<compile_context>
chip_gen: v7x
topology: tpu7x:2x2x1
jax: 0.10.0
libtpu: 0.0.40
codegen_flags: <defaults>
</compile_context>

<pallas_src>
import functools

import jax
import jax.numpy as jnp
from jax import lax
from jax.experimental import pallas as pl
from jax.experimental.pallas import tpu as pltpu


# ----------------------------------------------------------------------------
# Fused kernel: one batch element per grid step, all heads inside the body.
# ----------------------------------------------------------------------------
def _dis_attention_kernel(x_ref, wqkv_ref, wout_ref, bout_ref,
                          mu_ref, ls_ref, attn_ref, o_sc, *, num_heads):
    _, N, C = x_ref.shape
    H = num_heads
    Dh = C // H

    # --- QKV projection: bf16 operands, f32 accumulation (qkv_bias=False).
    # The softmax scale is already folded into the q-columns of Wqkv.
    x = x_ref[0].astype(jnp.bfloat16)                               # (N, C)
    qkv = jnp.dot(x, wqkv_ref[...],
                  preferred_element_type=jnp.float32)               # (N, 3C) f32
    qkv = qkv.astype(jnp.bfloat16)                                  # operands for per-head MXU ops

    # --- per-head attention; static unroll, results land in VMEM scratch so
    # temporaries do not stay live until a final concat.
    for h in range(H):
        qh = qkv[:, h * Dh:(h + 1) * Dh]                            # (N, Dh), pre-scaled
        kh = qkv[:, C + h * Dh:C + (h + 1) * Dh]                    # (N, Dh)
        vh = qkv[:, 2 * C + h * Dh:2 * C + (h + 1) * Dh]            # (N, Dh)

        # s[n, m] = sum_d q[n, d] * k[m, d]   (contract last dims, no transpose)
        s = lax.dot_general(
            qh, kh,
            dimension_numbers=(((1,), (1,)), ((), ())),
            preferred_element_type=jnp.float32,
        )                                                           # (N, N) f32

        # numerically-stable softmax in f32; exact divide (attn is returned).
        s = s - jnp.max(s, axis=-1, keepdims=True)
        e = jnp.exp(s)
        p = e / jnp.sum(e, axis=-1, keepdims=True)

        attn_ref[0, h] = p.astype(attn_ref.dtype)

        o_h = jnp.dot(p.astype(jnp.bfloat16), vh,
                      preferred_element_type=jnp.float32)           # (N, Dh) f32
        o_sc[:, h * Dh:(h + 1) * Dh] = o_h.astype(o_sc.dtype)

    # --- single merged output projection (dropout p=0.0 -> identity):
    # out = o @ [pad(Wmu) | pad(Wls)] + [bmu | bls]; split at lane C (tile-aligned).
    out = jnp.dot(o_sc[...], wout_ref[...],
                  preferred_element_type=jnp.float32) + bout_ref[...]   # (N, 2C) f32
    mu_ref[0] = out[:, :C].astype(mu_ref.dtype)
    ls_ref[0] = out[:, C:].astype(ls_ref.dtype)


def dis_attention_forward(x, params, num_heads):
    B, N, C = x.shape
    H = num_heads
    Dh = C // H
    half = C // 2
    assert C % H == 0 and C % 2 == 0
    scale = float((C * H) ** (-0.5))   # module quirk: head_dim = dim * num_heads

    # Fold softmax scale into Wqkv's q-columns (free), then cast weights to
    # bf16 (MXU-native; f32 matmuls lower to multi-pass decompositions).
    wqkv = params["Wqkv"].astype(jnp.float32)
    wqkv = wqkv.at[:, :C].multiply(scale).astype(jnp.bfloat16)          # (C, 3C)

    # Merge + zero-pad the two output projections into one (C, 2C) weight so a
    # single 128-deep contraction replaces two 64-lane-sliced half matmuls.
    wout = jnp.zeros((C, 2 * C), jnp.float32)
    wout = wout.at[:half, :C].set(params["Wmu"])
    wout = wout.at[half:, C:].set(params["Wls"])
    wout = wout.astype(jnp.bfloat16)                                    # (C, 2C)
    bout = jnp.concatenate([params["bmu"], params["bls"]]).astype(jnp.float32)
    bout = bout.reshape(1, 2 * C)

    kern = functools.partial(_dis_attention_kernel, num_heads=H)

    # Advisory cost estimate for the XLA scheduler.
    flops = B * (2 * N * C * 3 * C               # qkv projection
                 + H * 2 * 2 * N * N * Dh        # q@k^T and attn@v
                 + 2 * N * C * 2 * C)            # merged mu/logsigma projection
    bytes_accessed = (4 * x.size + 2 * wqkv.size + 2 * wout.size + 4 * bout.size
                      + 4 * 2 * B * N * C + 4 * B * H * N * N)
    cost = pl.CostEstimate(flops=flops,
                           transcendentals=B * H * N * N,
                           bytes_accessed=bytes_accessed)

    mu, logsigma, attn = pl.pallas_call(
        kern,
        out_shape=(
            jax.ShapeDtypeStruct((B, N, C), x.dtype),
            jax.ShapeDtypeStruct((B, N, C), x.dtype),
            # TODO(synk): emit attn as bf16 if downstream tolerates it (halves
            # the dominant O(B*H*N^2) HBM write); kept x.dtype to match module.
            jax.ShapeDtypeStruct((B, H, N, N), x.dtype),
        ),
        grid=(B,),
        in_specs=[
            pl.BlockSpec((1, N, C), lambda b: (b, 0, 0)),     # x (one batch / step)
            pl.BlockSpec((C, 3 * C), lambda b: (0, 0)),       # Wqkv (bf16, resident)
            pl.BlockSpec((C, 2 * C), lambda b: (0, 0)),       # merged Wout (bf16)
            pl.BlockSpec((1, 2 * C), lambda b: (0, 0)),       # merged bias (f32)
        ],
        out_specs=(
            pl.BlockSpec((1, N, C), lambda b: (b, 0, 0)),         # mu
            pl.BlockSpec((1, N, C), lambda b: (b, 0, 0)),         # logsigma
            pl.BlockSpec((1, H, N, N), lambda b: (b, 0, 0, 0)),   # attn
        ),
        scratch_shapes=[pltpu.VMEM((N, C), jnp.bfloat16)],        # o (heads interleaved)
        compiler_params=pltpu.CompilerParams(
            dimension_semantics=("parallel",),
            vmem_limit_bytes=16 * 1024 * 1024,
        ),
        cost_estimate=cost,
    )(x, wqkv, wout, bout)
    return mu, logsigma, attn


# ----------------------------------------------------------------------------
# Pure-JAX f32 reference (for verification)
# ----------------------------------------------------------------------------
def dis_attention_ref(x, params, num_heads):
    B, N, C = x.shape
    H = num_heads
    Dh = C // H
    scale = float((C * H) ** (-0.5))

    qkv = x @ params["Wqkv"]                     # qkv_bias=False
    qkv = qkv.reshape(B, N, 3, H, Dh).transpose(2, 0, 3, 1, 4)
    q, k, v = qkv[0], qkv[1], qkv[2]
    attn = jnp.einsum("bhnd,bhmd->bhnm", q, k) * scale
    attn = jax.nn.softmax(attn, axis=-1)
    o = jnp.einsum("bhnm,bhmd->bhnd", attn, v)
    o = o.transpose(0, 2, 1, 3).reshape(B, N, C).reshape(B, N, 2, C // 2)
    mu = o[:, :, 0, :] @ params["Wmu"] + params["bmu"]
    ls = o[:, :, 1, :] @ params["Wls"] + params["bls"]
    return mu, ls, attn


if __name__ == "__main__":
    # Small shapes consistent with the module: B=2 batches, N=128 tokens,
    # C=128 channels, num_heads=8 (default) -> per-head dim 16, C/2 = 64.
    # N = C = 128 keeps every output lane-dense.
    B, N, C, H = 2, 128, 128, 8
    dtype = jnp.float32

    key = jax.random.PRNGKey(0)
    kx, k1, k2, k3, k4, k5 = jax.random.split(key, 6)

    x = jax.random.normal(kx, (B, N, C), dtype=dtype)
    params = {
        # qkv: Linear(dim, 3*dim, bias=False) -> weight stored as (in, out)
        "Wqkv": jax.random.normal(k1, (C, 3 * C), dtype=dtype) * 0.02,
        # mu_proj: Linear(dim/2, dim)
        "Wmu": jax.random.normal(k2, (C // 2, C), dtype=dtype) * 0.02,
        "bmu": jax.random.normal(k3, (C,), dtype=dtype) * 0.02,
        # logsig_proj: Linear(dim/2, dim)
        "Wls": jax.random.normal(k4, (C // 2, C), dtype=dtype) * 0.02,
        "bls": jax.random.normal(k5, (C,), dtype=dtype) * 0.02,
    }

    fwd = jax.jit(lambda xx, pp: dis_attention_forward(xx, pp, num_heads=H))
    mu, logsigma, attn = jax.block_until_ready(fwd(x, params))

    mu_r, ls_r, attn_r = dis_attention_ref(x, params, num_heads=H)
    assert mu.shape == (B, N, C) and logsigma.shape == (B, N, C)
    assert attn.shape == (B, H, N, N)
    # bf16 MXU operands (f32 accumulation) -> slightly looser tolerance than
    # the bit-exact f32 reference; softmax itself stays in f32.
    assert jnp.allclose(attn, attn_r, atol=2e-3, rtol=2e-3)
    assert jnp.allclose(mu, mu_r, atol=3e-3, rtol=3e-3)
    assert jnp.allclose(logsigma, ls_r, atol=3e-3, rtol=3e-3)

    print("KERNEL_OK")
</pallas_src>

<mosaic_0001>
module attributes {stable_mosaic.version = 11 : i64} {
  func.func @_dis_attention_kernel(%arg0: i32, %arg1: memref<1x128x128xf32, #tpu.memory_space<vmem>>, %arg2: memref<128x384xbf16, #tpu.memory_space<vmem>>, %arg3: memref<128x256xbf16, #tpu.memory_space<vmem>>, %arg4: memref<1x256xf32, #tpu.memory_space<vmem>>, %arg5: memref<1x128x128xf32, #tpu.memory_space<vmem>>, %arg6: memref<1x128x128xf32, #tpu.memory_space<vmem>>, %arg7: memref<1x8x128x128xf32, #tpu.memory_space<vmem>>, %arg8: memref<128x128xbf16, #tpu.memory_space<vmem>>) attributes {dimension_semantics = [#tpu.dimension_semantics<parallel>], iteration_bounds = array<i64: 2>, scalar_prefetch = 0 : i64, scratch_operands = 1 : i64, tpu.core_type = #tpu.core_type<tc>, window_params = [{transform_indices = @transform_0, window_bounds = array<i64: 1, 128, 128>}, {pipeline_mode = #tpu.pipeline_mode<synchronous>, transform_indices = @transform_1, window_bounds = array<i64: 128, 384>}, {pipeline_mode = #tpu.pipeline_mode<synchronous>, transform_indices = @transform_2, window_bounds = array<i64: 128, 256>}, {pipeline_mode = #tpu.pipeline_mode<synchronous>, transform_indices = @transform_3, window_bounds = array<i64: 1, 256>}, {transform_indices = @transform_4, window_bounds = array<i64: 1, 128, 128>}, {transform_indices = @transform_5, window_bounds = array<i64: 1, 128, 128>}, {transform_indices = @transform_6, window_bounds = array<i64: 1, 8, 128, 128>}]} {
    %c0 = arith.constant 0 : index
    %c0_0 = arith.constant 0 : index
    %c0_1 = arith.constant 0 : index
    %0 = vector.load %arg1[%c0, %c0_0, %c0_1] : memref<1x128x128xf32, #tpu.memory_space<vmem>>, vector<1x128x128xf32>
    %1 = vector.shape_cast %0 : vector<1x128x128xf32> to vector<128x128xf32>
    %2 = arith.truncf %1 : vector<128x128xf32> to vector<128x128xbf16>
    %c0_2 = arith.constant 0 : index
    %c0_3 = arith.constant 0 : index
    %3 = vector.load %arg2[%c0_2, %c0_3] : memref<128x384xbf16, #tpu.memory_space<vmem>>, vector<128x384xbf16>
    %cst = arith.constant dense<0.000000e+00> : vector<128x384xf32>
    %4 = tpu.matmul %2, %3, %cst {dimension_numbers = #tpu.dot_dimension_numbers<[1], [0], [0], [1], [0, 0, 1, 1], [], []>} : vector<128x128xbf16>, vector<128x384xbf16>, vector<128x384xf32> -> vector<128x384xf32>
    %5 = arith.truncf %4 : vector<128x384xf32> to vector<128x384xbf16>
    %6 = vector.extract_strided_slice %5 {offsets = [0, 0], sizes = [128, 16], strides = [1, 1]} : vector<128x384xbf16> to vector<128x16xbf16>
    %7 = vector.extract_strided_slice %5 {offsets = [0, 128], sizes = [128, 16], strides = [1, 1]} : vector<128x384xbf16> to vector<128x16xbf16>
    %8 = vector.extract_strided_slice %5 {offsets = [0, 256], sizes = [128, 16], strides = [1, 1]} : vector<128x384xbf16> to vector<128x16xbf16>
    %cst_4 = arith.constant dense<0.000000e+00> : vector<128x128xf32>
    %9 = tpu.matmul %6, %7, %cst_4 {dimension_numbers = #tpu.dot_dimension_numbers<[1], [1], [0], [0], [0, 0, 1, 0], [], []>} : vector<128x16xbf16>, vector<128x16xbf16>, vector<128x128xf32> -> vector<128x128xf32>
    %cst_5 = arith.constant dense<0xFF800000> : vector<128xf32>
    %10 = vector.multi_reduction <maximumf>, %9, %cst_5 [1] : vector<128x128xf32> to vector<128xf32>
    %11 = vector.shape_cast %10 : vector<128xf32> to vector<128x1xf32>
    %12 = vector.broadcast %11 : vector<128x1xf32> to vector<128x128xf32>
    %13 = arith.subf %9, %12 : vector<128x128xf32>
    %14 = math.exp %13 : vector<128x128xf32>
    %cst_6 = arith.constant dense<0.000000e+00> : vector<128xf32>
    %15 = vector.multi_reduction <add>, %14, %cst_6 [1] : vector<128x128xf32> to vector<128xf32>
    %16 = vector.shape_cast %15 : vector<128xf32> to vector<128x1xf32>
    %17 = vector.broadcast %16 : vector<128x1xf32> to vector<128x128xf32>
    %18 = arith.divf %14, %17 : vector<128x128xf32>
    %c0_7 = arith.constant 0 : index
    %c0_8 = arith.constant 0 : index
    %c0_9 = arith.constant 0 : index
    %c0_10 = arith.constant 0 : index
    %19 = vector.load %arg7[%c0_7, %c0_8, %c0_9, %c0_10] : memref<1x8x128x128xf32, #tpu.memory_space<vmem>>, vector<1x1x128x128xf32>
    %20 = vector.shape_cast %19 : vector<1x1x128x128xf32> to vector<128x128xf32>
    %21 = vector.shape_cast %18 : vector<128x128xf32> to vector<1x1x128x128xf32>
    tpu.vector_store %arg7[%c0_7, %c0_8, %c0_9, %c0_10], %21 {strides = array<i32>} : memref<1x8x128x128xf32, #tpu.memory_space<vmem>>, vector<1x1x128x128xf32>,
    %22 = arith.truncf %18 : vector<128x128xf32> to vector<128x128xbf16>
    %cst_11 = arith.constant dense<0.000000e+00> : vector<128x16xf32>
    %23 = tpu.matmul %22, %8, %cst_11 {dimension_numbers = #tpu.dot_dimension_numbers<[1], [0], [0], [1], [0, 0, 1, 1], [], []>} : vector<128x128xbf16>, vector<128x16xbf16>, vector<128x16xf32> -> vector<128x16xf32>
    %24 = arith.truncf %23 : vector<128x16xf32> to vector<128x16xbf16>
    %c0_12 = arith.constant 0 : index
    %c0_13 = arith.constant 0 : index
    %25 = vector.load %arg8[%c0_12, %c0_13] : memref<128x128xbf16, #tpu.memory_space<vmem>>, vector<128x16xbf16>
    tpu.vector_store %arg8[%c0_12, %c0_13], %24 {strides = array<i32>} : memref<128x128xbf16, #tpu.memory_space<vmem>>, vector<128x16xbf16>,
    %26 = vector.extract_strided_slice %5 {offsets = [0, 16], sizes = [128, 16], strides = [1, 1]} : vector<128x384xbf16> to vector<128x16xbf16>
    %27 = vector.extract_strided_slice %5 {offsets = [0, 144], sizes = [128, 16], strides = [1, 1]} : vector<128x384xbf16> to vector<128x16xbf16>
    %28 = vector.extract_strided_slice %5 {offsets = [0, 272], sizes = [128, 16], strides = [1, 1]} : vector<128x384xbf16> to vector<128x16xbf16>
    %cst_14 = arith.constant dense<0.000000e+00> : vector<128x128xf32>
    %29 = tpu.matmul %26, %27, %cst_14 {dimension_numbers = #tpu.dot_dimension_numbers<[1], [1], [0], [0], [0, 0, 1, 0], [], []>} : vector<128x16xbf16>, vector<128x16xbf16>, vector<128x128xf32> -> vector<128x128xf32>
    %cst_15 = arith.constant dense<0xFF800000> : vector<128xf32>
    %30 = vector.multi_reduction <maximumf>, %29, %cst_15 [1] : vector<128x128xf32> to vector<128xf32>
    %31 = vector.shape_cast %30 : vector<128xf32> to vector<128x1xf32>
    %32 = vector.broadcast %31 : vector<128x1xf32> to vector<128x128xf32>
    %33 = arith.subf %29, %32 : vector<128x128xf32>
    %34 = math.exp %33 : vector<128x128xf32>
    %cst_16 = arith.constant dense<0.000000e+00> : vector<128xf32>
    %35 = vector.multi_reduction <add>, %34, %cst_16 [1] : vector<128x128xf32> to vector<128xf32>
    %36 = vector.shape_cast %35 : vector<128xf32> to vector<128x1xf32>
    %37 = vector.broadcast %36 : vector<128x1xf32> to vector<128x128xf32>
    %38 = arith.divf %34, %37 : vector<128x128xf32>
    %c0_17 = arith.constant 0 : index
    %c1 = arith.constant 1 : index
    %c0_18 = arith.constant 0 : index
    %c0_19 = arith.constant 0 : index
    %39 = vector.load %arg7[%c0_17, %c1, %c0_18, %c0_19] : memref<1x8x128x128xf32, #tpu.memory_space<vmem>>, vector<1x1x128x128xf32>
    %40 = vector.shape_cast %39 : vector<1x1x128x128xf32> to vector<128x128xf32>
    %41 = vector.shape_cast %38 : vector<128x128xf32> to vector<1x1x128x128xf32>
    tpu.vector_store %arg7[%c0_17, %c1, %c0_18, %c0_19], %41 {strides = array<i32>} : memref<1x8x128x128xf32, #tpu.memory_space<vmem>>, vector<1x1x128x128xf32>,
    %42 = arith.truncf %38 : vector<128x128xf32> to vector<128x128xbf16>
    %cst_20 = arith.constant dense<0.000000e+00> : vector<128x16xf32>
    %43 = tpu.matmul %42, %28, %cst_20 {dimension_numbers = #tpu.dot_dimension_numbers<[1], [0], [0], [1], [0, 0, 1, 1], [], []>} : vector<128x128xbf16>, vector<128x16xbf16>, vector<128x16xf32> -> vector<128x16xf32>
    %44 = arith.truncf %43 : vector<128x16xf32> to vector<128x16xbf16>
    %c0_21 = arith.constant 0 : index
    %c16 = arith.constant 16 : index
    %45 = vector.load %arg8[%c0_21, %c16] : memref<128x128xbf16, #tpu.memory_space<vmem>>, vector<128x16xbf16>
    tpu.vector_store %arg8[%c0_21, %c16], %44 {strides = array<i32>} : memref<128x128xbf16, #tpu.memory_space<vmem>>, vector<128x16xbf16>,
    %46 = vector.extract_strided_slice %5 {offsets = [0, 32], sizes = [128, 16], strides = [1, 1]} : vector<128x384xbf16> to vector<128x16xbf16>
    %47 = vector.extract_strided_slice %5 {offsets = [0, 160], sizes = [128, 16], strides = [1, 1]} : vector<128x384xbf16> to vector<128x16xbf16>
    %48 = vector.extract_strided_slice %5 {offsets = [0, 288], sizes = [128, 16], strides = [1, 1]} : vector<128x384xbf16> to vector<128x16xbf16>
    %cst_22 = arith.constant dense<0.000000e+00> : vector<128x128xf32>
    %49 = tpu.matmul %46, %47, %cst_22 {dimension_numbers = #tpu.dot_dimension_numbers<[1], [1], [0], [0], [0, 0, 1, 0], [], []>} : vector<128x16xbf16>, vector<128x16xbf16>, vector<128x128xf32> -> vector<128x128xf32>
    %cst_23 = arith.constant dense<0xFF800000> : vector<128xf32>
    %50 = vector.multi_reduction <maximumf>, %49, %cst_23 [1] : vector<128x128xf32> to vector<128xf32>
    %51 = vector.shape_cast %50 : vector<128xf32> to vector<128x1xf32>
    %52 = vector.broadcast %51 : vector<128x1xf32> to vector<128x128xf32>
    %53 = arith.subf %49, %52 : vector<128x128xf32>
    %54 = math.exp %53 : vector<128x128xf32>
    %cst_24 = arith.constant dense<0.000000e+00> : vector<128xf32>
    %55 = vector.multi_reduction <add>, %54, %cst_24 [1] : vector<128x128xf32> to vector<128xf32>
    %56 = vector.shape_cast %55 : vector<128xf32> to vector<128x1xf32>
    %57 = vector.broadcast %56 : vector<128x1xf32> to vector<128x128xf32>
    %58 = arith.divf %54, %57 : vector<128x128xf32>
    %c0_25 = arith.constant 0 : index
    %c2 = arith.constant 2 : index
    %c0_26 = arith.constant 0 : index
    %c0_27 = arith.constant 0 : index
    %59 = vector.load %arg7[%c0_25, %c2, %c0_26, %c0_27] : memref<1x8x128x128xf32, #tpu.memory_space<vmem>>, vector<1x1x128x128xf32>
    %60 = vector.shape_cast %59 : vector<1x1x128x128xf32> to vector<128x128xf32>
    %61 = vector.shape_cast %58 : vector<128x128xf32> to vector<1x1x128x128xf32>
    tpu.vector_store %arg7[%c0_25, %c2, %c0_26, %c0_27], %61 {strides = array<i32>} : memref<1x8x128x128xf32, #tpu.memory_space<vmem>>, vector<1x1x128x128xf32>,
    %62 = arith.truncf %58 : vector<128x128xf32> to vector<128x128xbf16>
    %cst_28 = arith.constant dense<0.000000e+00> : vector<128x16xf32>
    %63 = tpu.matmul %62, %48, %cst_28 {dimension_numbers = #tpu.dot_dimension_numbers<[1], [0], [0], [1], [0, 0, 1, 1], [], []>} : vector<128x128xbf16>, vector<128x16xbf16>, vector<128x16xf32> -> vector<128x16xf32>
    %64 = arith.truncf %63 : vector<128x16xf32> to vector<128x16xbf16>
    %c0_29 = arith.constant 0 : index
    %c32 = arith.constant 32 : index
    %65 = vector.load %arg8[%c0_29, %c32] : memref<128x128xbf16, #tpu.memory_space<vmem>>, vector<128x16xbf16>
    tpu.vector_store %arg8[%c0_29, %c32], %64 {strides = array<i32>} : memref<128x128xbf16, #tpu.memory_space<vmem>>, vector<128x16xbf16>,
    %66 = vector.extract_strided_slice %5 {offsets = [0, 48], sizes = [128, 16], strides = [1, 1]} : vector<128x384xbf16> to vector<128x16xbf16>
    %67 = vector.extract_strided_slice %5 {offsets = [0, 176], sizes = [128, 16], strides = [1, 1]} : vector<128x384xbf16> to vector<128x16xbf16>
    %68 = vector.extract_strided_slice %5 {offsets = [0, 304], sizes = [128, 16], strides = [1, 1]} : vector<128x384xbf16> to vector<128x16xbf16>
    %cst_30 = arith.constant dense<0.000000e+00> : vector<128x128xf32>
    %69 = tpu.matmul %66, %67, %cst_30 {dimension_numbers = #tpu.dot_dimension_numbers<[1], [1], [0], [0], [0, 0, 1, 0], [], []>} : vector<128x16xbf16>, vector<128x16xbf16>, vector<128x128xf32> -> vector<128x128xf32>
    %cst_31 = arith.constant dense<0xFF800000> : vector<128xf32>
    %70 = vector.multi_reduction <maximumf>, %69, %cst_31 [1] : vector<128x128xf32> to vector<128xf32>
    %71 = vector.shape_cast %70 : vector<128xf32> to vector<128x1xf32>
    %72 = vector.broadcast %71 : vector<128x1xf32> to vector<128x128xf32>
    %73 = arith.subf %69, %72 : vector<128x128xf32>
    %74 = math.exp %73 : vector<128x128xf32>
    %cst_32 = arith.constant dense<0.000000e+00> : vector<128xf32>
    %75 = vector.multi_reduction <add>, %74, %cst_32 [1] : vector<128x128xf32> to vector<128xf32>
    %76 = vector.shape_cast %75 : vector<128xf32> to vector<128x1xf32>
    %77 = vector.broadcast %76 : vector<128x1xf32> to vector<128x128xf32>
    %78 = arith.divf %74, %77 : vector<128x128xf32>
    %c0_33 = arith.constant 0 : index
    %c3 = arith.constant 3 : index
    %c0_34 = arith.constant 0 : index
    %c0_35 = arith.constant 0 : index
    %79 = vector.load %arg7[%c0_33, %c3, %c0_34, %c0_35] : memref<1x8x128x128xf32, #tpu.memory_space<vmem>>, vector<1x1x128x128xf32>
    %80 = vector.shape_cast %79 : vector<1x1x128x128xf32> to vector<128x128xf32>
    %81 = vector.shape_cast %78 : vector<128x128xf32> to vector<1x1x128x128xf32>
    tpu.vector_store %arg7[%c0_33, %c3, %c0_34, %c0_35], %81 {strides = array<i32>} : memref<1x8x128x128xf32, #tpu.memory_space<vmem>>, vector<1x1x128x128xf32>,
    %82 = arith.truncf %78 : vector<128x128xf32> to vector<128x128xbf16>
    %cst_36 = arith.constant dense<0.000000e+00> : vector<128x16xf32>
    %83 = tpu.matmul %82, %68, %cst_36 {dimension_numbers = #tpu.dot_dimension_numbers<[1], [0], [0], [1], [0, 0, 1, 1], [], []>} : vector<128x128xbf16>, vector<128x16xbf16>, vector<128x16xf32> -> vector<128x16xf32>
    %84 = arith.truncf %83 : vector<128x16xf32> to vector<128x16xbf16>
    %c0_37 = arith.constant 0 : index
    %c48 = arith.constant 48 : index
    %85 = vector.load %arg8[%c0_37, %c48] : memref<128x128xbf16, #tpu.memory_space<vmem>>, vector<128x16xbf16>
    tpu.vector_store %arg8[%c0_37, %c48], %84 {strides = array<i32>} : memref<128x128xbf16, #tpu.memory_space<vmem>>, vector<128x16xbf16>,
    %86 = vector.extract_strided_slice %5 {offsets = [0, 64], sizes = [128, 16], strides = [1, 1]} : vector<128x384xbf16> to vector<128x16xbf16>
    %87 = vector.extract_strided_slice %5 {offsets = [0, 192], sizes = [128, 16], strides = [1, 1]} : vector<128x384xbf16> to vector<128x16xbf16>
    %88 = vector.extract_strided_slice %5 {offsets = [0, 320], sizes = [128, 16], strides = [1, 1]} : vector<128x384xbf16> to vector<128x16xbf16>
    %cst_38 = arith.constant dense<0.000000e+00> : vector<128x128xf32>
    %89 = tpu.matmul %86, %87, %cst_38 {dimension_numbers = #tpu.dot_dimension_numbers<[1], [1], [0], [0], [0, 0, 1, 0], [], []>} : vector<128x16xbf16>, vector<128x16xbf16>, vector<128x128xf32> -> vector<128x128xf32>
    %cst_39 = arith.constant dense<0xFF800000> : vector<128xf32>
    %90 = vector.multi_reduction <maximumf>, %89, %cst_39 [1] : vector<128x128xf32> to vector<128xf32>
    %91 = vector.shape_cast %90 : vector<128xf32> to vector<128x1xf32>
    %92 = vector.broadcast %91 : vector<128x1xf32> to vector<128x128xf32>
    %93 = arith.subf %89, %92 : vector<128x128xf32>
    %94 = math.exp %93 : vector<128x128xf32>
    %cst_40 = arith.constant dense<0.000000e+00> : vector<128xf32>
    %95 = vector.multi_reduction <add>, %94, %cst_40 [1] : vector<128x128xf32> to vector<128xf32>
    %96 = vector.shape_cast %95 : vector<128xf32> to vector<128x1xf32>
    %97 = vector.broadcast %96 : vector<128x1xf32> to vector<128x128xf32>
    %98 = arith.divf %94, %97 : vector<128x128xf32>
    %c0_41 = arith.constant 0 : index
    %c4 = arith.constant 4 : index
    %c0_42 = arith.constant 0 : index
    %c0_43 = arith.constant 0 : index
    %99 = vector.load %arg7[%c0_41, %c4, %c0_42, %c0_43] : memref<1x8x128x128xf32, #tpu.memory_space<vmem>>, vector<1x1x128x128xf32>
    %100 = vector.shape_cast %99 : vector<1x1x128x128xf32> to vector<128x128xf32>
    %101 = vector.shape_cast %98 : vector<128x128xf32> to vector<1x1x128x128xf32>
    tpu.vector_store %arg7[%c0_41, %c4, %c0_42, %c0_43], %101 {strides = array<i32>} : memref<1x8x128x128xf32, #tpu.memory_space<vmem>>, vector<1x1x128x128xf32>,
    %102 = arith.truncf %98 : vector<128x128xf32> to vector<128x128xbf16>
    %cst_44 = arith.constant dense<0.000000e+00> : vector<128x16xf32>
    %103 = tpu.matmul %102, %88, %cst_44 {dimension_numbers = #tpu.dot_dimension_numbers<[1], [0], [0], [1], [0, 0, 1, 1], [], []>} : vector<128x128xbf16>, vector<128x16xbf16>, vector<128x16xf32> -> vector<128x16xf32>
    %104 = arith.truncf %103 : vector<128x16xf32> to vector<128x16xbf16>
    %c0_45 = arith.constant 0 : index
    %c64 = arith.constant 64 : index
    %105 = vector.load %arg8[%c0_45, %c64] : memref<128x128xbf16, #tpu.memory_space<vmem>>, vector<128x16xbf16>
    tpu.vector_store %arg8[%c0_45, %c64], %104 {strides = array<i32>} : memref<128x128xbf16, #tpu.memory_space<vmem>>, vector<128x16xbf16>,
    %106 = vector.extract_strided_slice %5 {offsets = [0, 80], sizes = [128, 16], strides = [1, 1]} : vector<128x384xbf16> to vector<128x16xbf16>
    %107 = vector.extract_strided_slice %5 {offsets = [0, 208], sizes = [128, 16], strides = [1, 1]} : vector<128x384xbf16> to vector<128x16xbf16>
    %108 = vector.extract_strided_slice %5 {offsets = [0, 336], sizes = [128, 16], strides = [1, 1]} : vector<128x384xbf16> to vector<128x16xbf16>
    %cst_46 = arith.constant dense<0.000000e+00> : vector<128x128xf32>
    %109 = tpu.matmul %106, %107, %cst_46 {dimension_numbers = #tpu.dot_dimension_numbers<[1], [1], [0], [0], [0, 0, 1, 0], [], []>} : vector<128x16xbf16>, vector<128x16xbf16>, vector<128x128xf32> -> vector<128x128xf32>
    %cst_47 = arith.constant dense<0xFF800000> : vector<128xf32>
    %110 = vector.multi_reduction <maximumf>, %109, %cst_47 [1] : vector<128x128xf32> to vector<128xf32>
    %111 = vector.shape_cast %110 : vector<128xf32> to vector<128x1xf32>
    %112 = vector.broadcast %111 : vector<128x1xf32> to vector<128x128xf32>
    %113 = arith.subf %109, %112 : vector<128x128xf32>
    %114 = math.exp %113 : vector<128x128xf32>
    %cst_48 = arith.constant dense<0.000000e+00> : vector<128xf32>
    %115 = vector.multi_reduction <add>, %114, %cst_48 [1] : vector<128x128xf32> to vector<128xf32>
    %116 = vector.shape_cast %115 : vector<128xf32> to vector<128x1xf32>
    %117 = vector.broadcast %116 : vector<128x1xf32> to vector<128x128xf32>
    %118 = arith.divf %114, %117 : vector<128x128xf32>
    %c0_49 = arith.constant 0 : index
    %c5 = arith.constant 5 : index
    %c0_50 = arith.constant 0 : index
    %c0_51 = arith.constant 0 : index
    %119 = vector.load %arg7[%c0_49, %c5, %c0_50, %c0_51] : memref<1x8x128x128xf32, #tpu.memory_space<vmem>>, vector<1x1x128x128xf32>
    %120 = vector.shape_cast %119 : vector<1x1x128x128xf32> to vector<128x128xf32>
    %121 = vector.shape_cast %118 : vector<128x128xf32> to vector<1x1x128x128xf32>
    tpu.vector_store %arg7[%c0_49, %c5, %c0_50, %c0_51], %121 {strides = array<i32>} : memref<1x8x128x128xf32, #tpu.memory_space<vmem>>, vector<1x1x128x128xf32>,
    %122 = arith.truncf %118 : vector<128x128xf32> to vector<128x128xbf16>
    %cst_52 = arith.constant dense<0.000000e+00> : vector<128x16xf32>
    %123 = tpu.matmul %122, %108, %cst_52 {dimension_numbers = #tpu.dot_dimension_numbers<[1], [0], [0], [1], [0, 0, 1, 1], [], []>} : vector<128x128xbf16>, vector<128x16xbf16>, vector<128x16xf32> -> vector<128x16xf32>
    %124 = arith.truncf %123 : vector<128x16xf32> to vector<128x16xbf16>
    %c0_53 = arith.constant 0 : index
    %c80 = arith.constant 80 : index
    %125 = vector.load %arg8[%c0_53, %c80] : memref<128x128xbf16, #tpu.memory_space<vmem>>, vector<128x16xbf16>
    tpu.vector_store %arg8[%c0_53, %c80], %124 {strides = array<i32>} : memref<128x128xbf16, #tpu.memory_space<vmem>>, vector<128x16xbf16>,
    %126 = vector.extract_strided_slice %5 {offsets = [0, 96], sizes = [128, 16], strides = [1, 1]} : vector<128x384xbf16> to vector<128x16xbf16>
    %127 = vector.extract_strided_slice %5 {offsets = [0, 224], sizes = [128, 16], strides = [1, 1]} : vector<128x384xbf16> to vector<128x16xbf16>
    %128 = vector.extract_strided_slice %5 {offsets = [0, 352], sizes = [128, 16], strides = [1, 1]} : vector<128x384xbf16> to vector<128x16xbf16>
    %cst_54 = arith.constant dense<0.000000e+00> : vector<128x128xf32>
    %129 = tpu.matmul %126, %127, %cst_54 {dimension_numbers = #tpu.dot_dimension_numbers<[1], [1], [0], [0], [0, 0, 1, 0], [], []>} : vector<128x16xbf16>, vector<128x16xbf16>, vector<128x128xf32> -> vector<128x128xf32>
    %cst_55 = arith.constant dense<0xFF800000> : vector<128xf32>
    %130 = vector.multi_reduction <maximumf>, %129, %cst_55 [1] : vector<128x128xf32> to vector<128xf32>
    %131 = vector.shape_cast %130 : vector<128xf32> to vector<128x1xf32>
    %132 = vector.broadcast %131 : vector<128x1xf32> to vector<128x128xf32>
    %133 = arith.subf %129, %132 : vector<128x128xf32>
    %134 = math.exp %133 : vector<128x128xf32>
    %cst_56 = arith.constant dense<0.000000e+00> : vector<128xf32>
    %135 = vector.multi_reduction <add>, %134, %cst_56 [1] : vector<128x128xf32> to vector<128xf32>
    %136 = vector.shape_cast %135 : vector<128xf32> to vector<128x1xf32>
    %137 = vector.broadcast %136 : vector<128x1xf32> to vector<128x128xf32>
    %138 = arith.divf %134, %137 : vector<128x128xf32>
    %c0_57 = arith.constant 0 : index
    %c6 = arith.constant 6 : index
    %c0_58 = arith.constant 0 : index
    %c0_59 = arith.constant 0 : index
    %139 = vector.load %arg7[%c0_57, %c6, %c0_58, %c0_59] : memref<1x8x128x128xf32, #tpu.memory_space<vmem>>, vector<1x1x128x128xf32>
    %140 = vector.shape_cast %139 : vector<1x1x128x128xf32> to vector<128x128xf32>
    %141 = vector.shape_cast %138 : vector<128x128xf32> to vector<1x1x128x128xf32>
    tpu.vector_store %arg7[%c0_57, %c6, %c0_58, %c0_59], %141 {strides = array<i32>} : memref<1x8x128x128xf32, #tpu.memory_space<vmem>>, vector<1x1x128x128xf32>,
    %142 = arith.truncf %138 : vector<128x128xf32> to vector<128x128xbf16>
    %cst_60 = arith.constant dense<0.000000e+00> : vector<128x16xf32>
    %143 = tpu.matmul %142, %128, %cst_60 {dimension_numbers = #tpu.dot_dimension_numbers<[1], [0], [0], [1], [0, 0, 1, 1], [], []>} : vector<128x128xbf16>, vector<128x16xbf16>, vector<128x16xf32> -> vector<128x16xf32>
    %144 = arith.truncf %143 : vector<128x16xf32> to vector<128x16xbf16>
    %c0_61 = arith.constant 0 : index
    %c96 = arith.constant 96 : index
    %145 = vector.load %arg8[%c0_61, %c96] : memref<128x128xbf16, #tpu.memory_space<vmem>>, vector<128x16xbf16>
    tpu.vector_store %arg8[%c0_61, %c96], %144 {strides = array<i32>} : memref<128x128xbf16, #tpu.memory_space<vmem>>, vector<128x16xbf16>,
    %146 = vector.extract_strided_slice %5 {offsets = [0, 112], sizes = [128, 16], strides = [1, 1]} : vector<128x384xbf16> to vector<128x16xbf16>
    %147 = vector.extract_strided_slice %5 {offsets = [0, 240], sizes = [128, 16], strides = [1, 1]} : vector<128x384xbf16> to vector<128x16xbf16>
    %148 = vector.extract_strided_slice %5 {offsets = [0, 368], sizes = [128, 16], strides = [1, 1]} : vector<128x384xbf16> to vector<128x16xbf16>
    %cst_62 = arith.constant dense<0.000000e+00> : vector<128x128xf32>
    %149 = tpu.matmul %146, %147, %cst_62 {dimension_numbers = #tpu.dot_dimension_numbers<[1], [1], [0], [0], [0, 0, 1, 0], [], []>} : vector<128x16xbf16>, vector<128x16xbf16>, vector<128x128xf32> -> vector<128x128xf32>
    %cst_63 = arith.constant dense<0xFF800000> : vector<128xf32>
    %150 = vector.multi_reduction <maximumf>, %149, %cst_63 [1] : vector<128x128xf32> to vector<128xf32>
    %151 = vector.shape_cast %150 : vector<128xf32> to vector<128x1xf32>
    %152 = vector.broadcast %151 : vector<128x1xf32> to vector<128x128xf32>
    %153 = arith.subf %149, %152 : vector<128x128xf32>
    %154 = math.exp %153 : vector<128x128xf32>
    %cst_64 = arith.constant dense<0.000000e+00> : vector<128xf32>
    %155 = vector.multi_reduction <add>, %154, %cst_64 [1] : vector<128x128xf32> to vector<128xf32>
    %156 = vector.shape_cast %155 : vector<128xf32> to vector<128x1xf32>
    %157 = vector.broadcast %156 : vector<128x1xf32> to vector<128x128xf32>
    %158 = arith.divf %154, %157 : vector<128x128xf32>
    %c0_65 = arith.constant 0 : index
    %c7 = arith.constant 7 : index
    %c0_66 = arith.constant 0 : index
    %c0_67 = arith.constant 0 : index
    %159 = vector.load %arg7[%c0_65, %c7, %c0_66, %c0_67] : memref<1x8x128x128xf32, #tpu.memory_space<vmem>>, vector<1x1x128x128xf32>
    %160 = vector.shape_cast %159 : vector<1x1x128x128xf32> to vector<128x128xf32>
    %161 = vector.shape_cast %158 : vector<128x128xf32> to vector<1x1x128x128xf32>
    tpu.vector_store %arg7[%c0_65, %c7, %c0_66, %c0_67], %161 {strides = array<i32>} : memref<1x8x128x128xf32, #tpu.memory_space<vmem>>, vector<1x1x128x128xf32>,
    %162 = arith.truncf %158 : vector<128x128xf32> to vector<128x128xbf16>
    %cst_68 = arith.constant dense<0.000000e+00> : vector<128x16xf32>
    %163 = tpu.matmul %162, %148, %cst_68 {dimension_numbers = #tpu.dot_dimension_numbers<[1], [0], [0], [1], [0, 0, 1, 1], [], []>} : vector<128x128xbf16>, vector<128x16xbf16>, vector<128x16xf32> -> vector<128x16xf32>
    %164 = arith.truncf %163 : vector<128x16xf32> to vector<128x16xbf16>
    %c0_69 = arith.constant 0 : index
    %c112 = arith.constant 112 : index
    %165 = vector.load %arg8[%c0_69, %c112] : memref<128x128xbf16, #tpu.memory_space<vmem>>, vector<128x16xbf16>
    tpu.vector_store %arg8[%c0_69, %c112], %164 {strides = array<i32>} : memref<128x128xbf16, #tpu.memory_space<vmem>>, vector<128x16xbf16>,
    %c0_70 = arith.constant 0 : index
    %c0_71 = arith.constant 0 : index
    %166 = vector.load %arg8[%c0_70, %c0_71] : memref<128x128xbf16, #tpu.memory_space<vmem>>, vector<128x128xbf16>
    %c0_72 = arith.constant 0 : index
    %c0_73 = arith.constant 0 : index
    %167 = vector.load %arg3[%c0_72, %c0_73] : memref<128x256xbf16, #tpu.memory_space<vmem>>, vector<128x256xbf16>
    %cst_74 = arith.constant dense<0.000000e+00> : vector<128x256xf32>
    %168 = tpu.matmul %166, %167, %cst_74 {dimension_numbers = #tpu.dot_dimension_numbers<[1], [0], [0], [1], [0, 0, 1, 1], [], []>} : vector<128x128xbf16>, vector<128x256xbf16>, vector<128x256xf32> -> vector<128x256xf32>
    %c0_75 = arith.constant 0 : index
    %c0_76 = arith.constant 0 : index
    %169 = vector.load %arg4[%c0_75, %c0_76] : memref<1x256xf32, #tpu.memory_space<vmem>>, vector<1x256xf32>
    %170 = vector.broadcast %169 : vector<1x256xf32> to vector<128x256xf32>
    %171 = arith.addf %168, %170 : vector<128x256xf32>
    %172 = vector.extract_strided_slice %171 {offsets = [0, 0], sizes = [128, 128], strides = [1, 1]} : vector<128x256xf32> to vector<128x128xf32>
    %c0_77 = arith.constant 0 : index
    %c0_78 = arith.constant 0 : index
    %c0_79 = arith.constant 0 : index
    %173 = vector.load %arg5[%c0_77, %c0_78, %c0_79] : memref<1x128x128xf32, #tpu.memory_space<vmem>>, vector<1x128x128xf32>
    %174 = vector.shape_cast %173 : vector<1x128x128xf32> to vector<128x128xf32>
    %175 = vector.shape_cast %172 : vector<128x128xf32> to vector<1x128x128xf32>
    tpu.vector_store %arg5[%c0_77, %c0_78, %c0_79], %175 {strides = array<i32>} : memref<1x128x128xf32, #tpu.memory_space<vmem>>, vector<1x128x128xf32>,
    %176 = vector.extract_strided_slice %171 {offsets = [0, 128], sizes = [128, 128], strides = [1, 1]} : vector<128x256xf32> to vector<128x128xf32>
    %c0_80 = arith.constant 0 : index
    %c0_81 = arith.constant 0 : index
    %c0_82 = arith.constant 0 : index
    %177 = vector.load %arg6[%c0_80, %c0_81, %c0_82] : memref<1x128x128xf32, #tpu.memory_space<vmem>>, vector<1x128x128xf32>
    %178 = vector.shape_cast %177 : vector<1x128x128xf32> to vector<128x128xf32>
    %179 = vector.shape_cast %176 : vector<128x128xf32> to vector<1x128x128xf32>
    tpu.vector_store %arg6[%c0_80, %c0_81, %c0_82], %179 {strides = array<i32>} : memref<1x128x128xf32, #tpu.memory_space<vmem>>, vector<1x128x128xf32>,
    return
  }
  func.func @transform_0(%arg0: i32) -> (i32, i32, i32) {
    %c0_i32 = arith.constant 0 : i32
    %c0_i32_0 = arith.constant 0 : i32
    %c0_i32_1 = arith.constant 0 : i32
    return %arg0, %c0_i32, %c0_i32_0 : i32, i32, i32
  }
  func.func @transform_1(%arg0: i32) -> (i32, i32) {
    %c0_i32 = arith.constant 0 : i32
    %c0_i32_0 = arith.constant 0 : i32
    %c0_i32_1 = arith.constant 0 : i32
    return %c0_i32, %c0_i32_0 : i32, i32
  }
  func.func @transform_2(%arg0: i32) -> (i32, i32) {
    %c0_i32 = arith.constant 0 : i32
    %c0_i32_0 = arith.constant 0 : i32
    %c0_i32_1 = arith.constant 0 : i32
    return %c0_i32, %c0_i32_0 : i32, i32
  }
  func.func @transform_3(%arg0: i32) -> (i32, i32) {
    %c0_i32 = arith.constant 0 : i32
    %c0_i32_0 = arith.constant 0 : i32
    %c0_i32_1 = arith.constant 0 : i32
    return %c0_i32, %c0_i32_0 : i32, i32
  }
  func.func @transform_4(%arg0: i32) -> (i32, i32, i32) {
    %c0_i32 = arith.constant 0 : i32
    %c0_i32_0 = arith.constant 0 : i32
    %c0_i32_1 = arith.constant 0 : i32
    return %arg0, %c0_i32, %c0_i32_0 : i32, i32, i32
  }
  func.func @transform_5(%arg0: i32) -> (i32, i32, i32) {
    %c0_i32 = arith.constant 0 : i32
    %c0_i32_0 = arith.constant 0 : i32
    %c0_i32_1 = arith.constant 0 : i32
    return %arg0, %c0_i32, %c0_i32_0 : i32, i32, i32
  }
  func.func @transform_6(%arg0: i32) -> (i32, i32, i32, i32) {
    %c0_i32 = arith.constant 0 : i32
    %c0_i32_0 = arith.constant 0 : i32
    %c0_i32_1 = arith.constant 0 : i32
    %c0_i32_2 = arith.constant 0 : i32
    return %arg0, %c0_i32, %c0_i32_0, %c0_i32_1 : i32, i32, i32, i32
  }
}

</mosaic_0001>

<bundles_post_ra>
// kernel: _lambda_.1
= control target key start
LH: loop header
LB: loop body
LE: loop exit
PB: predicated region body
PF: predicated region fallthrough
CT: control target
= control target key end

     0   :  { %s9876_s0 = inlined_call_operand.vmem [shape: f32[2,128,128], index: 0, kind: input, shape index: {}]   ;;  %s9877_s1 = inlined_call_operand.vmem [shape: bf16[128,384], index: 1, kind: input, shape index: {}]   ;;  %s9878_s2 = inlined_call_operand.vmem [shape: bf16[128,256], index: 2, kind: input, shape index: {}]   ;;  %s9879_s3 = inlined_call_operand.vmem [shape: f32[1,256], index: 3, kind: input, shape index: {}]   ;;  %s9880_s4 = inlined_call_operand.hbm [shape: f32[2,128,128], index: 4, kind: output, shape index: {0}]   ;;  %s9881_s5 = inlined_call_operand.hbm [shape: f32[2,128,128], index: 5, kind: output, shape index: {1}]   ;;  %s9882_s6 = inlined_call_operand.hbm [shape: f32[2,8,128,128], index: 6, kind: output, shape index: {2}]  }
   0x1   :  { %9998 = sst [smem:[#allocation80_spill]] %s9876_s0 }
   0x2   :  { %9999 = sst [smem:[#allocation81_spill]] %s9877_s1 }
   0x3   :  { %12 = vsyncpa [#allocation4], 0 }
   0x4   :  { %14 = vsyncpa [#allocation4 + $0x1], 0 }
   0x5   :  { %15 = vsyncpa [#allocation6], 0 }
   0x6   :  { %17 = vsyncpa [#allocation6 + $0x1], 0  ;;  %s7109_s21 = smov 0   ;;  %s7111_s22 = smov 0  }
   0x7   :  { %s7113_s23 = smov 0   ;;  %s7115_s24 = smov 0  }
   0x8 LB: > { %s7130_s25 = sadd.s32 4294967295, %s7059_s24   ;;  %s9989_s26 = sadd.s32 4294967294, %s7059_s24   ;;  %s7059_s24 = sphi %s7115_s24, %s10252_s24   ;;  %s7055_s23 = sphi %s7113_s23, %s10251_s23   ;;  %s7051_s22 = sphi %s7111_s22, %s10250_s22   ;;  %s7047_s21 = sphi %s7109_s21, %s10249_s21  }
   0x9   : > { %s7134_s27 = sadd.s32 1, %s7059_s24   ;;  %s119_s28 = sadd.s32 1, %s7055_s23 }
   0xa   : > { %s116_s29 = ssub.s32 %s7059_s24, %s7134_s27  ;;  %p129_p0 = scmp.ne.s32.totalorder %s7055_s23, %s7051_s22 }
   0xb   : > { %p117_p1 = scmp.eq.s32.totalorder %s116_s29, 0  ;;  %p130_p2 = scmp.eq.s32.totalorder %s7130_s25, 1 }
   0xc   : > { %p135_p3 = scmp.ne.s32.totalorder %s7051_s22, %s7047_s21  ;;  %p136_p4 = scmp.eq.s32.totalorder %s9989_s26, 1 }
   0xd   : > { %s7147_s30 = scalar_select %p117_p1, %s7055_s23, %s119_s28  }
   0xe   : > { %p7149_p5 = por %p130_p2, %p129_p0  ;;  %p7153_p6 = por %p136_p4, %p135_p3 }
   0xf   : > { %p5193_p7 = scmp.ge.s32.totalorder %s7059_s24, 1  ;;  %p223_p8 = scmp.lt.s32.totalorder %s7059_s24, 3 }
  0x11   : > { %p224_p9 = pnand %p5193_p7, %p223_p8 }
  0x13   : > { %227 = sbr.rel (%p224_p9) target bundleno = 5530 (0x159a), region = 36 }
  0x1a   : > { %s10002_s1 = sld [smem:[#allocation81_spill]]  ;;  %p263_p10 = scmp.lt.s32.totalorder %s7130_s25, 1  ;;  %v9883_v2 = vmov 0   ;;  %vm687_vm0 = vcmask 130048   ;;  %vm1645_vm1 = vcmask 261248   ;;  %vm2161_vm2 = vcmask 392448  }
  0x1b   : > { %485 = vmatprep.mubr.bf16.mxu0 %v9883_v2  ;;  %s10003_s0 = sld [smem:[#allocation80_spill]]  ;;  %s7063_s29 = smov 112   ;;  %vm2677_vm3 = vcmask 523648   ;;  %vm3193_vm4 = vcmask 654848   ;;  %vm3709_vm5 = vcmask 786048   ;;  %vm4225_vm6 = vcmask 917248  }
  0x1c   : > { %s264_s15 = scalar_select %p263_p10, %s7130_s25, 1  ;;  %vm4741_vm7 = vcmask 1048448  }
  0x1d   : > { %s7537_s9 = sand.u32 1, %s7051_s22   ;;  %s9994_s13 = smov 80  }
  0x1e   : > { %s5426_s20 = sshll.u32 %s264_s15, 7  ;;  %s5196_s10 = sshll.u32 %s7537_s9, 10 }
  0x1f   : > { %s7541_s12 = scalar_lea.vmem [#allocation7], %s5196_s10  ;;  %s7065_s14 = smov 64  }
  0x20   : > { %v6369_v0 = vld [vmem:[%s10002_s1 + $0x4] ss:$12 sps:$4 sm:$0xff]   ;;  %v6371_v1 = vld [vmem:[%s10002_s1] ss:$12 sps:$4 sm:$0xff]   ;;  %v6372_v3 = vld [vmem:[%s10002_s1 + $0x1c] ss:$12 sps:$4 sm:$0xff]  }
  0x21   : > { %453 = vmatprep.subr.bf16.mxu0 %v6369_v0  ;;  %v6374_v4 = vld [vmem:[%s10002_s1 + $0x18] ss:$12 sps:$4 sm:$0xff]   ;;  %v6375_v5 = vld [vmem:[%s10002_s1 + $0x34] ss:$12 sps:$4 sm:$0xff]   ;;  %v6377_v6 = vld [vmem:[%s10002_s1 + $0x30] ss:$12 sps:$4 sm:$0xff]   ;;  %s7183_s11 = scalar_lea.vmem %s10003_s0, %s5426_s20 }
  0x22   : > { %454 = vmatpush1.bf16.msra.mxu0 %v6371_v1  ;;  %v6378_v7 = vld [vmem:[%s10002_s1 + $0x4c] ss:$12 sps:$4 sm:$0xff]   ;;  %v269_v8 = vld [vmem:[%s7183_s11] sm:$0xff]  ;;  %v6380_v9 = vld [vmem:[%s10002_s1 + $0x48] ss:$12 sps:$4 sm:$0xff]   ;;  %s7066_s15 = smov 48  }
  0x23   : > { %455 = vmatprep.subr.bf16.mxu0 %v6372_v3  ;;  %v270_v10 = vld [vmem:[%s7183_s11 + $0x8] sm:$0xff]  ;;  %v6381_v11 = vld [vmem:[%s10002_s1 + $0x64] ss:$12 sps:$4 sm:$0xff]   ;;  %v6387_v18 = vld [vmem:[%s10002_s1 + $0x94] ss:$12 sps:$4 sm:$0xff]   ;;  %s9990_s16 = smov 32  }
  0x24   : > { %v285_v12 = vpack.c.bf16 %v270_v10, %v269_v8  ;;  %v6383_v13 = vld [vmem:[%s10002_s1 + $0x60] ss:$12 sps:$4 sm:$0xff]   ;;  %v6384_v14 = vld [vmem:[%s10002_s1 + $0x7c] ss:$12 sps:$4 sm:$0xff]   ;;  %v6386_v17 = vld [vmem:[%s10002_s1 + $0x78] ss:$12 sps:$4 sm:$0xff]  }
  0x25   : > { %v6393_v15 = vld [vmem:[%s10002_s1 + $0x8] ss:$12 sps:$4 sm:$0xff]   ;;  %v6394_v16 = vld [vmem:[%s10002_s1 + $0x20] ss:$12 sps:$4 sm:$0xff]   ;;  %v6395_v19 = vld [vmem:[%s10002_s1 + $0x38] ss:$12 sps:$4 sm:$0xff]  }
  0x26   : > { %456 = vmatpush1.bf16.msra.mxu0 %v6374_v4  ;;  %5718 = vmatprep.mubr.bf16.mxu1 %v285_v12  ;;  %v6389_v20 = vld [vmem:[%s10002_s1 + $0x90] ss:$12 sps:$4 sm:$0xff]   ;;  %v6390_v21 = vld [vmem:[%s10002_s1 + $0xac] ss:$12 sps:$4 sm:$0xff]   ;;  %v6392_v23 = vld [vmem:[%s10002_s1 + $0xa8] ss:$12 sps:$4 sm:$0xff]  }
  0x27   : > { %457 = vmatprep.subr.bf16.mxu0 %v6375_v5  ;;  %5702 = vmatprep.subr.bf16.mxu1 %v6393_v15  ;;  %v6396_v22 = vld [vmem:[%s10002_s1 + $0x50] ss:$12 sps:$4 sm:$0xff]   ;;  %v6397_v24 = vld [vmem:[%s10002_s1 + $0x68] ss:$12 sps:$4 sm:$0xff]   ;;  %v6398_v25 = vld [vmem:[%s10002_s1 + $0x80] ss:$12 sps:$4 sm:$0xff]  }
  0x28   : > { %5703 = vmatpush3.bf16.msra.mxu1 %v6393_v15  ;;  %v271_v26 = vld [vmem:[%s7183_s11 + $0x10] sm:$0xff]  ;;  %v272_v27 = vld [vmem:[%s7183_s11 + $0x18] sm:$0xff]  ;;  %v273_v31 = vld [vmem:[%s7183_s11 + $0x20] sm:$0xff]  ;;  %s9992_s17 = smov 16   ;;  %s10191_s20 = smov 96  }
  0x29   : > { %5704 = vmatprep.subr.bf16.mxu1 %v6394_v16  ;;  %v6399_v28 = vld [vmem:[%s10002_s1 + $0x98] ss:$12 sps:$4 sm:$0xff]   ;;  %v286_v29 = vpack.c.bf16 %v272_v27, %v271_v26  ;;  %v6400_v30 = vld [vmem:[%s10002_s1 + $0xb0] ss:$12 sps:$4 sm:$0xff]   ;;  %v274_v32 = vld [vmem:[%s7183_s11 + $0x28] sm:$0xff]  ;;  %s10193_s26 = smov 80  }
  0x2a   : > { %458 = vmatpush1.bf16.msra.mxu0 %v6377_v6  ;;  %v287_v33 = vpack.c.bf16 %v274_v32, %v273_v31  ;;  %v275_v34 = vld [vmem:[%s7183_s11 + $0x30] sm:$0xff]  ;;  %v276_v35 = vld [vmem:[%s7183_s11 + $0x38] sm:$0xff]  ;;  %v277_v37 = vld [vmem:[%s7183_s11 + $0x40] sm:$0xff]  ;;  %s10197_s28 = smov 16   ;;  %s10201_s10 = smov 32  }
  0x2b   : > { %459 = vmatprep.subr.bf16.mxu0 %v6378_v7  ;;  %v288_v36 = vpack.c.bf16 %v276_v35, %v275_v34  ;;  %v278_v38 = vld [vmem:[%s7183_s11 + $0x48] sm:$0xff]  ;;  %v279_v40 = vld [vmem:[%s7183_s11 + $0x50] sm:$0xff]  ;;  %v280_v41 = vld [vmem:[%s7183_s11 + $0x58] sm:$0xff]  ;;  %s5012_s0 = scalar_lea.sflag [#allocation4], %s7537_s9 }
  0x2c   : > { %5705 = vmatpush3.bf16.msra.mxu1 %v6394_v16  ;;  %v289_v39 = vpack.c.bf16 %v278_v38, %v277_v37  ;;  %v281_v42 = vld [vmem:[%s7183_s11 + $0x60] sm:$0xff]  ;;  %v282_v43 = vld [vmem:[%s7183_s11 + $0x68] sm:$0xff]  ;;  %v290_v44 = vpack.c.bf16 %v280_v41, %v279_v40  ;;  %v283_v46 = vld [vmem:[%s7183_s11 + $0x70] sm:$0xff] }
  0x2d   : > { %5706 = vmatprep.subr.bf16.mxu1 %v6395_v19  ;;  %v291_v45 = vpack.c.bf16 %v282_v43, %v281_v42  ;;  %v284_v47 = vld [vmem:[%s7183_s11 + $0x78] sm:$0xff]  ;;  %s9996_s11 = smov 96  }
  0x2e   : > { %460 = vmatpush1.bf16.msra.mxu0 %v6380_v9  ;;  %v292_v48 = vpack.c.bf16 %v284_v47, %v283_v46 }
  0x2f   : > { %461 = vmatprep.subr.bf16.mxu0 %v6381_v11 }
  0x30   : > { %5707 = vmatpush3.bf16.msra.mxu1 %v6395_v19 }
  0x31   : > { %5708 = vmatprep.subr.bf16.mxu1 %v6396_v22 }
  0x32   : > { %462 = vmatpush1.bf16.msra.mxu0 %v6383_v13 }
  0x33   : > { %463 = vmatprep.subr.bf16.mxu0 %v6384_v14 }
  0x34   : > { %5709 = vmatpush3.bf16.msra.mxu1 %v6396_v22 }
  0x35   : > { %5710 = vmatprep.subr.bf16.mxu1 %v6397_v24 }
  0x36   : > { %464 = vmatpush1.bf16.msra.mxu0 %v6386_v17 }
  0x37   : > { %465 = vmatprep.subr.bf16.mxu0 %v6387_v18 }
  0x38   : > { %5711 = vmatpush3.bf16.msra.mxu1 %v6397_v24 }
  0x39   : > { %5712 = vmatprep.subr.bf16.mxu1 %v6398_v25 }
  0x3a   : > { %466 = vmatpush1.bf16.msra.mxu0 %v6389_v20 }
  0x3b   : > { %467 = vmatprep.subr.bf16.mxu0 %v6390_v21 }
  0x3c   : > { %5713 = vmatpush3.bf16.msra.mxu1 %v6398_v25 }
  0x3d   : > { %5714 = vmatprep.subr.bf16.mxu1 %v6399_v28 }
  0x3e   : > { %468 = vmatpush1.bf16.msra.mxu0 %v6392_v23 }
  0x40   : > { %5715 = vmatpush3.bf16.msra.mxu1 %v6399_v28 }
  0x41   : > { %486 = vmatmul.mubr.bf16.vlgmr.msra.gmra.mrb[0].mxu0 %v285_v12  ;;  %5716 = vmatprep.subr.bf16.mxu1 %v6400_v30 }
  0x42   : > { %495 = vmatprep.mubr.bf16.mxu0 %v9883_v2 }
  0x44   : > { %5717 = vmatpush3.bf16.msra.mxu1 %v6400_v30 }
  0x47   : > { %5719 = vmatmul.mubr.bf16.vlgmr.msra.gmra.mrb[0].mxu1 %v286_v29 }
  0x48   : > { %5722 = vmatprep.mubr.bf16.mxu1 %v287_v33 }
  0x49   : > { %496 = vmatmul.mubr.bf16.gmra.mrb[4].mxu0 %v286_v29 }
  0x4a   : > { %505 = vmatprep.mubr.bf16.mxu0 %v9883_v2 }
  0x4f   : > { %5723 = vmatmul.mubr.bf16.gmra.mrb[4].mxu1 %v288_v36 }
  0x50   : > { %5726 = vmatprep.mubr.bf16.mxu1 %v289_v39 }
  0x51   : > { %506 = vmatmul.mubr.bf16.gmra.mrb[8].mxu0 %v287_v33 }
  0x52   : > { %515 = vmatprep.mubr.bf16.mxu0 %v9883_v2 }
  0x57   : > { %5727 = vmatmul.mubr.bf16.gmra.mrb[8].mxu1 %v290_v44 }
  0x58   : > { %5730 = vmatprep.mubr.bf16.mxu1 %v291_v45 }
  0x59   : > { %516 = vmatmul.mubr.bf16.gmra.mrb[12].mxu0 %v288_v36 }
  0x5a   : > { %525 = vmatprep.mubr.bf16.mxu0 %v9883_v2 }
  0x5f   : > { %5731 = vmatmul.mubr.bf16.gmra.mrb[12].mxu1 %v292_v48 }
  0x61   : > { %526 = vmatmul.mubr.bf16.gmra.mrb[16].mxu0 %v289_v39 }
  0x62   : > { %535 = vmatprep.mubr.bf16.mxu0 %v9883_v2 }
  0x69   : > { %536 = vmatmul.mubr.bf16.gmra.mrb[20].mxu0 %v290_v44 }
  0x6a   : > { %545 = vmatprep.mubr.bf16.mxu0 %v9883_v2 }
  0x71   : > { %546 = vmatmul.mubr.bf16.gmra.mrb[24].mxu0 %v291_v45 }
  0x72   : > { %555 = vmatprep.mubr.bf16.mxu0 %v9883_v2 }
  0x79   : > { %556 = vmatmul.mubr.bf16.gmra.mrb[28].mxu0 %v292_v48 }
 0x114   : > { %v487_v49 = vpop.f32.mrb[0].mxu0 }
 0x115   : > { %v489_v50 = vpop.f32.mrb[1].mxu0 }
 0x116   : > { %v491_v51 = vpop.f32.mrb[2].mxu0 }
 0x117   : > { %v7262_v52 = vpack.c.bf16 %v491_v51, %v487_v49  ;;  %v493_v53 = vpop.f32.mrb[3].mxu0 }
 0x118   : > { %v7264_v54 = vpack.c.bf16 %v493_v53, %v489_v50 }
 0x119   : > { %5750 = vmatprep.mubr.msk.bf16.mxu0 %vm687_vm0, %v7262_v52 }
 0x11a   : > { %10004 = vst [vmem:[#allocation10_spill] sm:$0xff] %v7264_v54  ;;  %1670 = vrot.lane.b32.xlu1 %v7264_v54, %s9996_s11  ;;  %1146 = vrot.lane.b32.xlu0 %v7264_v54, %s7063_s29  ;;  %v713_v55 = vsel %vm687_vm0, %v7264_v54, 0  ;;  %v5720_v0 = vpop.f32.mrb[0].mxu1 }
 0x11b   : > { %6246 = vmatprep.subr.msk.bf16.mxu0 %vm687_vm0, %v7264_v54  ;;  %v600_v3 = vpop.f32.mrb[1].mxu1 }
 0x11c   : > { %5735 = vmatpush3.bf16.xpose.msra.mxu0 %v713_v55  ;;  %v497_v56 = vpop.f32.mrb[4].mxu0  ;;  %v5721_v5 = vpop.f32.mrb[2].mxu1 }
 0x11d   : > { %v499_v57 = vpop.f32.mrb[5].mxu0  ;;  %v7288_v8 = vpack.c.bf16 %v5721_v5, %v5720_v0  ;;  %v603_v9 = vpop.f32.mrb[3].mxu1 }
 0x11e   : > { %v501_v58 = vpop.f32.mrb[6].mxu0  ;;  %v7292_v11 = vpack.c.bf16 %v603_v9, %v600_v3 }
 0x11f   : > { %v7276_v59 = vpack.c.bf16 %v501_v58, %v497_v56  ;;  %v503_v60 = vpop.f32.mrb[7].mxu0  ;;  %10006 = vst [vmem:[#allocation12_spill] sm:$0xff] %v7288_v8 }
 0x120   : > { %v7278_v61 = vpack.c.bf16 %v503_v60, %v499_v57  ;;  %10007 = vst [vmem:[#allocation13_spill] sm:$0xff] %v7292_v11  ;;  %5766 = vmatprep.subr.bf16.mxu1 %v7292_v11 }
 0x121   : > { %5767 = vmatpush3.bf16.msra.mxu1 %v7292_v11 }
 0x122   : > { %10005 = vst [vmem:[#allocation11_spill] sm:$0xff] %v7278_v61  ;;  %1148 = vrot.lane.b32.xlu1 %v7278_v61, %s7063_s29  ;;  %6247 = vmatprep.subr.msk.bf16.mxu0 %vm687_vm0, %v7278_v61  ;;  %v716_v62 = vsel %vm687_vm0, %v7278_v61, 0  ;;  %v5724_v14 = vpop.f32.mrb[4].mxu1 }
 0x123   : > { %v616_v16 = vpop.f32.mrb[5].mxu1  ;;  %5768 = vmatprep.subr.bf16.mxu1 %v7288_v8 }
 0x124   : > { %5737 = vmatpush3.bf16.xpose.msra.mxu0 %v716_v62  ;;  %v507_v63 = vpop.f32.mrb[8].mxu0  ;;  %v5725_v18 = vpop.f32.mrb[6].mxu1 }
 0x125   : > { %v509_v1 = vpop.f32.mrb[9].mxu0  ;;  %v7305_v21 = vpack.c.bf16 %v5725_v18, %v5724_v14  ;;  %v619_v22 = vpop.f32.mrb[7].mxu1  ;;  %5769 = vmatpush3.bf16.msra.mxu1 %v7288_v8 }
 0x126   : > { %v511_v4 = vpop.f32.mrb[10].mxu0  ;;  %v7309_v24 = vpack.c.bf16 %v619_v22, %v616_v16 }
 0x127   : > { %v7286_v6 = vpack.c.bf16 %v511_v4, %v507_v63  ;;  %v513_v7 = vpop.f32.mrb[11].mxu0  ;;  %10009 = vst [vmem:[#allocation15_spill] sm:$0xff] %v7305_v21 }
 0x128   : > { %v7290_v10 = vpack.c.bf16 %v513_v7, %v509_v1  ;;  %10010 = vst [vmem:[#allocation16_spill] sm:$0xff] %v7309_v24  ;;  %5770 = vmatprep.subr.bf16.mxu1 %v7309_v24 }
 0x129   : > { %5771 = vmatpush3.bf16.msra.mxu1 %v7309_v24 }
 0x12a   : > { %1150 = vrot.lane.b32.xlu0 %v7290_v10, %s7063_s29  ;;  %6248 = vmatprep.subr.msk.bf16.mxu0 %vm687_vm0, %v7290_v10  ;;  %v719_v12 = vsel %vm687_vm0, %v7290_v10, 0  ;;  %v5728_v27 = vpop.f32.mrb[8].mxu1 }
 0x12b   : > { %v632_v29 = vpop.f32.mrb[9].mxu1  ;;  %5772 = vmatprep.subr.bf16.mxu1 %v7305_v21 }
 0x12c   : > { %5739 = vmatpush3.bf16.xpose.msra.mxu0 %v719_v12  ;;  %v517_v13 = vpop.f32.mrb[12].mxu0  ;;  %v5729_v31 = vpop.f32.mrb[10].mxu1 }
 0x12d   : > { %v519_v15 = vpop.f32.mrb[13].mxu0  ;;  %v7323_v34 = vpack.c.bf16 %v5729_v31, %v5728_v27  ;;  %v635_v35 = vpop.f32.mrb[11].mxu1  ;;  %5773 = vmatpush3.bf16.msra.mxu1 %v7305_v21 }
 0x12e   : > { %v521_v17 = vpop.f32.mrb[14].mxu0  ;;  %v7327_v37 = vpack.c.bf16 %v635_v35, %v632_v29 }
 0x12f   : > { %v7303_v19 = vpack.c.bf16 %v521_v17, %v517_v13  ;;  %v523_v20 = vpop.f32.mrb[15].mxu0  ;;  %10011 = vst [vmem:[#allocation17_spill] sm:$0xff] %v7323_v34 }
 0x130   : > { %v7307_v23 = vpack.c.bf16 %v523_v20, %v519_v15  ;;  %10012 = vst [vmem:[#allocation18_spill] sm:$0xff] %v7327_v37  ;;  %5774 = vmatprep.subr.bf16.mxu1 %v7327_v37 }
 0x131   : > { %10008 = vst [vmem:[#allocation14_spill] sm:$0xff] %v7303_v19  ;;  %5775 = vmatpush3.bf16.msra.mxu1 %v7327_v37 }
 0x132   : > { %1152 = vrot.lane.b32.xlu1 %v7307_v23, %s7063_s29  ;;  %6249 = vmatprep.subr.msk.bf16.mxu0 %vm687_vm0, %v7307_v23  ;;  %v722_v25 = vsel %vm687_vm0, %v7307_v23, 0  ;;  %v5732_v40 = vpop.f32.mrb[12].mxu1 }
 0x133   : > { %v648_v42 = vpop.f32.mrb[13].mxu1  ;;  %5776 = vmatprep.subr.bf16.mxu1 %v7323_v34 }
 0x134   : > { %5741 = vmatpush3.bf16.xpose.msra.mxu0 %v722_v25  ;;  %v527_v26 = vpop.f32.mrb[16].mxu0  ;;  %v5733_v44 = vpop.f32.mrb[14].mxu1 }
 0x135   : > { %v529_v28 = vpop.f32.mrb[17].mxu0  ;;  %v7341_v47 = vpack.c.bf16 %v5733_v44, %v5732_v40  ;;  %v651_v48 = vpop.f32.mrb[15].mxu1  ;;  %5777 = vmatpush3.bf16.msra.mxu1 %v7323_v34 }
 0x136   : > { %v531_v30 = vpop.f32.mrb[18].mxu0  ;;  %v7345_v50 = vpack.c.bf16 %v651_v48, %v648_v42 }
 0x137   : > { %v7321_v32 = vpack.c.bf16 %v531_v30, %v527_v26  ;;  %v533_v33 = vpop.f32.mrb[19].mxu0  ;;  %10014 = vst [vmem:[#allocation20_spill] sm:$0xff] %v7341_v47 }
 0x138   : > { %v7325_v36 = vpack.c.bf16 %v533_v33, %v529_v28  ;;  %10015 = vst [vmem:[#allocation21_spill] sm:$0xff] %v7345_v50  ;;  %5778 = vmatprep.subr.bf16.mxu1 %v7345_v50 }
 0x139   : > { %5779 = vmatpush3.bf16.msra.mxu1 %v7345_v50 }
 0x13a   : > { %1154 = vrot.lane.b32.xlu0 %v7325_v36, %s7063_s29  ;;  %6250 = vmatprep.subr.msk.bf16.mxu0 %vm687_vm0, %v7325_v36  ;;  %v725_v38 = vsel %vm687_vm0, %v7325_v36, 0 }
 0x13b   : > { %5780 = vmatprep.subr.bf16.mxu1 %v7341_v47 }
 0x13c   : > { %5743 = vmatpush3.bf16.xpose.msra.mxu0 %v725_v38  ;;  %v537_v39 = vpop.f32.mrb[20].mxu0 }
 0x13d   : > { %v539_v41 = vpop.f32.mrb[21].mxu0  ;;  %5781 = vmatpush3.bf16.msra.mxu1 %v7341_v47 }
 0x13e   : > { %v541_v43 = vpop.f32.mrb[22].mxu0 }
 0x13f   : > { %v7339_v45 = vpack.c.bf16 %v541_v43, %v537_v39  ;;  %v543_v46 = vpop.f32.mrb[23].mxu0 }
 0x140   : > { %v7343_v49 = vpack.c.bf16 %v543_v46, %v539_v41 }
 0x141   : > { %10013 = vst [vmem:[#allocation19_spill] sm:$0xff] %v7339_v45 }
 0x142   : > { %6251 = vmatprep.subr.msk.bf16.mxu0 %vm687_vm0, %v7343_v49  ;;  %v728_v51 = vsel %vm687_vm0, %v7343_v49, 0 }
 0x144   : > { %5745 = vmatpush3.bf16.xpose.msra.mxu0 %v728_v51  ;;  %v547_v53 = vpop.f32.mrb[24].mxu0 }
 0x145   : > { %v549_v55 = vpop.f32.mrb[25].mxu0 }
 0x146   : > { %v551_v56 = vpop.f32.mrb[26].mxu0 }
 0x147   : > { %v7355_v57 = vpack.c.bf16 %v551_v56, %v547_v53  ;;  %v553_v58 = vpop.f32.mrb[27].mxu0 }
 0x148   : > { %v7357_v60 = vpack.c.bf16 %v553_v58, %v549_v55 }
 0x14a   : > { %6252 = vmatprep.subr.msk.bf16.mxu0 %vm687_vm0, %v7357_v60  ;;  %v731_v62 = vsel %vm687_vm0, %v7357_v60, 0 }
 0x14c   : > { %5747 = vmatpush3.bf16.xpose.msra.mxu0 %v731_v62  ;;  %v557_v63 = vpop.f32.mrb[28].mxu0 }
 0x14d   : > { %v559_v0 = vpop.f32.mrb[29].mxu0 }
 0x14e   : > { %v561_v1 = vpop.f32.mrb[30].mxu0 }
 0x14f   : > { %v7364_v3 = vpack.c.bf16 %v561_v1, %v557_v63  ;;  %v563_v4 = vpop.f32.mrb[31].mxu0 }
 0x150   : > { %v7366_v5 = vpack.c.bf16 %v563_v4, %v559_v0 }
 0x151   : > { %10016 = vst [vmem:[#allocation22_spill] sm:$0xff] %v7364_v3 }
 0x152   : > { %6253 = vmatprep.subr.msk.bf16.mxu0 %vm687_vm0, %v7366_v5  ;;  %v734_v7 = vsel %vm687_vm0, %v7366_v5, 0 }
 0x154   : > { %5749 = vmatpush3.bf16.xpose.msra.mxu0 %v734_v7 }
 0x15b   : > { %5751 = vmatmul.mubr.msk.bf16.vlgmr.msra.gmra.mrb[32].mxu0 %vm687_vm0, %v7276_v59 }
 0x15c   : > { %5754 = vmatprep.mubr.msk.bf16.mxu0 %vm687_vm0, %v7286_v6 }
 0x163   : > { %5755 = vmatmul.mubr.msk.bf16.gmra.mrb[36].mxu0 %vm687_vm0, %v7303_v19 }
 0x164   : > { %5758 = vmatprep.mubr.msk.bf16.mxu0 %vm687_vm0, %v7321_v32 }
 0x16b   : > { %5759 = vmatmul.mubr.msk.bf16.gmra.mrb[40].mxu0 %vm687_vm0, %v7339_v45 }
 0x16c   : > { %5762 = vmatprep.mubr.msk.bf16.mxu0 %vm687_vm0, %v7355_v57 }
 0x173   : > { %5763 = vmatmul.mubr.msk.bf16.gmra.mrb[44].mxu0 %vm687_vm0, %v7364_v3 }
 0x18c   : > { %v1671_v9 = vpop.permute.xlu1 %1670  ;;  %v7386_v12 = vpop.permute.xlu0 %1146 }
 0x18d   : > { %6254 = vmatprep.subr.msk.bf16.mxu1 %vm687_vm0, %v7386_v12  ;;  %6262 = vmatprep.subr.msk.bf16.mxu0 %vm687_vm0, %v1671_v9  ;;  %v1711_v13 = vsel %vm687_vm0, %v1671_v9, 0 }
 0x18e   : > { %5863 = vmatpush3.bf16.xpose.msra.mxu0 %v1711_v13 }
 0x194   : > { %v7420_v38 = vpop.permute.xlu1 %1148 }
 0x19c   : > { %v7422_v39 = vpop.permute.xlu0 %1150 }
 0x1a4   : > { %v7424_v40 = vpop.permute.xlu1 %1152 }
 0x1ac   : > { %v7426_v41 = vpop.permute.xlu0 %1154 }
 0x22e   : > { %v5752_v14 = vpop.f32.mrb[32].mxu0 }
 0x22f   : > { %837 = vmax.xlane.f32.xlu1 %v5752_v14  ;;  %v770_v15 = vpop.f32.mrb[33].mxu0 }
 0x230   : > { %833 = vmax.xlane.f32.xlu0 %v770_v15  ;;  %v5753_v16 = vpop.f32.mrb[34].mxu0 }
 0x231   : > { %v773_v17 = vpop.f32.mrb[35].mxu0 }
 0x233   : > { %839 = vmax.xlane.f32.xlu1 %v5753_v16 }
 0x234   : > { %835 = vmax.xlane.f32.xlu0 %v773_v17 }
 0x236   : > { %v5756_v18 = vpop.f32.mrb[36].mxu0 }
 0x237   : > { %v786_v20 = vpop.f32.mrb[37].mxu0 }
 0x238   : > { %845 = vmax.xlane.f32.xlu0 %v5756_v18  ;;  %v5757_v22 = vpop.f32.mrb[38].mxu0 }
 0x239   : > { %847 = vmax.xlane.f32.xlu1 %v5757_v22  ;;  %v789_v25 = vpop.f32.mrb[39].mxu0 }
 0x23c   : > { %841 = vmax.xlane.f32.xlu0 %v786_v20 }
 0x23d   : > { %843 = vmax.xlane.f32.xlu1 %v789_v25 }
 0x23e   : > { %v7392_v26 = vpop.f32.mrb[40].mxu0 }
 0x23f   : > { %v7394_v27 = vpop.f32.mrb[41].mxu0 }
 0x240   : > { %853 = vmax.xlane.f32.xlu0 %v7392_v26  ;;  %v7397_v28 = vpop.f32.mrb[42].mxu0 }
 0x241   : > { %855 = vmax.xlane.f32.xlu1 %v7397_v28  ;;  %v7400_v29 = vpop.f32.mrb[43].mxu0 }
 0x244   : > { %849 = vmax.xlane.f32.xlu0 %v7394_v27 }
 0x245   : > { %851 = vmax.xlane.f32.xlu1 %v7400_v29 }
 0x246   : > { %v7404_v30 = vpop.f32.mrb[44].mxu0 }
 0x247   : > { %v7406_v31 = vpop.f32.mrb[45].mxu0 }
 0x248   : > { %861 = vmax.xlane.f32.xlu0 %v7404_v30  ;;  %v7409_v33 = vpop.f32.mrb[46].mxu0 }
 0x249   : > { %v7411_v35 = vpop.f32.mrb[47].mxu0 }
 0x24c   : > { %857 = vmax.xlane.f32.xlu0 %v7406_v31 }
 0x256   : > { %1672 = vrot.lane.b32.xlu1 %v7278_v61, %s9996_s11 }
 0x262   : > { %1156 = vrot.lane.b32.xlu0 %v7343_v49, %s7063_s29 }
 0x27a   : > { %863 = vmax.xlane.f32.xlu1 %v7409_v33 }
 0x27e   : > { %859 = vmax.xlane.f32.xlu1 %v7411_v35 }
 0x2bc   : > { %v838_v42 = vpop.xlane.xlu1 %837 }
 0x2bd   : > { %v867_v43 = vsub.f32 %v5752_v14, %v838_v42  ;;  %v834_v44 = vpop.xlane.xlu0 %833 }
 0x2be   : > { %v865_v46 = vsub.f32 %v770_v15, %v834_v44 }
 0x2bf   : > { %v885_v48 = vmul.f32 1.442695, %v867_v43 }
 0x2c0   : > { %v881_v51 = vmul.f32 1.442695, %v865_v46  ;;  %v840_v53 = vpop.xlane.xlu1 %839 }
 0x2c1   : > { %6425 = vpow2.f32 %v885_v48  ;;  %v868_v55 = vsub.f32 %v5753_v16, %v840_v53  ;;  %v836_v56 = vpop.xlane.xlu0 %835 }
 0x2c2   : > { %v866_v58 = vsub.f32 %v773_v17, %v836_v56  ;;  %6427 = vpow2.f32 %v881_v51 }
 0x2c3   : > { %v887_v62 = vmul.f32 1.442695, %v868_v55 }
 0x2c4   : > { %v883_v63 = vmul.f32 1.442695, %v866_v58 }
 0x2c5   : > { %6429 = vpow2.f32 %v887_v62  ;;  %v846_v0 = vpop.xlane.xlu0 %845 }
 0x2c6   : > { %v871_v1 = vsub.f32 %v5756_v18, %v846_v0  ;;  %v848_v4 = vpop.xlane.xlu1 %847  ;;  %6431 = vpow2.f32 %v883_v63 }
 0x2c7   : > { %v872_v13 = vsub.f32 %v5757_v22, %v848_v4 }
 0x2c8   : > { %v893_v7 = vmul.f32 1.442695, %v871_v1 }
 0x2c9   : > { %v842_v9 = vpop.xlane.xlu0 %841  ;;  %v895_v48 = vmul.f32 1.442695, %v872_v13 }
 0x2ca   : > { %6433 = vpow2.f32 %v893_v7  ;;  %v869_v14 = vsub.f32 %v786_v20, %v842_v9  ;;  %v844_v15 = vpop.xlane.xlu1 %843 }
 0x2cb   : > { %v7428_v42 = vpop.eup %6425  ;;  %v870_v43 = vsub.f32 %v789_v25, %v844_v15 }
 0x2cc   : > { %v889_v16 = vmul.f32 1.442695, %v869_v14  ;;  %917 = vadd.xlane.f32.xlu0 %v7428_v42  ;;  %v7431_v46 = vpop.eup %6427 }
 0x2cd   : > { %v891_v17 = vmul.f32 1.442695, %v870_v43  ;;  %v854_v44 = vpop.xlane.xlu0 %853 }
 0x2ce   : > { %6435 = vpow2.f32 %v889_v16  ;;  %v875_v18 = vsub.f32 %v7392_v26, %v854_v44  ;;  %v856_v51 = vpop.xlane.xlu1 %855 }
 0x2cf   : > { %v7434_v53 = vpop.eup %6429  ;;  %6437 = vpow2.f32 %v891_v17  ;;  %v876_v26 = vsub.f32 %v7397_v28, %v856_v51 }
 0x2d0   : > { %913 = vadd.xlane.f32.xlu0 %v7431_v46  ;;  %919 = vadd.xlane.f32.xlu1 %v7434_v53  ;;  %6439 = vpow2.f32 %v895_v48  ;;  %v901_v22 = vmul.f32 1.442695, %v875_v18  ;;  %v7439_v56 = vpop.eup %6431 }
 0x2d1   : > { %v850_v20 = vpop.xlane.xlu0 %849  ;;  %v903_v4 = vmul.f32 1.442695, %v876_v26 }
 0x2d2   : > { %v873_v25 = vsub.f32 %v7394_v27, %v850_v20  ;;  %v852_v55 = vpop.xlane.xlu1 %851  ;;  %6441 = vpow2.f32 %v901_v22 }
 0x2d3   : > { %v874_v7 = vsub.f32 %v7400_v29, %v852_v55 }
 0x2d4   : > { %v7441_v58 = vpop.eup %6433  ;;  %915 = vadd.xlane.f32.xlu1 %v7439_v56  ;;  %v897_v62 = vmul.f32 1.442695, %v873_v25 }
 0x2d5   : > { %925 = vadd.xlane.f32.xlu0 %v7441_v58  ;;  %v899_v9 = vmul.f32 1.442695, %v874_v7  ;;  %v862_v43 = vpop.xlane.xlu0 %861 }
 0x2d6   : > { %v1673_v63 = vpop.permute.xlu1 %1672  ;;  %6443 = vpow2.f32 %v897_v62  ;;  %v879_v16 = vsub.f32 %v7404_v30, %v862_v43 }
 0x2d7   : > { %6263 = vmatprep.subr.msk.bf16.mxu0 %vm687_vm0, %v1673_v63  ;;  %v1714_v0 = vsel %vm687_vm0, %v1673_v63, 0  ;;  %6445 = vpow2.f32 %v903_v4 }
 0x2d8   : > { %v7448_v1 = vpop.eup %6435  ;;  %5865 = vmatpush3.bf16.xpose.msra.mxu0 %v1714_v0  ;;  %6447 = vpow2.f32 %v899_v9  ;;  %v909_v44 = vmul.f32 1.442695, %v879_v16 }
 0x2d9   : > { %v7450_v27 = vpop.eup %6437  ;;  %921 = vadd.xlane.f32.xlu1 %v7448_v1  ;;  %v858_v17 = vpop.xlane.xlu0 %857 }
 0x2da   : > { %923 = vadd.xlane.f32.xlu0 %v7450_v27  ;;  %v7455_v28 = vpop.eup %6439  ;;  %v877_v48 = vsub.f32 %v7406_v31, %v858_v17  ;;  %6449 = vpow2.f32 %v909_v44 }
 0x2dc   : > { %v7458_v13 = vpop.eup %6441  ;;  %v905_v18 = vmul.f32 1.442695, %v877_v48 }
 0x2dd   : > { %927 = vadd.xlane.f32.xlu1 %v7455_v28 }
 0x2de   : > { %6451 = vpow2.f32 %v905_v18 }
 0x2e0   : > { %v7461_v14 = vpop.eup %6443 }
 0x2e1   : > { %933 = vadd.xlane.f32.xlu1 %v7458_v13  ;;  %v7464_v15 = vpop.eup %6445 }
 0x2e2   : > { %v7467_v29 = vpop.eup %6447 }
 0x2e4   : > { %v7477_v55 = vpop.eup %6449 }
 0x2e5   : > { %929 = vadd.xlane.f32.xlu1 %v7461_v14 }
 0x2e8   : > { %v7481_v26 = vpop.eup %6451 }
 0x2e9   : > { %935 = vadd.xlane.f32.xlu1 %v7464_v15 }
 0x2ed   : > { %931 = vadd.xlane.f32.xlu1 %v7467_v29 }
 0x2f0   : > { %1158 = vrot.lane.b32.xlu0 %v7357_v60, %s7063_s29 }
 0x2fe   : > { %1674 = vrot.lane.b32.xlu1 %v7290_v10, %s9996_s11 }
 0x307   : > { %v864_v51 = vpop.xlane.xlu1 %863 }
 0x308   : > { %v880_v20 = vsub.f32 %v7409_v33, %v864_v51 }
 0x30a   : > { %v911_v22 = vmul.f32 1.442695, %v880_v20 }
 0x30b   : > { %v860_v25 = vpop.xlane.xlu1 %859 }
 0x30c   : > { %6453 = vpow2.f32 %v911_v22  ;;  %v878_v30 = vsub.f32 %v7411_v35, %v860_v25  ;;  %v7528_v35 = vpop.permute.xlu0 %1156 }
 0x30e   : > { %v907_v62 = vmul.f32 1.442695, %v878_v30 }
 0x30f   : > { %941 = vadd.xlane.f32.xlu0 %v7477_v55 }
 0x310   : > { %6455 = vpow2.f32 %v907_v62 }
 0x313   : > { %937 = vadd.xlane.f32.xlu0 %v7481_v26 }
 0x316   : > { %v7484_v31 = vpop.eup %6453 }
 0x317   : > { %943 = vadd.xlane.f32.xlu0 %v7484_v31 }
 0x31a   : > { %v7487_v33 = vpop.eup %6455 }
 0x322   : > { %939 = vadd.xlane.f32.xlu1 %v7487_v33 }
 0x32d   : > { %1160 = vrot.lane.b32.xlu0 %v7366_v5, %s7063_s29 }
 0x331   : > { %1122 = vrot.lane.b32.xlu0 %v7262_v52, %s7063_s29 }
 0x333   : > { %1676 = vrot.lane.b32.xlu1 %v7307_v23, %s9996_s11 }
 0x335   : > { %1678 = vrot.lane.b32.xlu0 %v7325_v36, %s9996_s11 }
 0x337   : > { %1124 = vrot.lane.b32.xlu1 %v7276_v59, %s7063_s29 }
 0x339   : > { %1128 = vrot.lane.b32.xlu0 %v7303_v19, %s7063_s29 }
 0x33b   : > { %1126 = vrot.lane.b32.xlu1 %v7286_v6, %s7063_s29 }
 0x33d   : > { %1130 = vrot.lane.b32.xlu0 %v7321_v32, %s7063_s29 }
 0x33f   : > { %1680 = vrot.lane.b32.xlu1 %v7343_v49, %s9996_s11 }
 0x341   : > { %1682 = vrot.lane.b32.xlu0 %v7357_v60, %s9996_s11 }
 0x343   : > { %1132 = vrot.lane.b32.xlu1 %v7339_v45, %s7063_s29 }
 0x345   : > { %1136 = vrot.lane.b32.xlu0 %v7364_v3, %s7063_s29 }
 0x347   : > { %1134 = vrot.lane.b32.xlu1 %v7355_v57, %s7063_s29 }
 0x349   : > { %1654 = vrot.lane.b32.xlu0 %v7262_v52, %s9996_s11 }
 0x34b   : > { %1684 = vrot.lane.b32.xlu1 %v7366_v5, %s9996_s11 }
 0x34d   : > { %1658 = vrot.lane.b32.xlu0 %v7286_v6, %s9996_s11 }
 0x34f   : > { %1656 = vrot.lane.b32.xlu1 %v7276_v59, %s9996_s11 }
 0x351   : > { %1662 = vrot.lane.b32.xlu0 %v7321_v32, %s9996_s11 }
 0x353   : > { %1660 = vrot.lane.b32.xlu1 %v7303_v19, %s9996_s11 }
 0x355   : > { %1666 = vrot.lane.b32.xlu0 %v7355_v57, %s9996_s11 }
 0x357   : > { %1664 = vrot.lane.b32.xlu1 %v7339_v45, %s9996_s11 }
 0x359   : > { %v918_v63 = vpop.xlane.xlu0 %917 }
 0x35a   : > { %6457 = vrcp.f32 %v918_v63 }
 0x35b   : > { %1668 = vrot.lane.b32.xlu1 %v7364_v3, %s9996_s11 }
 0x35d   : > { %v914_v0 = vpop.xlane.xlu0 %913  ;;  %v920_v4 = vpop.xlane.xlu1 %919 }
 0x35e   : > { %6459 = vrcp.f32 %v914_v0 }
 0x35f   : > { %6461 = vrcp.f32 %v920_v4 }
 0x361   : > { %v916_v7 = vpop.xlane.xlu1 %915 }
 0x362   : > { %6463 = vrcp.f32 %v916_v7  ;;  %v926_v9 = vpop.xlane.xlu0 %925  ;;  %v1187_v7 = vsel %vm687_vm0, %v7386_v12, 0 }
 0x363   : > { %6465 = vrcp.f32 %v926_v9 }
 0x364   : > { %v6458_v43 = vpop.eup %6457 }
 0x365   : > { %v950_v16 = vmul.f32 %v6458_v43, %v7428_v42 }
 0x366   : > { %v922_v17 = vpop.xlane.xlu1 %921 }
 0x367   : > { %979 = vst [vmem:[%s7541_s12 + $0x10] sm:$0xff] %v950_v16  ;;  %6467 = vrcp.f32 %v922_v17  ;;  %v924_v44 = vpop.xlane.xlu0 %923 }
 0x368   : > { %v6460_v48 = vpop.eup %6459  ;;  %6469 = vrcp.f32 %v924_v44 }
 0x369   : > { %v6462_v18 = vpop.eup %6461  ;;  %v946_v51 = vmul.f32 %v6460_v48, %v7431_v46 }
 0x36a   : > { %v952_v20 = vmul.f32 %v6462_v18, %v7434_v53  ;;  %v928_v22 = vpop.xlane.xlu1 %927 }
 0x36b   : > { %6471 = vrcp.f32 %v928_v22  ;;  %977 = vst [vmem:[%s7541_s12] sm:$0xff] %v946_v51 }
 0x36c   : > { %v6464_v42 = vpop.eup %6463  ;;  %980 = vst [vmem:[%s7541_s12 + $0x18] sm:$0xff] %v952_v20  ;;  %v994_v4 = vpack.c.bf16 %v952_v20, %v950_v16 }
 0x36d   : > { %v6466_v25 = vpop.eup %6465  ;;  %v948_v30 = vmul.f32 %v6464_v42, %v7439_v56 }
 0x36e   : > { %v934_v62 = vpop.xlane.xlu1 %933  ;;  %v958_v63 = vmul.f32 %v6466_v25, %v7441_v58 }
 0x36f   : > { %6473 = vrcp.f32 %v934_v62  ;;  %978 = vst [vmem:[%s7541_s12 + $0x8] sm:$0xff] %v948_v30  ;;  %v993_v0 = vpack.c.bf16 %v948_v30, %v946_v51  ;;  %v1196_v62 = vsel %vm687_vm0, %v7424_v40, 0 }
 0x370   : > { %983 = vst [vmem:[%s7541_s12 + $0x30] sm:$0xff] %v958_v63 }
 0x371   : > { %v6468_v46 = vpop.eup %6467  ;;  %5782 = vmatprep.mubr.bf16.mxu1 %v993_v0 }
 0x372   : > { %v6470_v53 = vpop.eup %6469  ;;  %5783 = vmatmul.mubr.bf16.vlgmr.msra.gmra.mrb[16].mxu1 %v994_v4  ;;  %v930_v9 = vpop.xlane.xlu1 %929  ;;  %v954_v56 = vmul.f32 %v6468_v46, %v7448_v1 }
 0x373   : > { %5799 = vmatpush3.bf16.xpose.msra.mxu1 %v1187_v7  ;;  %6475 = vrcp.f32 %v930_v9  ;;  %v956_v58 = vmul.f32 %v6470_v53, %v7450_v27  ;;  %v1190_v27 = vsel %vm687_vm0, %v7420_v38, 0 }
 0x374   : > { %6255 = vmatprep.subr.msk.bf16.mxu1 %vm687_vm0, %v7420_v38  ;;  %981 = vst [vmem:[%s7541_s12 + $0x20] sm:$0xff] %v954_v56 }
 0x375   : > { %v6472_v43 = vpop.eup %6471  ;;  %982 = vst [vmem:[%s7541_s12 + $0x28] sm:$0xff] %v956_v58  ;;  %v995_v16 = vpack.c.bf16 %v956_v58, %v954_v56 }
 0x376   : > { %v936_v17 = vpop.xlane.xlu1 %935  ;;  %v960_v44 = vmul.f32 %v6472_v43, %v7455_v28 }
 0x377   : > { %6477 = vrcp.f32 %v936_v17  ;;  %5786 = vmatprep.mubr.bf16.mxu1 %v995_v16 }
 0x378   : > { %984 = vst [vmem:[%s7541_s12 + $0x38] sm:$0xff] %v960_v44  ;;  %v996_v12 = vpack.c.bf16 %v960_v44, %v958_v63 }
 0x379   : > { %v6474_v1 = vpop.eup %6473 }
 0x37a   : > { %5787 = vmatmul.mubr.bf16.gmra.mrb[20].mxu1 %v996_v12  ;;  %v932_v48 = vpop.xlane.xlu1 %931  ;;  %v966_v18 = vmul.f32 %v6474_v1, %v7458_v13  ;;  %v1193_v13 = vsel %vm687_vm0, %v7422_v39, 0 }
 0x37b   : > { %5801 = vmatpush3.bf16.xpose.msra.mxu1 %v1190_v27  ;;  %6479 = vrcp.f32 %v932_v48 }
 0x37c   : > { %6256 = vmatprep.subr.msk.bf16.mxu1 %vm687_vm0, %v7422_v39  ;;  %987 = vst [vmem:[%s7541_s12 + $0x50] sm:$0xff] %v966_v18  ;;  %v1199_v39 = vsel %vm687_vm0, %v7426_v41, 0 }
 0x37d   : > { %v6476_v28 = vpop.eup %6475 }
 0x37e   : > { %v1675_v51 = vpop.permute.xlu1 %1674  ;;  %v962_v20 = vmul.f32 %v6476_v28, %v7461_v14 }
 0x37f   : > { %6264 = vmatprep.subr.msk.bf16.mxu0 %vm687_vm0, %v1675_v51  ;;  %v1717_v22 = vsel %vm687_vm0, %v1675_v51, 0 }
 0x380   : > { %5867 = vmatpush3.bf16.xpose.msra.mxu0 %v1717_v22  ;;  %985 = vst [vmem:[%s7541_s12 + $0x40] sm:$0xff] %v962_v20 }
 0x381   : > { %v6478_v38 = vpop.eup %6477 }
 0x382   : > { %v968_v42 = vmul.f32 %v6478_v38, %v7464_v15  ;;  %v1159_v15 = vpop.permute.xlu0 %1158 }
 0x383   : > { %5803 = vmatpush3.bf16.xpose.msra.mxu1 %v1193_v13  ;;  %v1205_v4 = vsel %vm687_vm0, %v1159_v15, 0 }
 0x384   : > { %6257 = vmatprep.subr.msk.bf16.mxu1 %vm687_vm0, %v7424_v40  ;;  %988 = vst [vmem:[%s7541_s12 + $0x58] sm:$0xff] %v968_v42  ;;  %v998_v63 = vpack.c.bf16 %v968_v42, %v966_v18 }
 0x385   : > { %v6480_v25 = vpop.eup %6479 }
 0x386   : > { %v964_v14 = vmul.f32 %v6480_v25, %v7467_v29  ;;  %v1202_v29 = vsel %vm687_vm0, %v7528_v35, 0 }
 0x388   : > { %986 = vst [vmem:[%s7541_s12 + $0x48] sm:$0xff] %v964_v14  ;;  %v997_v30 = vpack.c.bf16 %v964_v14, %v962_v20 }
 0x38a   : > { %5790 = vmatprep.mubr.bf16.mxu1 %v997_v30 }
 0x38b   : > { %5805 = vmatpush3.bf16.xpose.msra.mxu1 %v1196_v62 }
 0x38c   : > { %5791 = vmatmul.mubr.bf16.gmra.mrb[24].mxu1 %v998_v63  ;;  %6258 = vmatprep.subr.msk.bf16.mxu1 %vm687_vm0, %v7426_v41 }
 0x393   : > { %5807 = vmatpush3.bf16.xpose.msra.mxu1 %v1199_v39 }
 0x394   : > { %6259 = vmatprep.subr.msk.bf16.mxu1 %vm687_vm0, %v7528_v35 }
 0x39b   : > { %5809 = vmatpush3.bf16.xpose.msra.mxu1 %v1202_v29 }
 0x39c   : > { %6260 = vmatprep.subr.msk.bf16.mxu1 %vm687_vm0, %v1159_v15  ;;  %v942_v40 = vpop.xlane.xlu0 %941 }
 0x39d   : > { %6481 = vrcp.f32 %v942_v40 }
 0x3a0   : > { %v938_v0 = vpop.xlane.xlu0 %937 }
 0x3a1   : > { %6483 = vrcp.f32 %v938_v0 }
 0x3a3   : > { %5811 = vmatpush3.bf16.xpose.msra.mxu1 %v1205_v4 }
 0x3a4   : > { %v944_v41 = vpop.xlane.xlu0 %943 }
 0x3a5   : > { %6485 = vrcp.f32 %v944_v41 }
 0x3a7   : > { %v6482_v46 = vpop.eup %6481 }
 0x3a8   : > { %v1161_v53 = vpop.permute.xlu0 %1160  ;;  %v974_v7 = vmul.f32 %v6482_v46, %v7477_v55 }
 0x3a9   : > { %6261 = vmatprep.subr.msk.bf16.mxu1 %vm687_vm0, %v1161_v53  ;;  %v1208_v35 = vsel %vm687_vm0, %v1161_v53, 0 }
 0x3aa   : > { %991 = vst [vmem:[%s7541_s12 + $0x70] sm:$0xff] %v974_v7 }
 0x3ab   : > { %v6484_v9 = vpop.eup %6483  ;;  %5813 = vmatpush3.bf16.xpose.msra.mxu1 %v1208_v35 }
 0x3ac   : > { %v1123_v56 = vpop.permute.xlu0 %1122  ;;  %v970_v58 = vmul.f32 %v6484_v9, %v7481_v26 }
 0x3ae   : > { %989 = vst [vmem:[%s7541_s12 + $0x60] sm:$0xff] %v970_v58 }
 0x3af   : > { %v6486_v43 = vpop.eup %6485  ;;  %v940_v16 = vpop.xlane.xlu1 %939 }
 0x3b0   : > { %6487 = vrcp.f32 %v940_v16  ;;  %v1679_v17 = vpop.permute.xlu0 %1678  ;;  %v976_v44 = vmul.f32 %v6486_v43, %v7484_v31 }
 0x3b1   : > { %v1723_v31 = vsel %vm687_vm0, %v1679_v17, 0 }
 0x3b2   : > { %992 = vst [vmem:[%s7541_s12 + $0x78] sm:$0xff] %v976_v44  ;;  %v1000_v22 = vpack.c.bf16 %v976_v44, %v974_v7 }
 0x3b3   : > { %v1677_v55 = vpop.permute.xlu1 %1676 }
 0x3b4   : > { %v1129_v12 = vpop.permute.xlu0 %1128  ;;  %6265 = vmatprep.subr.msk.bf16.mxu0 %vm687_vm0, %v1677_v55  ;;  %v1720_v1 = vsel %vm687_vm0, %v1677_v55, 0 }
 0x3b5   : > { %5869 = vmatpush3.bf16.xpose.msra.mxu0 %v1720_v1 }
 0x3b6   : > { %6266 = vmatprep.subr.msk.bf16.mxu0 %vm687_vm0, %v1679_v17 }
 0x3b7   : > { %v1125_v27 = vpop.permute.xlu1 %1124 }
 0x3b8   : > { %v1131_v26 = vpop.permute.xlu0 %1130 }
 0x3ba   : > { %v6488_v48 = vpop.eup %6487 }
 0x3bb   : > { %v1127_v18 = vpop.permute.xlu1 %1126  ;;  %v972_v28 = vmul.f32 %v6488_v48, %v7487_v33 }
 0x3bc   : > { %v1683_v51 = vpop.permute.xlu0 %1682 }
 0x3bd   : > { %5871 = vmatpush3.bf16.xpose.msra.mxu0 %v1723_v31  ;;  %990 = vst [vmem:[%s7541_s12 + $0x68] sm:$0xff] %v972_v28  ;;  %v999_v20 = vpack.c.bf16 %v972_v28, %v970_v58  ;;  %v1729_v30 = vsel %vm687_vm0, %v1683_v51, 0 }
 0x3bf   : > { %5794 = vmatprep.mubr.bf16.mxu1 %v999_v20  ;;  %v1681_v38 = vpop.permute.xlu1 %1680 }
 0x3c0   : > { %v1137_v13 = vpop.permute.xlu0 %1136  ;;  %5795 = vmatmul.mubr.bf16.gmra.mrb[28].mxu1 %v1000_v22  ;;  %6267 = vmatprep.subr.msk.bf16.mxu0 %vm687_vm0, %v1681_v38  ;;  %v1726_v14 = vsel %vm687_vm0, %v1681_v38, 0 }
 0x3c1   : > { %5814 = vmatprep.mubr.msk.bf16.mxu1 %vm687_vm0, %v1123_v56 }
 0x3c3   : > { %v1133_v42 = vpop.permute.xlu1 %1132 }
 0x3c4   : > { %v1655_v25 = vpop.permute.xlu0 %1654 }
 0x3c5   : > { %5873 = vmatpush3.bf16.xpose.msra.mxu0 %v1726_v14  ;;  %5878 = vmatprep.mubr.msk.bf16.mxu0 %vm687_vm0, %v1655_v25 }
 0x3c6   : > { %6268 = vmatprep.subr.msk.bf16.mxu0 %vm687_vm0, %v1683_v51 }
 0x3c7   : > { %v1135_v33 = vpop.permute.xlu1 %1134 }
 0x3c8   : > { %5815 = vmatmul.mubr.msk.bf16.vlgmr.msra.gmra.mrb[32].mxu1 %vm687_vm0, %v1125_v27  ;;  %v1659_v15 = vpop.permute.xlu0 %1658 }
 0x3c9   : > { %5818 = vmatprep.mubr.msk.bf16.mxu1 %vm687_vm0, %v1127_v18 }
 0x3cb   : > { %v1685_v62 = vpop.permute.xlu1 %1684 }
 0x3cc   : > { %v1732_v63 = vsel %vm687_vm0, %v1685_v62, 0  ;;  %v1663_v40 = vpop.permute.xlu0 %1662 }
 0x3cd   : > { %5875 = vmatpush3.bf16.xpose.msra.mxu0 %v1729_v30 }
 0x3ce   : > { %6269 = vmatprep.subr.msk.bf16.mxu0 %vm687_vm0, %v1685_v62 }
 0x3cf   : > { %v1657_v39 = vpop.permute.xlu1 %1656 }
 0x3d0   : > { %5819 = vmatmul.mubr.msk.bf16.gmra.mrb[36].mxu1 %vm687_vm0, %v1129_v12  ;;  %v1667_v4 = vpop.permute.xlu0 %1666 }
 0x3d1   : > { %5822 = vmatprep.mubr.msk.bf16.mxu1 %vm687_vm0, %v1131_v26 }
 0x3d3   : > { %v1661_v29 = vpop.permute.xlu1 %1660 }
 0x3d5   : > { %5877 = vmatpush3.bf16.xpose.msra.mxu0 %v1732_v63 }
 0x3d7   : > { %v1665_v0 = vpop.permute.xlu1 %1664 }
 0x3d8   : > { %5823 = vmatmul.mubr.msk.bf16.gmra.mrb[40].mxu1 %vm687_vm0, %v1133_v42 }
 0x3d9   : > { %5826 = vmatprep.mubr.msk.bf16.mxu1 %vm687_vm0, %v1135_v33 }
 0x3db   : > { %v1669_v41 = vpop.permute.xlu1 %1668 }
 0x3dc   : > { %5879 = vmatmul.mubr.msk.bf16.vlgmr.msra.gmra.mrb[48].mxu0 %vm687_vm0, %v1657_v39 }
 0x3dd   : > { %5882 = vmatprep.mubr.msk.bf16.mxu0 %vm687_vm0, %v1659_v15 }
 0x3e0   : > { %5827 = vmatmul.mubr.msk.bf16.gmra.mrb[44].mxu1 %vm687_vm0, %v1137_v13 }
 0x3e4   : > { %5883 = vmatmul.mubr.msk.bf16.gmra.mrb[52].mxu0 %vm687_vm0, %v1661_v29 }
 0x3e5   : > { %5886 = vmatprep.mubr.msk.bf16.mxu0 %vm687_vm0, %v1663_v40 }
 0x3ec   : > { %5887 = vmatmul.mubr.msk.bf16.gmra.mrb[56].mxu0 %vm687_vm0, %v1665_v0 }
 0x3ed   : > { %5890 = vmatprep.mubr.msk.bf16.mxu0 %vm687_vm0, %v1667_v4 }
 0x3f4   : > { %5891 = vmatmul.mubr.msk.bf16.gmra.mrb[60].mxu0 %vm687_vm0, %v1669_v41 }
 0x445   : > { %v5784_v46 = vpop.f32.mrb[16].mxu1 }
 0x446   : > { %v1035_v53 = vpop.f32.mrb[17].mxu1 }
 0x447   : > { %v5785_v7 = vpop.f32.mrb[18].mxu1 }
 0x448   : > { %v1099_v35 = vpack.c.bf16 %v5785_v7, %v5784_v46  ;;  %v1038_v9 = vpop.f32.mrb[19].mxu1 }
 0x449   : > { %v1098_v56 = vpack.c.bf16 %v1038_v9, %v1035_v53 }
 0x44a   : > { %1107 = vst.msk [vmem:[#allocation2 + $0x8] sm:$0xff] %vm687_vm0, %v1099_v35 }
 0x44b   : > { %1106 = vst.msk [vmem:[#allocation2] sm:$0xff] %vm687_vm0, %v1098_v56 }
 0x44d   : > { %v5788_v58 = vpop.f32.mrb[20].mxu1 }
 0x44e   : > { %v1051_v43 = vpop.f32.mrb[21].mxu1 }
 0x44f   : > { %v5789_v16 = vpop.f32.mrb[22].mxu1 }
 0x450   : > { %v1101_v17 = vpack.c.bf16 %v5789_v16, %v5788_v58  ;;  %v1054_v44 = vpop.f32.mrb[23].mxu1 }
 0x451   : > { %v1100_v55 = vpack.c.bf16 %v1054_v44, %v1051_v43 }
 0x452   : > { %1109 = vst.msk [vmem:[#allocation2 + $0x18] sm:$0xff] %vm687_vm0, %v1101_v17 }
 0x453   : > { %1108 = vst.msk [vmem:[#allocation2 + $0x10] sm:$0xff] %vm687_vm0, %v1100_v55 }
 0x45f   : > { %v5792_v12 = vpop.f32.mrb[24].mxu1 }
 0x460   : > { %v1067_v1 = vpop.f32.mrb[25].mxu1 }
 0x461   : > { %v5793_v27 = vpop.f32.mrb[26].mxu1 }
 0x462   : > { %v1103_v26 = vpack.c.bf16 %v5793_v27, %v5792_v12  ;;  %v1070_v48 = vpop.f32.mrb[27].mxu1 }
 0x463   : > { %v1102_v18 = vpack.c.bf16 %v1070_v48, %v1067_v1 }
 0x464   : > { %1111 = vst.msk [vmem:[#allocation2 + $0x28] sm:$0xff] %vm687_vm0, %v1103_v26 }
 0x465   : > { %1110 = vst.msk [vmem:[#allocation2 + $0x20] sm:$0xff] %vm687_vm0, %v1102_v18 }
 0x493   : > { %v5796_v28 = vpop.f32.mrb[28].mxu1 }
 0x494   : > { %v1083_v51 = vpop.f32.mrb[29].mxu1 }
 0x495   : > { %v5797_v31 = vpop.f32.mrb[30].mxu1 }
 0x496   : > { %v1105_v20 = vpack.c.bf16 %v5797_v31, %v5796_v28  ;;  %v1086_v22 = vpop.f32.mrb[31].mxu1 }
 0x497   : > { %v1104_v38 = vpack.c.bf16 %v1086_v22, %v1083_v51 }
 0x498   : > { %1113 = vst.msk [vmem:[#allocation2 + $0x38] sm:$0xff] %vm687_vm0, %v1105_v20 }
 0x499   : > { %1112 = vst.msk [vmem:[#allocation2 + $0x30] sm:$0xff] %vm687_vm0, %v1104_v38 }
 0x49b   : > { %v7636_v13 = vpop.f32.mrb[32].mxu1 }
 0x49c   : > { %v7638_v42 = vpop.f32.mrb[33].mxu1 }
 0x49d   : > { %v7640_v25 = vpop.f32.mrb[34].mxu1 }
 0x49e   : > { %v7642_v14 = vpop.f32.mrb[35].mxu1 }
 0x4a3   : > { %v7644_v33 = vpop.f32.mrb[36].mxu1 }
 0x4a4   : > { %v7646_v30 = vpop.f32.mrb[37].mxu1 }
 0x4a5   : > { %v7648_v62 = vpop.f32.mrb[38].mxu1 }
 0x4a6   : > { %v7650_v63 = vpop.f32.mrb[39].mxu1 }
 0x4ab   : > { %v7652_v39 = vpop.f32.mrb[40].mxu1 }
 0x4ac   : > { %v7654_v15 = vpop.f32.mrb[41].mxu1 }
 0x4ad   : > { %v7656_v29 = vpop.f32.mrb[42].mxu1 }
 0x4ae   : > { %v7658_v40 = vpop.f32.mrb[43].mxu1 }
 0x4af   : > { %v5880_v0 = vpop.f32.mrb[48].mxu0 }
 0x4b0   : > { %v1768_v4 = vpop.f32.mrb[49].mxu0 }
 0x4b1   : > { %1831 = vmax.xlane.f32.xlu0 %v1768_v4  ;;  %v5881_v41 = vpop.f32.mrb[50].mxu0 }
 0x4b2   : > { %v1771_v46 = vpop.f32.mrb[51].mxu0 }
 0x4b3   : > { %v7660_v53 = vpop.f32.mrb[44].mxu1  ;;  %1833 = vmax.xlane.f32.xlu1 %v1771_v46 }
 0x4b4   : > { %v7662_v7 = vpop.f32.mrb[45].mxu1 }
 0x4b5   : > { %v7664_v35 = vpop.f32.mrb[46].mxu1  ;;  %1835 = vmax.xlane.f32.xlu0 %v5880_v0 }
 0x4b6   : > { %v7666_v9 = vpop.f32.mrb[47].mxu1 }
 0x4b7   : > { %1837 = vmax.xlane.f32.xlu1 %v5881_v41  ;;  %v7668_v56 = vpop.f32.mrb[52].mxu0 }
 0x4b8   : > { %v7670_v58 = vpop.f32.mrb[53].mxu0 }
 0x4b9   : > { %1839 = vmax.xlane.f32.xlu0 %v7670_v58  ;;  %v7673_v43 = vpop.f32.mrb[54].mxu0 }
 0x4ba   : > { %v7675_v16 = vpop.f32.mrb[55].mxu0 }
 0x4bb   : > { %1841 = vmax.xlane.f32.xlu1 %v7675_v16 }
 0x4bd   : > { %1843 = vmax.xlane.f32.xlu0 %v7668_v56 }
 0x4bf   : > { %1845 = vmax.xlane.f32.xlu1 %v7673_v43  ;;  %v7680_v17 = vpop.f32.mrb[56].mxu0 }
 0x4c0   : > { %v7682_v44 = vpop.f32.mrb[57].mxu0 }
 0x4c1   : > { %v7684_v55 = vpop.f32.mrb[58].mxu0 }
 0x4c2   : > { %v7686_v12 = vpop.f32.mrb[59].mxu0 }
 0x4c3   : > { %1847 = vmax.xlane.f32.xlu1 %v7682_v44 }
 0x4c7   : > { %1849 = vmax.xlane.f32.xlu1 %v7686_v12  ;;  %v7690_v1 = vpop.f32.mrb[60].mxu0 }
 0x4c8   : > { %v7692_v27 = vpop.f32.mrb[61].mxu0 }
 0x4c9   : > { %v7694_v26 = vpop.f32.mrb[62].mxu0 }
 0x4ca   : > { %v7696_v48 = vpop.f32.mrb[63].mxu0 }
 0x4cb   : > { %1851 = vmax.xlane.f32.xlu1 %v7680_v17 }
 0x4cf   : > { %1853 = vmax.xlane.f32.xlu1 %v7684_v55 }
 0x4d3   : > { %1484 = vrot.lane.b32.xlu0 %v7292_v11, %s7063_s29 }
 0x4e0   : > { %1486 = vrot.lane.b32.xlu1 %v7288_v8, %s7063_s29 }
 0x4e4   : > { %1488 = vrot.lane.b32.xlu1 %v7309_v24, %s7063_s29 }
 0x4f2   : > { %1857 = vmax.xlane.f32.xlu0 %v7696_v48 }
 0x4f6   : > { %1859 = vmax.xlane.f32.xlu0 %v7690_v1 }
 0x4fa   : > { %1861 = vmax.xlane.f32.xlu0 %v7694_v26 }
 0x508   : > { %1855 = vmax.xlane.f32.xlu1 %v7692_v27 }
 0x510   : > { %1490 = vrot.lane.b32.xlu0 %v7305_v21, %s7063_s29 }
 0x514   : > { %1494 = vrot.lane.b32.xlu0 %v7323_v34, %s7063_s29 }
 0x518   : > { %1498 = vrot.lane.b32.xlu0 %v7341_v47, %s7063_s29 }
 0x519   : > { %1492 = vrot.lane.b32.xlu1 %v7327_v37, %s7063_s29 }
 0x51c   : > { %2002 = vrot.lane.b32.xlu0 %v7288_v8, %s9996_s11 }
 0x51d   : > { %1496 = vrot.lane.b32.xlu1 %v7345_v50, %s7063_s29 }
 0x520   : > { %2006 = vrot.lane.b32.xlu0 %v7305_v21, %s9996_s11 }
 0x521   : > { %2000 = vrot.lane.b32.xlu1 %v7292_v11, %s9996_s11 }
 0x524   : > { %2010 = vrot.lane.b32.xlu0 %v7323_v34, %s9996_s11 }
 0x525   : > { %2004 = vrot.lane.b32.xlu1 %v7309_v24, %s9996_s11 }
 0x528   : > { %2012 = vrot.lane.b32.xlu0 %v7345_v50, %s9996_s11 }
 0x529   : > { %2008 = vrot.lane.b32.xlu1 %v7327_v37, %s9996_s11 }
 0x52c   : > { %2014 = vrot.lane.b32.xlu0 %v7341_v47, %s9996_s11 }
 0x53e   : > { %v1832_v18 = vpop.xlane.xlu0 %1831 }
 0x53f   : > { %v1863_v31 = vsub.f32 %v1768_v4, %v1832_v18 }
 0x540   : > { %v1834_v28 = vpop.xlane.xlu1 %1833 }
 0x541   : > { %v1864_v38 = vsub.f32 %v1771_v46, %v1834_v28  ;;  %v1879_v8 = vmul.f32 1.442695, %v1863_v31 }
 0x542   : > { %v1836_v51 = vpop.xlane.xlu0 %1835 }
 0x543   : > { %v1865_v20 = vsub.f32 %v5880_v0, %v1836_v51  ;;  %v1881_v45 = vmul.f32 1.442695, %v1864_v38 }
 0x544   : > { %v1838_v22 = vpop.xlane.xlu1 %1837 }
 0x545   : > { %v1883_v2 = vmul.f32 1.442695, %v1865_v20  ;;  %v1866_v34 = vsub.f32 %v5881_v41, %v1838_v22 }
 0x546   : > { %v7736_v21 = vpop.xlane.xlu0 %1839 }
 0x547   : > { %6489 = vpow2.f32 %v1883_v2  ;;  %v1885_v50 = vmul.f32 1.442695, %v1866_v34 }
 0x548   : > { %v1842_v3 = vpop.xlane.xlu1 %1841 }
 0x549   : > { %6491 = vpow2.f32 %v1885_v50  ;;  %v1868_v38 = vsub.f32 %v7675_v16, %v1842_v3 }
 0x54a   : > { %v7738_v37 = vpop.xlane.xlu0 %1843  ;;  %6493 = vpow2.f32 %v1879_v8 }
 0x54b   : > { %6495 = vpow2.f32 %v1881_v45 }
 0x54c   : > { %v7740_v47 = vpop.xlane.xlu1 %1845 }
 0x54e   : > { %v1485_v4 = vpop.permute.xlu0 %1484 }
 0x54f   : > { %5830 = vmatprep.subr.bf16.mxu1 %v1485_v4 }
 0x550   : > { %5831 = vmatpush3.bf16.msra.mxu1 %v1485_v4  ;;  %v7742_v0 = vpop.xlane.xlu1 %1847 }
 0x551   : > { %v7744_v41 = vpop.eup %6489 }
 0x552   : > { %1915 = vadd.xlane.f32.xlu1 %v7744_v41 }
 0x553   : > { %v7747_v2 = vpop.eup %6491 }
 0x554   : > { %1917 = vadd.xlane.f32.xlu0 %v7747_v2  ;;  %v7750_v34 = vpop.xlane.xlu1 %1849  ;;  %v7752_v50 = vpop.eup %6493 }
 0x555   : > { %v7755_v8 = vpop.eup %6495 }
 0x556   : > { %1911 = vadd.xlane.f32.xlu1 %v7752_v50 }
 0x558   : > { %1913 = vadd.xlane.f32.xlu0 %v7755_v8  ;;  %v7758_v45 = vpop.xlane.xlu1 %1851 }
 0x55a   : > { %1309 = vmax.xlane.f32.xlu1 %v7642_v14 }
 0x55c   : > { %1311 = vmax.xlane.f32.xlu0 %v7636_v13  ;;  %v7762_v46 = vpop.xlane.xlu1 %1853 }
 0x55e   : > { %1321 = vmax.xlane.f32.xlu1 %v7648_v62 }
 0x560   : > { %1307 = vmax.xlane.f32.xlu0 %v7638_v42  ;;  %v1487_v18 = vpop.permute.xlu1 %1486 }
 0x561   : > { %5832 = vmatprep.subr.bf16.mxu1 %v1487_v18 }
 0x562   : > { %1317 = vmax.xlane.f32.xlu1 %v7650_v63  ;;  %5833 = vmatpush3.bf16.msra.mxu1 %v1487_v18  ;;  %v1889_v18 = vmul.f32 1.442695, %v1868_v38 }
 0x564   : > { %1313 = vmax.xlane.f32.xlu0 %v7640_v25  ;;  %v1489_v28 = vpop.permute.xlu1 %1488  ;;  %6497 = vpow2.f32 %v1889_v18  ;;  %v1870_v18 = vsub.f32 %v7673_v43, %v7740_v47 }
 0x565   : > { %5834 = vmatprep.subr.bf16.mxu1 %v1489_v28 }
 0x566   : > { %1329 = vmax.xlane.f32.xlu1 %v7656_v29  ;;  %5835 = vmatpush3.bf16.msra.mxu1 %v1489_v28 }
 0x568   : > { %1319 = vmax.xlane.f32.xlu0 %v7644_v33 }
 0x56a   : > { %1325 = vmax.xlane.f32.xlu1 %v7658_v40 }
 0x56c   : > { %1315 = vmax.xlane.f32.xlu0 %v7646_v30 }
 0x56e   : > { %1337 = vmax.xlane.f32.xlu1 %v7664_v35  ;;  %v7795_v16 = vpop.eup %6497 }
 0x570   : > { %1327 = vmax.xlane.f32.xlu0 %v7652_v39 }
 0x572   : > { %1333 = vmax.xlane.f32.xlu1 %v7666_v9 }
 0x574   : > { %1323 = vmax.xlane.f32.xlu0 %v7654_v15 }
 0x578   : > { %1335 = vmax.xlane.f32.xlu0 %v7660_v53 }
 0x57c   : > { %1331 = vmax.xlane.f32.xlu0 %v7662_v7 }
 0x57f   : > { %v7778_v51 = vpop.xlane.xlu0 %1857 }
 0x583   : > { %2188 = vrot.lane.b32.xlu1 %v7278_v61, %s9994_s13  ;;  %v7782_v31 = vpop.xlane.xlu0 %1859  ;;  %v1867_v61 = vsub.f32 %v7670_v58, %v7736_v21 }
 0x587   : > { %v7784_v20 = vpop.xlane.xlu0 %1861 }
 0x58b   : > { %v1491_v22 = vpop.permute.xlu0 %1490 }
 0x58c   : > { %5836 = vmatprep.subr.bf16.mxu1 %v1491_v22 }
 0x58d   : > { %5837 = vmatpush3.bf16.msra.mxu1 %v1491_v22  ;;  %v1887_v22 = vmul.f32 1.442695, %v1867_v61  ;;  %v1893_v61 = vmul.f32 1.442695, %v1870_v18 }
 0x58f   : > { %v1495_v24 = vpop.permute.xlu0 %1494  ;;  %6499 = vpow2.f32 %v1887_v22 }
 0x592   : > { %2186 = vrot.lane.b32.xlu0 %v7264_v54, %s9994_s13  ;;  %v1869_v54 = vsub.f32 %v7668_v56, %v7738_v37 }
 0x593   : > { %v1499_v3 = vpop.permute.xlu0 %1498 }
 0x594   : > { %v1891_v38 = vmul.f32 1.442695, %v1869_v54 }
 0x595   : > { %v7789_v4 = vpop.xlane.xlu1 %1855 }
 0x596   : > { %6501 = vpow2.f32 %v1891_v38 }
 0x597   : > { %6503 = vpow2.f32 %v1893_v61 }
 0x599   : > { %v1493_v28 = vpop.permute.xlu1 %1492  ;;  %v7803_v21 = vpop.eup %6499 }
 0x59a   : > { %5838 = vmatprep.subr.bf16.mxu1 %v1493_v28 }
 0x59b   : > { %5839 = vmatpush3.bf16.msra.mxu1 %v1493_v28 }
 0x59c   : > { %5840 = vmatprep.subr.bf16.mxu1 %v1495_v24 }
 0x59d   : > { %v1497_v19 = vpop.permute.xlu1 %1496 }
 0x59f   : > { %5841 = vmatpush3.bf16.msra.mxu1 %v1495_v24  ;;  %v7812_v24 = vpop.permute.xlu0 %2002 }
 0x5a0   : > { %5842 = vmatprep.subr.bf16.mxu1 %v1497_v19  ;;  %10018 = vst [vmem:[#allocation24_spill] sm:$0xff] %v7812_v24 }
 0x5a1   : > { %v7799_v28 = vpop.permute.xlu1 %2000 }
 0x5a2   : > { %10017 = vst [vmem:[#allocation23_spill] sm:$0xff] %v7799_v28 }
 0x5a3   : > { %5843 = vmatpush3.bf16.msra.mxu1 %v1497_v19  ;;  %v7806_v19 = vpop.eup %6501  ;;  %v7814_v37 = vpop.permute.xlu0 %2006 }
 0x5a4   : > { %5844 = vmatprep.subr.bf16.mxu1 %v1499_v3  ;;  %v7809_v54 = vpop.eup %6503  ;;  %10019 = vst [vmem:[#allocation25_spill] sm:$0xff] %v7814_v37 }
 0x5a5   : > { %v7818_v56 = vpop.permute.xlu1 %2004 }
 0x5a6   : > { %10021 = vst [vmem:[#allocation27_spill] sm:$0xff] %v7818_v56 }
 0x5a7   : > { %1921 = vadd.xlane.f32.xlu1 %v7795_v16  ;;  %5845 = vmatpush3.bf16.msra.mxu1 %v1499_v3  ;;  %v7816_v47 = vpop.permute.xlu0 %2010 }
 0x5a8   : > { %5894 = vmatprep.subr.bf16.mxu1 %v7799_v28  ;;  %10020 = vst [vmem:[#allocation26_spill] sm:$0xff] %v7816_v47 }
 0x5a9   : > { %v7822_v43 = vpop.permute.xlu1 %2008 }
 0x5aa   : > { %10023 = vst [vmem:[#allocation29_spill] sm:$0xff] %v7822_v43 }
 0x5ab   : > { %v7820_v58 = vpop.permute.xlu0 %2012 }
 0x5ac   : > { %10022 = vst [vmem:[#allocation28_spill] sm:$0xff] %v7820_v58 }
 0x5af   : > { %v7824_v22 = vpop.permute.xlu0 %2014 }
 0x5b0   : > { %10024 = vst [vmem:[#allocation30_spill] sm:$0xff] %v7824_v22 }
 0x5b1   : > { %1919 = vadd.xlane.f32.xlu0 %v7803_v21 }
 0x5b5   : > { %1923 = vadd.xlane.f32.xlu0 %v7806_v19 }
 0x5b9   : > { %1925 = vadd.xlane.f32.xlu0 %v7809_v54 }
 0x5df   : > { %v1916_v3 = vpop.xlane.xlu1 %1915 }
 0x5e0   : > { %6505 = vrcp.f32 %v1916_v3 }
 0x5e1   : > { %v1918_v38 = vpop.xlane.xlu0 %1917 }
 0x5e2   : > { %6507 = vrcp.f32 %v1918_v38 }
 0x5e3   : > { %v1912_v18 = vpop.xlane.xlu1 %1911 }
 0x5e4   : > { %6509 = vrcp.f32 %v1912_v18 }
 0x5e5   : > { %v1914_v61 = vpop.xlane.xlu0 %1913 }
 0x5e6   : > { %6511 = vrcp.f32 %v1914_v61 }
 0x5e7   : > { %v1310_v37 = vpop.xlane.xlu1 %1309 }
 0x5e9   : > { %v1312_v47 = vpop.xlane.xlu0 %1311 }
 0x5ea   : > { %v6506_v24 = vpop.eup %6505  ;;  %v1341_v56 = vsub.f32 %v7636_v13, %v1312_v47 }
 0x5eb   : > { %v7828_v58 = vmul.f32 %v6506_v24, %v7744_v41  ;;  %v1322_v43 = vpop.xlane.xlu1 %1321 }
 0x5ec   : > { %v6508_v22 = vpop.eup %6507  ;;  %v1359_v28 = vmul.f32 1.442695, %v1341_v56  ;;  %v1346_v3 = vsub.f32 %v7648_v62, %v1322_v43  ;;  %v1340_v43 = vsub.f32 %v7642_v14, %v1310_v37 }
 0x5ed   : > { %5265 = vst [vmem:[%s7541_s12 + $0x110] sm:$0xff] %v7828_v58  ;;  %v7834_v38 = vmul.f32 %v6508_v22, %v7747_v2  ;;  %v1308_v18 = vpop.xlane.xlu0 %1307 }
 0x5ee   : > { %v6510_v61 = vpop.eup %6509  ;;  %6513 = vpow2.f32 %v1359_v28  ;;  %v1369_v11 = vmul.f32 1.442695, %v1346_v3  ;;  %v1339_v13 = vsub.f32 %v7638_v42, %v1308_v18 }
 0x5ef   : > { %5266 = vst [vmem:[%s7541_s12 + $0x118] sm:$0xff] %v7834_v38  ;;  %v1318_v41 = vpop.xlane.xlu1 %1317  ;;  %v7840_v24 = vmul.f32 %v6510_v61, %v7752_v50 }
 0x5f0   : > { %v6512_v47 = vpop.eup %6511  ;;  %v1355_v2 = vmul.f32 1.442695, %v1339_v13  ;;  %v1344_v56 = vsub.f32 %v7650_v63, %v1318_v41  ;;  %6515 = vpow2.f32 %v1369_v11  ;;  %v1357_v11 = vmul.f32 1.442695, %v1340_v43 }
 0x5f1   : > { %v1314_v28 = vpop.xlane.xlu0 %1313  ;;  %v7847_v42 = vmul.f32 %v6512_v47, %v7755_v8  ;;  %5263 = vst [vmem:[%s7541_s12 + $0x100] sm:$0xff] %v7840_v24 }
 0x5f2   : > { %6517 = vpow2.f32 %v1355_v2  ;;  %v1365_v22 = vmul.f32 1.442695, %v1344_v56  ;;  %v1342_v50 = vsub.f32 %v7640_v25, %v1314_v28 }
 0x5f3   : > { %v1330_v3 = vpop.xlane.xlu1 %1329  ;;  %5264 = vst [vmem:[%s7541_s12 + $0x108] sm:$0xff] %v7847_v42 }
 0x5f4   : > { %v1361_v63 = vmul.f32 1.442695, %v1342_v50  ;;  %v1350_v14 = vsub.f32 %v7656_v29, %v1330_v3  ;;  %6519 = vpow2.f32 %v1365_v22 }
 0x5f5   : > { %v1320_v37 = vpop.xlane.xlu0 %1319 }
 0x5f6   : > { %6521 = vpow2.f32 %v1361_v63  ;;  %v1377_v8 = vmul.f32 1.442695, %v1350_v14  ;;  %v1345_v61 = vsub.f32 %v7644_v33, %v1320_v37 }
 0x5f7   : > { %v1326_v13 = vpop.xlane.xlu1 %1325  ;;  %6523 = vpow2.f32 %v1357_v11 }
 0x5f8   : > { %v7858_v41 = vpop.eup %6513  ;;  %v1348_v25 = vsub.f32 %v7658_v40, %v1326_v13  ;;  %v1367_v47 = vmul.f32 1.442695, %v1345_v61  ;;  %6525 = vpow2.f32 %v1377_v8 }
 0x5f9   : > { %v1316_v2 = vpop.xlane.xlu0 %1315  ;;  %1391 = vadd.xlane.f32.xlu0 %v7858_v41 }
 0x5fa   : > { %v1373_v56 = vmul.f32 1.442695, %v1348_v25  ;;  %v1343_v29 = vsub.f32 %v7646_v30, %v1316_v2  ;;  %v7863_v43 = vpop.eup %6515  ;;  %6527 = vpow2.f32 %v1367_v47 }
 0x5fb   : > { %v1338_v28 = vpop.xlane.xlu1 %1337 }
 0x5fc   : > { %v7865_v22 = vpop.eup %6517  ;;  %v1354_v33 = vsub.f32 %v7664_v35, %v1338_v28  ;;  %v1363_v50 = vmul.f32 1.442695, %v1343_v29  ;;  %6529 = vpow2.f32 %v1373_v56 }
 0x5fd   : > { %v1328_v3 = vpop.xlane.xlu0 %1327  ;;  %1387 = vadd.xlane.f32.xlu1 %v7865_v22  ;;  %1401 = vadd.xlane.f32.xlu0 %v7863_v43 }
 0x5fe   : > { %v1385_v40 = vmul.f32 1.442695, %v1354_v33  ;;  %v1349_v63 = vsub.f32 %v7652_v39, %v1328_v3  ;;  %v7871_v14 = vpop.eup %6519  ;;  %6531 = vpow2.f32 %v1363_v50 }
 0x5ff   : > { %v1334_v30 = vpop.xlane.xlu1 %1333 }
 0x600   : > { %v7873_v11 = vpop.eup %6521  ;;  %v1352_v37 = vsub.f32 %v7666_v9, %v1334_v30  ;;  %v1375_v35 = vmul.f32 1.442695, %v1349_v63  ;;  %6533 = vpow2.f32 %v1385_v40 }
 0x601   : > { %v1324_v8 = vpop.xlane.xlu0 %1323  ;;  %1393 = vadd.xlane.f32.xlu1 %v7873_v11  ;;  %1397 = vadd.xlane.f32.xlu0 %v7871_v14  ;;  %v7879_v25 = vpop.eup %6523 }
 0x602   : > { %v1381_v61 = vmul.f32 1.442695, %v1352_v37  ;;  %v1347_v13 = vsub.f32 %v7654_v15, %v1324_v8  ;;  %v7881_v39 = vpop.eup %6525  ;;  %6535 = vpow2.f32 %v1375_v35  ;;  %v1872_v37 = vsub.f32 %v7686_v12, %v7750_v34 }
 0x604   : > { %6537 = vpow2.f32 %v1381_v61  ;;  %v1371_v9 = vmul.f32 1.442695, %v1347_v13  ;;  %v7886_v56 = vpop.eup %6527  ;;  %v1874_v13 = vsub.f32 %v7684_v55, %v7762_v46  ;;  %v7936_v46 = vpop.permute.xlu1 %2188 }
 0x605   : > { %v1336_v47 = vpop.xlane.xlu0 %1335  ;;  %1389 = vadd.xlane.f32.xlu1 %v7879_v25  ;;  %1409 = vadd.xlane.f32.xlu0 %v7881_v39 }
 0x606   : > { %v1353_v2 = vsub.f32 %v7660_v53, %v1336_v47  ;;  %v7888_v29 = vpop.eup %6529  ;;  %6539 = vpow2.f32 %v1371_v9  ;;  %v1871_v53 = vsub.f32 %v7682_v44, %v7742_v0  ;;  %v1897_v44 = vmul.f32 1.442695, %v1872_v37 }
 0x607   : > { %v1873_v0 = vsub.f32 %v7680_v17, %v7758_v45  ;;  %v1901_v34 = vmul.f32 1.442695, %v1874_v13  ;;  %v1875_v9 = vsub.f32 %v7692_v27, %v7789_v4 }
 0x608   : > { %v1383_v15 = vmul.f32 1.442695, %v1353_v2  ;;  %v7893_v50 = vpop.eup %6531 }
 0x609   : > { %v1332_v28 = vpop.xlane.xlu0 %1331  ;;  %1399 = vadd.xlane.f32.xlu1 %v7886_v56  ;;  %1405 = vadd.xlane.f32.xlu0 %v7888_v29  ;;  %v1899_v61 = vmul.f32 1.442695, %v1873_v0 }
 0x60a   : > { %v1351_v33 = vsub.f32 %v7662_v7, %v1332_v28  ;;  %v7895_v3 = vpop.eup %6533  ;;  %6541 = vpow2.f32 %v1383_v15  ;;  %v1895_v7 = vmul.f32 1.442695, %v1871_v53  ;;  %v1877_v28 = vsub.f32 %v7690_v1, %v7782_v31 }
 0x60b   : > { %v1903_v15 = vmul.f32 1.442695, %v1875_v9  ;;  %v1878_v53 = vsub.f32 %v7694_v26, %v7784_v20  ;;  %v1876_v9 = vsub.f32 %v7696_v48, %v7778_v51  ;;  %v10025_v48 = vld [vmem:[#allocation13_spill] sm:$0xff]  ;;  %v10026_v51 = vld [vmem:[#allocation14_spill] sm:$0xff] }
 0x60c   : > { %v1379_v40 = vmul.f32 1.442695, %v1351_v33  ;;  %v7901_v63 = vpop.eup %6535  ;;  %v1907_v33 = vmul.f32 1.442695, %v1877_v28 }
 0x60d   : > { %1395 = vadd.xlane.f32.xlu1 %v7893_v50  ;;  %1417 = vadd.xlane.f32.xlu0 %v7895_v3  ;;  %v1905_v28 = vmul.f32 1.442695, %v1876_v9 }
 0x60e   : > { %v7903_v30 = vpop.eup %6537  ;;  %6543 = vpow2.f32 %v1379_v40  ;;  %v7944_v40 = vpop.permute.xlu0 %2186 }
 0x60f   : > { %6545 = vpow2.f32 %v1895_v7  ;;  %v1909_v7 = vmul.f32 1.442695, %v1878_v53  ;;  %v10029_v53 = vld [vmem:[#allocation18_spill] sm:$0xff] }
 0x610   : > { %v7909_v35 = vpop.eup %6539  ;;  %6547 = vpow2.f32 %v1897_v44 }
 0x611   : > { %1407 = vadd.xlane.f32.xlu1 %v7901_v63  ;;  %1413 = vadd.xlane.f32.xlu0 %v7903_v30  ;;  %6549 = vpow2.f32 %v1899_v61 }
 0x612   : > { %6551 = vpow2.f32 %v1901_v34 }
 0x614   : > { %v7914_v8 = vpop.eup %6541 }
 0x615   : > { %1403 = vadd.xlane.f32.xlu1 %v7909_v35 }
 0x618   : > { %v7919_v12 = vpop.eup %6543 }
 0x619   : > { %1415 = vadd.xlane.f32.xlu1 %v7914_v8  ;;  %v7922_v47 = vpop.eup %6545 }
 0x61a   : > { %v7925_v17 = vpop.eup %6547 }
 0x61b   : > { %v7930_v45 = vpop.eup %6549 }
 0x61c   : > { %v7933_v55 = vpop.eup %6551 }
 0x61d   : > { %1411 = vadd.xlane.f32.xlu1 %v7919_v12 }
 0x621   : > { %1927 = vadd.xlane.f32.xlu1 %v7922_v47 }
 0x625   : > { %1929 = vadd.xlane.f32.xlu1 %v7925_v17 }
 0x627   : > { %2190 = vrot.lane.b32.xlu0 %v7290_v10, %s9994_s13 }
 0x629   : > { %1931 = vadd.xlane.f32.xlu1 %v7930_v45 }
 0x62d   : > { %1933 = vadd.xlane.f32.xlu1 %v7933_v55 }
 0x634   : > { %v1922_v2 = vpop.xlane.xlu1 %1921 }
 0x635   : > { %6553 = vrcp.f32 %v1922_v2 }
 0x636   : > { %6555 = vpow2.f32 %v1903_v15 }
 0x637   : > { %6557 = vpow2.f32 %v1907_v33 }
 0x63e   : > { %v1920_v37 = vpop.xlane.xlu0 %1919  ;;  %2192 = vrot.lane.b32.xlu1 %v7307_v23, %s9994_s13 }
 0x63f   : > { %v6554_v27 = vpop.eup %6553  ;;  %6559 = vrcp.f32 %v1920_v37  ;;  %v10030_v37 = vld [vmem:[#allocation22_spill] sm:$0xff] }
 0x640   : > { %v7949_v4 = vmul.f32 %v6554_v27, %v7795_v16  ;;  %6561 = vpow2.f32 %v1909_v7  ;;  %v7953_v26 = vpop.eup %6555  ;;  %v10031_v27 = vld [vmem:[#allocation21_spill] sm:$0xff] }
 0x641   : > { %v7956_v20 = vpop.eup %6557 }
 0x642   : > { %v1924_v1 = vpop.xlane.xlu0 %1923  ;;  %5268 = vst [vmem:[%s7541_s12 + $0x128] sm:$0xff] %v7949_v4 }
 0x643   : > { %6563 = vrcp.f32 %v1924_v1 }
 0x646   : > { %v1926_v31 = vpop.xlane.xlu0 %1925  ;;  %1935 = vadd.xlane.f32.xlu0 %v7953_v26 }
 0x647   : > { %6565 = vrcp.f32 %v1926_v31 }
 0x648   : > { %6567 = vpow2.f32 %v1905_v28  ;;  %v10034_v28 = vld [vmem:[#allocation15_spill] sm:$0xff] }
 0x649   : > { %v6560_v44 = vpop.eup %6559 }
 0x64a   : > { %1939 = vadd.xlane.f32.xlu0 %v7956_v20  ;;  %v7960_v16 = vmul.f32 %v6560_v44, %v7803_v21  ;;  %v7962_v0 = vpop.eup %6561  ;;  %v10032_v44 = vld [vmem:[#allocation12_spill] sm:$0xff] }
 0x64c   : > { %5267 = vst [vmem:[%s7541_s12 + $0x120] sm:$0xff] %v7960_v16 }
 0x64d   : > { %v6564_v13 = vpop.eup %6563 }
 0x64e   : > { %1941 = vadd.xlane.f32.xlu0 %v7962_v0  ;;  %v7970_v34 = vmul.f32 %v6564_v13, %v7806_v19  ;;  %v10027_v19 = vld [vmem:[#allocation16_spill] sm:$0xff]  ;;  %v10033_v13 = vld [vmem:[#allocation10_spill] sm:$0xff] }
 0x650   : > { %5269 = vst [vmem:[%s7541_s12 + $0x130] sm:$0xff] %v7970_v34 }
 0x651   : > { %v6566_v21 = vpop.eup %6565 }
 0x652   : > { %v7977_v2 = vmul.f32 %v6566_v21, %v7809_v54  ;;  %v7983_v33 = vpop.eup %6567  ;;  %v10028_v54 = vld [vmem:[#allocation19_spill] sm:$0xff] }
 0x654   : > { %5270 = vst [vmem:[%s7541_s12 + $0x138] sm:$0xff] %v7977_v2 }
 0x662   : > { %1937 = vadd.xlane.f32.xlu1 %v7983_v33 }
 0x664   : > { %2194 = vrot.lane.b32.xlu0 %v7325_v36, %s9994_s13 }
 0x668   : > { %2198 = vrot.lane.b32.xlu0 %v7357_v60, %s9994_s13 }
 0x66c   : > { %2170 = vrot.lane.b32.xlu0 %v7262_v52, %s9994_s13 }
 0x670   : > { %2174 = vrot.lane.b32.xlu0 %v7286_v6, %s9994_s13 }
 0x673   : > { %2196 = vrot.lane.b32.xlu1 %v7343_v49, %s9994_s13 }
 0x674   : > { %2178 = vrot.lane.b32.xlu0 %v7321_v32, %s9994_s13 }
 0x677   : > { %2200 = vrot.lane.b32.xlu1 %v7366_v5, %s9994_s13 }
 0x678   : > { %2182 = vrot.lane.b32.xlu0 %v7355_v57, %s9994_s13 }
 0x67b   : > { %2172 = vrot.lane.b32.xlu1 %v7276_v59, %s9994_s13 }
 0x67c   : > { %2516 = vrot.lane.b32.xlu0 %v10025_v48, %s9994_s13 }
 0x67f   : > { %2176 = vrot.lane.b32.xlu1 %v10026_v51, %s9994_s13 }
 0x680   : > { %2520 = vrot.lane.b32.xlu0 %v10027_v19, %s9994_s13 }
 0x683   : > { %2180 = vrot.lane.b32.xlu1 %v10028_v54, %s9994_s13 }
 0x684   : > { %2524 = vrot.lane.b32.xlu0 %v10029_v53, %s9994_s13 }
 0x686   : > { %v1392_v7 = vpop.xlane.xlu0 %1391 }
 0x687   : > { %6569 = vrcp.f32 %v1392_v7  ;;  %2184 = vrot.lane.b32.xlu1 %v10030_v37, %s9994_s13 }
 0x688   : > { %2528 = vrot.lane.b32.xlu0 %v10031_v27, %s9994_s13 }
 0x68a   : > { %v1402_v1 = vpop.xlane.xlu0 %1401  ;;  %v1388_v31 = vpop.xlane.xlu1 %1387 }
 0x68b   : > { %6571 = vrcp.f32 %v1402_v1  ;;  %2518 = vrot.lane.b32.xlu1 %v10032_v44, %s9994_s13 }
 0x68c   : > { %6573 = vrcp.f32 %v1388_v31  ;;  %2702 = vrot.lane.b32.xlu0 %v10033_v13, %s7065_s14  ;;  %v10035_v31 = vld [vmem:[#allocation17_spill] sm:$0xff] }
 0x68e   : > { %v1398_v9 = vpop.xlane.xlu0 %1397  ;;  %v1394_v21 = vpop.xlane.xlu1 %1393 }
 0x68f   : > { %6575 = vrcp.f32 %v1398_v9  ;;  %2522 = vrot.lane.b32.xlu1 %v10034_v28, %s9994_s13 }
 0x690   : > { %6577 = vrcp.f32 %v1394_v21 }
 0x691   : > { %v6570_v7 = vpop.eup %6569 }
 0x692   : > { %v1424_v15 = vmul.f32 %v6570_v7, %v7858_v41  ;;  %v1410_v1 = vpop.xlane.xlu0 %1409  ;;  %v1390_v61 = vpop.xlane.xlu1 %1389  ;;  %v10036_v41 = vld [vmem:[#allocation20_spill] sm:$0xff] }
 0x693   : > { %6579 = vrcp.f32 %v1410_v1  ;;  %2526 = vrot.lane.b32.xlu1 %v10035_v31, %s9994_s13 }
 0x694   : > { %5241 = vst [vmem:[%s7541_s12 + $0x90] sm:$0xff] %v1424_v15  ;;  %6581 = vrcp.f32 %v1390_v61 }
 0x695   : > { %v6572_v62 = vpop.eup %6571 }
 0x696   : > { %v6574_v18 = vpop.eup %6573  ;;  %v1406_v9 = vpop.xlane.xlu0 %1405  ;;  %v1434_v27 = vmul.f32 %v6572_v62, %v7863_v43  ;;  %v10037_v43 = vld [vmem:[#allocation11_spill] sm:$0xff] }
 0x697   : > { %v1400_v13 = vpop.xlane.xlu1 %1399  ;;  %6583 = vrcp.f32 %v1406_v9  ;;  %2530 = vrot.lane.b32.xlu1 %v10036_v41, %s9994_s13  ;;  %v1420_v21 = vmul.f32 %v6574_v18, %v7865_v22 }
 0x698   : > { %6585 = vrcp.f32 %v1400_v13  ;;  %5246 = vst [vmem:[%s7541_s12 + $0xb8] sm:$0xff] %v1434_v27 }
 0x699   : > { %v6576_v7 = vpop.eup %6575  ;;  %5239 = vst [vmem:[%s7541_s12 + $0x80] sm:$0xff] %v1420_v21 }
 0x69a   : > { %v6578_v1 = vpop.eup %6577  ;;  %v1418_v61 = vpop.xlane.xlu0 %1417  ;;  %v1430_v53 = vmul.f32 %v6576_v7, %v7871_v14 }
 0x69b   : > { %v1396_v31 = vpop.xlane.xlu1 %1395  ;;  %v1426_v62 = vmul.f32 %v6578_v1, %v7873_v11  ;;  %6587 = vrcp.f32 %v1418_v61  ;;  %2704 = vrot.lane.b32.xlu1 %v10037_v43, %s7065_s14 }
 0x69c   : > { %6589 = vrcp.f32 %v1396_v31  ;;  %5244 = vst [vmem:[%s7541_s12 + $0xa8] sm:$0xff] %v1430_v53 }
 0x69d   : > { %v6580_v18 = vpop.eup %6579  ;;  %5242 = vst [vmem:[%s7541_s12 + $0x98] sm:$0xff] %v1426_v62  ;;  %v1469_v61 = vpack.c.bf16 %v1426_v62, %v1424_v15 }
 0x69e   : > { %v6582_v22 = vpop.eup %6581  ;;  %v1414_v13 = vpop.xlane.xlu0 %1413  ;;  %v1442_v41 = vmul.f32 %v6580_v18, %v7881_v39  ;;  %v10038_v18 = vld [vmem:[#allocation23_spill] sm:$0xff] }
 0x69f   : > { %v1408_v9 = vpop.xlane.xlu1 %1407  ;;  %6591 = vrcp.f32 %v1414_v13  ;;  %v1422_v14 = vmul.f32 %v6582_v22, %v7879_v25  ;;  %v10039_v13 = vld [vmem:[#allocation24_spill] sm:$0xff] }
 0x6a0   : > { %6593 = vrcp.f32 %v1408_v9  ;;  %5250 = vst [vmem:[%s7541_s12 + $0xd8] sm:$0xff] %v1442_v41 }
 0x6a1   : > { %v6584_v11 = vpop.eup %6583  ;;  %5240 = vst [vmem:[%s7541_s12 + $0x88] sm:$0xff] %v1422_v14  ;;  %v1468_v7 = vpack.c.bf16 %v1422_v14, %v1420_v21  ;;  %v10040_v14 = vld [vmem:[#allocation27_spill] sm:$0xff] }
 0x6a2   : > { %v6586_v1 = vpop.eup %6585  ;;  %v1438_v43 = vmul.f32 %v6584_v11, %v7888_v29 }
 0x6a3   : > { %v1404_v31 = vpop.xlane.xlu1 %1403  ;;  %5846 = vmatprep.mubr.bf16.mxu1 %v1468_v7  ;;  %v1432_v39 = vmul.f32 %v6586_v1, %v7886_v56 }
 0x6a4   : > { %6595 = vrcp.f32 %v1404_v31  ;;  %5847 = vmatmul.mubr.bf16.vlgmr.msra.gmra.mrb[48].mxu1 %v1469_v61  ;;  %5248 = vst [vmem:[%s7541_s12 + $0xc8] sm:$0xff] %v1438_v43  ;;  %v10041_v31 = vld [vmem:[#allocation25_spill] sm:$0xff] }
 0x6a5   : > { %v6588_v25 = vpop.eup %6587  ;;  %5895 = vmatpush3.bf16.msra.mxu1 %v10038_v18  ;;  %5245 = vst [vmem:[%s7541_s12 + $0xb0] sm:$0xff] %v1432_v39  ;;  %v1471_v7 = vpack.c.bf16 %v1434_v27, %v1432_v39 }
 0x6a6   : > { %v6590_v22 = vpop.eup %6589  ;;  %5896 = vmatprep.subr.bf16.mxu1 %v10039_v13  ;;  %v1450_v15 = vmul.f32 %v6588_v25, %v7895_v3 }
 0x6a7   : > { %v1416_v21 = vpop.xlane.xlu1 %1415  ;;  %v1428_v29 = vmul.f32 %v6590_v22, %v7893_v50 }
 0x6a8   : > { %6597 = vrcp.f32 %v1416_v21  ;;  %5254 = vst [vmem:[%s7541_s12 + $0xf8] sm:$0xff] %v1450_v15 }
 0x6a9   : > { %v6592_v62 = vpop.eup %6591  ;;  %5897 = vmatpush3.bf16.msra.mxu1 %v10039_v13  ;;  %5243 = vst [vmem:[%s7541_s12 + $0xa0] sm:$0xff] %v1428_v29  ;;  %v1470_v56 = vpack.c.bf16 %v1430_v53, %v1428_v29 }
 0x6aa   : > { %v6594_v9 = vpop.eup %6593  ;;  %5898 = vmatprep.subr.bf16.mxu1 %v10040_v14  ;;  %v1446_v1 = vmul.f32 %v6592_v62, %v7903_v30 }
 0x6ab   : > { %v1412_v11 = vpop.xlane.xlu1 %1411  ;;  %5850 = vmatprep.mubr.bf16.mxu1 %v1470_v56  ;;  %v1440_v3 = vmul.f32 %v6594_v9, %v7901_v63  ;;  %v10042_v63 = vld [vmem:[#allocation29_spill] sm:$0xff]  ;;  %v10045_v9 = vpack.c.bf16 %v7847_v42, %v7840_v24  ;;  %v10048_v42 = vpack.c.bf16 %v7949_v4, %v7960_v16  ;;  %v2230_v4 = vsel %vm687_vm0, %v7936_v46, 0 }
 0x6ac   : > { %6599 = vrcp.f32 %v1412_v11  ;;  %5851 = vmatmul.mubr.bf16.gmra.mrb[52].mxu1 %v1471_v7  ;;  %5252 = vst [vmem:[%s7541_s12 + $0xe8] sm:$0xff] %v1446_v1  ;;  %v10047_v7 = vpack.c.bf16 %v7834_v38, %v7828_v58  ;;  %v10049_v58 = vpack.c.bf16 %v7977_v2, %v7970_v34  ;;  %v2191_v38 = vpop.permute.xlu0 %2190 }
 0x6ad   : > { %5899 = vmatpush3.bf16.msra.mxu1 %v10040_v14  ;;  %5249 = vst [vmem:[%s7541_s12 + $0xd0] sm:$0xff] %v1440_v3  ;;  %v1473_v25 = vpack.c.bf16 %v1442_v41, %v1440_v3  ;;  %v10046_v14 = vld [vmem:[#allocation30_spill] sm:$0xff]  ;;  %v2233_v3 = vsel %vm687_vm0, %v2191_v38, 0 }
 0x6ae   : > { %v6596_v50 = vpop.eup %6595  ;;  %5900 = vmatprep.subr.bf16.mxu1 %v10041_v31 }
 0x6af   : > { %v1928_v53 = vpop.xlane.xlu1 %1927  ;;  %v1436_v61 = vmul.f32 %v6596_v50, %v7909_v35  ;;  %v10043_v35 = vld [vmem:[#allocation26_spill] sm:$0xff] }
 0x6b0   : > { %6601 = vrcp.f32 %v1928_v53 }
 0x6b1   : > { %5247 = vst [vmem:[%s7541_s12 + $0xc0] sm:$0xff] %v1436_v61  ;;  %v1472_v27 = vpack.c.bf16 %v1438_v43, %v1436_v61  ;;  %5901 = vmatpush3.bf16.msra.mxu1 %v10041_v31 }
 0x6b2   : > { %v6598_v30 = vpop.eup %6597  ;;  %5902 = vmatprep.subr.bf16.mxu1 %v10042_v63 }
 0x6b3   : > { %5854 = vmatprep.mubr.bf16.mxu1 %v1472_v27  ;;  %v1930_v39 = vpop.xlane.xlu1 %1929  ;;  %v1448_v18 = vmul.f32 %v6598_v30, %v7914_v8  ;;  %v10044_v8 = vld [vmem:[#allocation28_spill] sm:$0xff] }
 0x6b4   : > { %6603 = vrcp.f32 %v1930_v39  ;;  %5855 = vmatmul.mubr.bf16.gmra.mrb[56].mxu1 %v1473_v25 }
 0x6b5   : > { %5253 = vst [vmem:[%s7541_s12 + $0xf0] sm:$0xff] %v1448_v18  ;;  %5903 = vmatpush3.bf16.msra.mxu1 %v10042_v63  ;;  %v1475_v62 = vpack.c.bf16 %v1450_v15, %v1448_v18 }
 0x6b6   : > { %v6600_v22 = vpop.eup %6599  ;;  %5904 = vmatprep.subr.bf16.mxu1 %v10043_v35 }
 0x6b7   : > { %v1932_v43 = vpop.xlane.xlu1 %1931  ;;  %v1444_v13 = vmul.f32 %v6600_v22, %v7919_v12 }
 0x6b8   : > { %6605 = vrcp.f32 %v1932_v43 }
 0x6b9   : > { %5251 = vst [vmem:[%s7541_s12 + $0xe0] sm:$0xff] %v1444_v13  ;;  %v1474_v21 = vpack.c.bf16 %v1446_v1, %v1444_v13  ;;  %5905 = vmatpush3.bf16.msra.mxu1 %v10043_v35  ;;  %v2227_v1 = vsel %vm687_vm0, %v7944_v40, 0 }
 0x6ba   : > { %v6602_v29 = vpop.eup %6601  ;;  %5906 = vmatprep.subr.bf16.mxu1 %v10044_v8 }
 0x6bb   : > { %5858 = vmatprep.mubr.bf16.mxu1 %v1474_v21  ;;  %v1934_v41 = vpop.xlane.xlu1 %1933  ;;  %v1960_v56 = vmul.f32 %v6602_v29, %v7922_v47 }
 0x6bc   : > { %6607 = vrcp.f32 %v1934_v41  ;;  %5859 = vmatmul.mubr.bf16.gmra.mrb[60].mxu1 %v1475_v62 }
 0x6bd   : > { %5271 = vst [vmem:[%s7541_s12 + $0x140] sm:$0xff] %v1960_v56  ;;  %5907 = vmatpush3.bf16.msra.mxu1 %v10044_v8  ;;  %5910 = vmatprep.mubr.bf16.mxu1 %v10045_v9 }
 0x6be   : > { %v6604_v12 = vpop.eup %6603  ;;  %5908 = vmatprep.subr.bf16.mxu1 %v10046_v14 }
 0x6bf   : > { %v1962_v11 = vmul.f32 %v6604_v12, %v7925_v17  ;;  %v2193_v34 = vpop.permute.xlu1 %2192 }
 0x6c0   : > { %v2236_v53 = vsel %vm687_vm0, %v2193_v34, 0 }
 0x6c1   : > { %5272 = vst [vmem:[%s7541_s12 + $0x148] sm:$0xff] %v1962_v11  ;;  %5909 = vmatpush3.bf16.msra.mxu1 %v10046_v14 }
 0x6c2   : > { %v6606_v15 = vpop.eup %6605  ;;  %6270 = vmatprep.subr.msk.bf16.mxu1 %vm687_vm0, %v7944_v40 }
 0x6c3   : > { %v1964_v47 = vmul.f32 %v6606_v15, %v7930_v45  ;;  %v1996_v45 = vpack.c.bf16 %v1962_v11, %v1960_v56 }
 0x6c4   : > { %5911 = vmatmul.mubr.bf16.vlgmr.msra.gmra.mrb[64].mxu1 %v10047_v7 }
 0x6c5   : > { %5273 = vst [vmem:[%s7541_s12 + $0x150] sm:$0xff] %v1964_v47  ;;  %5914 = vmatprep.mubr.bf16.mxu1 %v10048_v42 }
 0x6c6   : > { %v6608_v24 = vpop.eup %6607 }
 0x6c7   : > { %v1966_v17 = vmul.f32 %v6608_v24, %v7933_v55 }
 0x6c9   : > { %5274 = vst [vmem:[%s7541_s12 + $0x158] sm:$0xff] %v1966_v17  ;;  %v1997_v55 = vpack.c.bf16 %v1966_v17, %v1964_v47 }
 0x6ca   : > { %5927 = vmatpush3.bf16.xpose.msra.mxu1 %v2227_v1 }
 0x6cb   : > { %6271 = vmatprep.subr.msk.bf16.mxu1 %vm687_vm0, %v7936_v46 }
 0x6cc   : > { %5915 = vmatmul.mubr.bf16.gmra.mrb[68].mxu1 %v10049_v58 }
 0x6cd   : > { %5918 = vmatprep.mubr.bf16.mxu1 %v1996_v45 }
 0x6d2   : > { %5929 = vmatpush3.bf16.xpose.msra.mxu1 %v2230_v4 }
 0x6d3   : > { %6272 = vmatprep.subr.msk.bf16.mxu1 %vm687_vm0, %v2191_v38  ;;  %v1936_v40 = vpop.xlane.xlu0 %1935 }
 0x6d4   : > { %6609 = vrcp.f32 %v1936_v40  ;;  %5919 = vmatmul.mubr.bf16.gmra.mrb[72].mxu1 %v1997_v55 }
 0x6d7   : > { %v1940_v16 = vpop.xlane.xlu0 %1939 }
 0x6d8   : > { %6611 = vrcp.f32 %v1940_v16 }
 0x6da   : > { %5931 = vmatpush3.bf16.xpose.msra.mxu1 %v2233_v3 }
 0x6db   : > { %6273 = vmatprep.subr.msk.bf16.mxu1 %vm687_vm0, %v2193_v34  ;;  %v1942_v2 = vpop.xlane.xlu0 %1941 }
 0x6dc   : > { %6613 = vrcp.f32 %v1942_v2 }
 0x6de   : > { %v6610_v46 = vpop.eup %6609 }
 0x6df   : > { %v2195_v50 = vpop.permute.xlu0 %2194  ;;  %v1968_v31 = vmul.f32 %v6610_v46, %v7953_v26 }
 0x6e0   : > { %v2239_v18 = vsel %vm687_vm0, %v2195_v50, 0 }
 0x6e1   : > { %5275 = vst [vmem:[%s7541_s12 + $0x160] sm:$0xff] %v1968_v31 }
 0x6e2   : > { %v6612_v61 = vpop.eup %6611  ;;  %5933 = vmatpush3.bf16.xpose.msra.mxu1 %v2236_v53 }
 0x6e3   : > { %6274 = vmatprep.subr.msk.bf16.mxu1 %vm687_vm0, %v2195_v50  ;;  %v2199_v27 = vpop.permute.xlu0 %2198  ;;  %v1972_v30 = vmul.f32 %v6612_v61, %v7956_v20 }
 0x6e4   : > { %v2245_v62 = vsel %vm687_vm0, %v2199_v27, 0 }
 0x6e5   : > { %5277 = vst [vmem:[%s7541_s12 + $0x170] sm:$0xff] %v1972_v30 }
 0x6e6   : > { %v6614_v63 = vpop.eup %6613 }
 0x6e7   : > { %v2171_v39 = vpop.permute.xlu0 %2170  ;;  %v1974_v25 = vmul.f32 %v6614_v63, %v7962_v0 }
 0x6e9   : > { %5278 = vst [vmem:[%s7541_s12 + $0x178] sm:$0xff] %v1974_v25  ;;  %v1999_v12 = vpack.c.bf16 %v1974_v25, %v1972_v30 }
 0x6ea   : > { %5935 = vmatpush3.bf16.xpose.msra.mxu1 %v2239_v18 }
 0x6eb   : > { %v2175_v26 = vpop.permute.xlu0 %2174 }
 0x6ef   : > { %v2179_v22 = vpop.permute.xlu0 %2178  ;;  %v1938_v35 = vpop.xlane.xlu1 %1937 }
 0x6f0   : > { %6615 = vrcp.f32 %v1938_v35 }
 0x6f3   : > { %v2183_v43 = vpop.permute.xlu0 %2182  ;;  %v2197_v13 = vpop.permute.xlu1 %2196 }
 0x6f4   : > { %6275 = vmatprep.subr.msk.bf16.mxu1 %vm687_vm0, %v2197_v13  ;;  %v2242_v20 = vsel %vm687_vm0, %v2197_v13, 0 }
 0x6f5   : > { %5937 = vmatpush3.bf16.xpose.msra.mxu1 %v2242_v20 }
 0x6f6   : > { %6276 = vmatprep.subr.msk.bf16.mxu1 %vm687_vm0, %v2199_v27 }
 0x6f7   : > { %v2517_v21 = vpop.permute.xlu0 %2516  ;;  %v2201_v0 = vpop.permute.xlu1 %2200 }
 0x6f8   : > { %5958 = vmatprep.subr.bf16.mxu0 %v2517_v21  ;;  %v2248_v11 = vsel %vm687_vm0, %v2201_v0, 0 }
 0x6f9   : > { %5959 = vmatpush3.bf16.msra.mxu0 %v2517_v21 }
 0x6fa   : > { %v6616_v29 = vpop.eup %6615 }
 0x6fb   : > { %v2173_v8 = vpop.permute.xlu1 %2172  ;;  %v1970_v41 = vmul.f32 %v6616_v29, %v7983_v33  ;;  %v2521_v33 = vpop.permute.xlu0 %2520 }
 0x6fd   : > { %5939 = vmatpush3.bf16.xpose.msra.mxu1 %v2245_v62  ;;  %5276 = vst [vmem:[%s7541_s12 + $0x168] sm:$0xff] %v1970_v41  ;;  %v1998_v56 = vpack.c.bf16 %v1970_v41, %v1968_v31 }
 0x6fe   : > { %6277 = vmatprep.subr.msk.bf16.mxu1 %vm687_vm0, %v2201_v0 }
 0x6ff   : > { %5922 = vmatprep.mubr.bf16.mxu1 %v1998_v56  ;;  %v2177_v9 = vpop.permute.xlu1 %2176  ;;  %v2525_v24 = vpop.permute.xlu0 %2524 }
 0x700   : > { %5923 = vmatmul.mubr.bf16.gmra.mrb[76].mxu1 %v1999_v12 }
 0x701   : > { %5942 = vmatprep.mubr.msk.bf16.mxu1 %vm687_vm0, %v2171_v39 }
 0x703   : > { %v2181_v14 = vpop.permute.xlu1 %2180  ;;  %v2529_v17 = vpop.permute.xlu0 %2528 }
 0x705   : > { %5941 = vmatpush3.bf16.xpose.msra.mxu1 %v2248_v11 }
 0x707   : > { %v2185_v15 = vpop.permute.xlu1 %2184  ;;  %v8133_v45 = vpop.permute.xlu0 %2702 }
 0x70b   : > { %v2519_v47 = vpop.permute.xlu1 %2518 }
 0x70c   : > { %5943 = vmatmul.mubr.msk.bf16.vlgmr.msra.gmra.mrb[80].mxu1 %vm687_vm0, %v2173_v8  ;;  %5960 = vmatprep.subr.bf16.mxu0 %v2519_v47 }
 0x70d   : > { %5946 = vmatprep.mubr.msk.bf16.mxu1 %vm687_vm0, %v2175_v26  ;;  %5961 = vmatpush3.bf16.msra.mxu0 %v2519_v47 }
 0x70e   : > { %5962 = vmatprep.subr.bf16.mxu0 %v2521_v33 }
 0x70f   : > { %v2523_v7 = vpop.permute.xlu1 %2522 }
 0x711   : > { %5963 = vmatpush3.bf16.msra.mxu0 %v2521_v33 }
 0x712   : > { %5964 = vmatprep.subr.bf16.mxu0 %v2523_v7 }
 0x713   : > { %v2527_v42 = vpop.permute.xlu1 %2526 }
 0x714   : > { %5947 = vmatmul.mubr.msk.bf16.gmra.mrb[84].mxu1 %vm687_vm0, %v2177_v9 }
 0x715   : > { %5950 = vmatprep.mubr.msk.bf16.mxu1 %vm687_vm0, %v2179_v22  ;;  %5965 = vmatpush3.bf16.msra.mxu0 %v2523_v7 }
 0x716   : > { %5966 = vmatprep.subr.bf16.mxu0 %v2525_v24 }
 0x717   : > { %v2531_v1 = vpop.permute.xlu1 %2530 }
 0x719   : > { %5967 = vmatpush3.bf16.msra.mxu0 %v2525_v24 }
 0x71a   : > { %5968 = vmatprep.subr.bf16.mxu0 %v2527_v42 }
 0x71c   : > { %5951 = vmatmul.mubr.msk.bf16.gmra.mrb[88].mxu1 %vm687_vm0, %v2181_v14 }
 0x71d   : > { %5954 = vmatprep.mubr.msk.bf16.mxu1 %vm687_vm0, %v2183_v43  ;;  %5969 = vmatpush3.bf16.msra.mxu0 %v2527_v42 }
 0x71e   : > { %5970 = vmatprep.subr.bf16.mxu0 %v2529_v17 }
 0x721   : > { %5971 = vmatpush3.bf16.msra.mxu0 %v2529_v17 }
 0x722   : > { %5972 = vmatprep.subr.bf16.mxu0 %v2531_v1 }
 0x724   : > { %5955 = vmatmul.mubr.msk.bf16.gmra.mrb[92].mxu1 %vm687_vm0, %v2185_v15 }
 0x725   : > { %5973 = vmatpush3.bf16.msra.mxu0 %v2531_v1 }
 0x726   : > { %6278 = vmatprep.subr.msk.bf16.mxu0 %vm687_vm0, %v8133_v45 }
 0x777   : > { %v8137_v58 = vpop.f32.mrb[48].mxu1 }
 0x778   : > { %10050 = vst [vmem:[#allocation13_spill] sm:$0xff] %v8137_v58  ;;  %v8139_v38 = vpop.f32.mrb[49].mxu1 }
 0x779   : > { %10051 = vst [vmem:[#allocation14_spill] sm:$0xff] %v8139_v38  ;;  %v8141_v4 = vpop.f32.mrb[50].mxu1 }
 0x77a   : > { %10052 = vst [vmem:[#allocation16_spill] sm:$0xff] %v8141_v4  ;;  %v8145_v40 = vpop.f32.mrb[51].mxu1 }
 0x77b   : > { %10053 = vst [vmem:[#allocation19_spill] sm:$0xff] %v8145_v40 }
 0x77f   : > { %v8149_v3 = vpop.f32.mrb[52].mxu1 }
 0x780   : > { %10054 = vst [vmem:[#allocation22_spill] sm:$0xff] %v8149_v3  ;;  %v8151_v34 = vpop.f32.mrb[53].mxu1 }
 0x781   : > { %10055 = vst [vmem:[#allocation12_spill] sm:$0xff] %v8151_v34  ;;  %v8153_v2 = vpop.f32.mrb[54].mxu1 }
 0x782   : > { %10056 = vst [vmem:[#allocation15_spill] sm:$0xff] %v8153_v2  ;;  %v8157_v50 = vpop.f32.mrb[55].mxu1 }
 0x783   : > { %10057 = vst [vmem:[#allocation23_spill] sm:$0xff] %v8157_v50 }
 0x787   : > { %v8161_v53 = vpop.f32.mrb[56].mxu1 }
 0x788   : > { %10058 = vst [vmem:[#allocation24_spill] sm:$0xff] %v8161_v53  ;;  %v8163_v61 = vpop.f32.mrb[57].mxu1 }
 0x789   : > { %10059 = vst [vmem:[#allocation27_spill] sm:$0xff] %v8163_v61  ;;  %v8165_v27 = vpop.f32.mrb[58].mxu1 }
 0x78a   : > { %10060 = vst [vmem:[#allocation25_spill] sm:$0xff] %v8165_v27  ;;  %v8169_v63 = vpop.f32.mrb[59].mxu1 }
 0x78b   : > { %10061 = vst [vmem:[#allocation29_spill] sm:$0xff] %v8169_v63 }
 0x78f   : > { %v8173_v25 = vpop.f32.mrb[60].mxu1 }
 0x790   : > { %10062 = vst [vmem:[#allocation26_spill] sm:$0xff] %v8173_v25  ;;  %v8175_v18 = vpop.f32.mrb[61].mxu1 }
 0x791   : > { %10063 = vst [vmem:[#allocation28_spill] sm:$0xff] %v8175_v18  ;;  %v8177_v26 = vpop.f32.mrb[62].mxu1 }
 0x792   : > { %10064 = vst [vmem:[#allocation30_spill] sm:$0xff] %v8177_v26  ;;  %v8181_v35 = vpop.f32.mrb[63].mxu1  ;;  %v8270_v26 = vpop.permute.xlu1 %2704 }
 0x793   : > { %10065 = vst [vmem:[#allocation31_spill] sm:$0xff] %v8181_v35 }
 0x797   : > { %v8185_v13 = vpop.f32.mrb[64].mxu1 }
 0x798   : > { %10066 = vst [vmem:[#allocation32_spill] sm:$0xff] %v8185_v13  ;;  %v8187_v20 = vpop.f32.mrb[65].mxu1 }
 0x799   : > { %v8189_v21 = vpop.f32.mrb[66].mxu1 }
 0x79a   : > { %10067 = vst [vmem:[#allocation33_spill] sm:$0xff] %v8189_v21  ;;  %v8193_v29 = vpop.f32.mrb[67].mxu1 }
 0x79f   : > { %v8197_v41 = vpop.f32.mrb[68].mxu1 }
 0x7a0   : > { %10068 = vst [vmem:[#allocation34_spill] sm:$0xff] %v8197_v41  ;;  %v8199_v62 = vpop.f32.mrb[69].mxu1 }
 0x7a1   : > { %10069 = vst [vmem:[#allocation35_spill] sm:$0xff] %v8199_v62  ;;  %v8201_v56 = vpop.f32.mrb[70].mxu1 }
 0x7a2   : > { %10070 = vst [vmem:[#allocation36_spill] sm:$0xff] %v8201_v56  ;;  %v8205_v9 = vpop.f32.mrb[71].mxu1 }
 0x7a3   : > { %10071 = vst [vmem:[#allocation37_spill] sm:$0xff] %v8205_v9 }
 0x7a7   : > { %v8209_v11 = vpop.f32.mrb[72].mxu1 }
 0x7a8   : > { %10072 = vst [vmem:[#allocation38_spill] sm:$0xff] %v8209_v11  ;;  %v8211_v15 = vpop.f32.mrb[73].mxu1 }
 0x7a9   : > { %10073 = vst [vmem:[#allocation39_spill] sm:$0xff] %v8211_v15  ;;  %v8213_v47 = vpop.f32.mrb[74].mxu1 }
 0x7aa   : > { %10074 = vst [vmem:[#allocation40_spill] sm:$0xff] %v8213_v47  ;;  %v8217_v7 = vpop.f32.mrb[75].mxu1 }
 0x7ab   : > { %10075 = vst [vmem:[#allocation41_spill] sm:$0xff] %v8217_v7 }
 0x7d3   : > { %v8221_v42 = vpop.f32.mrb[76].mxu1 }
 0x7d4   : > { %10076 = vst [vmem:[#allocation42_spill] sm:$0xff] %v8221_v42  ;;  %v8223_v17 = vpop.f32.mrb[77].mxu1 }
 0x7d5   : > { %10077 = vst [vmem:[#allocation43_spill] sm:$0xff] %v8223_v17  ;;  %v8225_v1 = vpop.f32.mrb[78].mxu1 }
 0x7d6   : > { %10078 = vst [vmem:[#allocation44_spill] sm:$0xff] %v8225_v1  ;;  %v8229_v43 = vpop.f32.mrb[79].mxu1 }
 0x7d7   : > { %10079 = vst [vmem:[#allocation45_spill] sm:$0xff] %v8229_v43 }
 0x7df   : > { %v5944_v33 = vpop.f32.mrb[80].mxu1 }
 0x7e0   : > { %2351 = vmax.xlane.f32.xlu0 %v5944_v33  ;;  %v2284_v39 = vpop.f32.mrb[81].mxu1 }
 0x7e1   : > { %v5945_v46 = vpop.f32.mrb[82].mxu1 }
 0x7e2   : > { %v2287_v12 = vpop.f32.mrb[83].mxu1 }
 0x7e3   : > { %2349 = vmax.xlane.f32.xlu1 %v2287_v12 }
 0x7e4   : > { %2347 = vmax.xlane.f32.xlu0 %v2284_v39 }
 0x7e7   : > { %v5948_v24 = vpop.f32.mrb[84].mxu1 }
 0x7e8   : > { %2353 = vmax.xlane.f32.xlu0 %v5945_v46  ;;  %v8233_v14 = vpop.f32.mrb[85].mxu1 }
 0x7e9   : > { %v8235_v31 = vpop.f32.mrb[86].mxu1 }
 0x7ea   : > { %2361 = vmax.xlane.f32.xlu1 %v8235_v31  ;;  %v8238_v22 = vpop.f32.mrb[87].mxu1 }
 0x7ec   : > { %2359 = vmax.xlane.f32.xlu0 %v5948_v24 }
 0x7ee   : > { %2357 = vmax.xlane.f32.xlu1 %v8238_v22 }
 0x7ef   : > { %v8241_v30 = vpop.f32.mrb[88].mxu1 }
 0x7f0   : > { %2355 = vmax.xlane.f32.xlu0 %v8233_v14  ;;  %v8244_v55 = vpop.f32.mrb[89].mxu1 }
 0x7f1   : > { %v8246_v0 = vpop.f32.mrb[90].mxu1 }
 0x7f2   : > { %2369 = vmax.xlane.f32.xlu1 %v8246_v0  ;;  %v8249_v16 = vpop.f32.mrb[91].mxu1 }
 0x7f4   : > { %2367 = vmax.xlane.f32.xlu0 %v8241_v30 }
 0x7f6   : > { %2365 = vmax.xlane.f32.xlu1 %v8249_v16 }
 0x7f7   : > { %v8253_v8 = vpop.f32.mrb[92].mxu1 }
 0x7f8   : > { %2363 = vmax.xlane.f32.xlu0 %v8244_v55  ;;  %v8256_v42 = vpop.f32.mrb[93].mxu1 }
 0x7f9   : > { %v8258_v1 = vpop.f32.mrb[94].mxu1 }
 0x7fa   : > { %v8260_v25 = vpop.f32.mrb[95].mxu1 }
 0x7fc   : > { %2375 = vmax.xlane.f32.xlu0 %v8253_v8 }
 0x800   : > { %2371 = vmax.xlane.f32.xlu0 %v8256_v42 }
 0x807   : > { %2708 = vrot.lane.b32.xlu1 %v7307_v23, %s7065_s14 }
 0x816   : > { %2706 = vrot.lane.b32.xlu0 %v7290_v10, %s7065_s14 }
 0x82b   : > { %2377 = vmax.xlane.f32.xlu1 %v8258_v1 }
 0x82f   : > { %2373 = vmax.xlane.f32.xlu1 %v8260_v25 }
 0x86d   : > { %v2352_v18 = vpop.xlane.xlu0 %2351 }
 0x86e   : > { %v2381_v35 = vsub.f32 %v5944_v33, %v2352_v18 }
 0x870   : > { %v2399_v17 = vmul.f32 1.442695, %v2381_v35  ;;  %v2350_v43 = vpop.xlane.xlu1 %2349 }
 0x871   : > { %v2380_v11 = vsub.f32 %v2287_v12, %v2350_v43  ;;  %v2348_v47 = vpop.xlane.xlu0 %2347 }
 0x872   : > { %6617 = vpow2.f32 %v2399_v17  ;;  %v2379_v53 = vsub.f32 %v2284_v39, %v2348_v47 }
 0x873   : > { %v2397_v27 = vmul.f32 1.442695, %v2380_v11 }
 0x874   : > { %v2395_v15 = vmul.f32 1.442695, %v2379_v53 }
 0x875   : > { %6619 = vpow2.f32 %v2397_v27  ;;  %v2354_v7 = vpop.xlane.xlu0 %2353 }
 0x876   : > { %6621 = vpow2.f32 %v2395_v15  ;;  %v2382_v61 = vsub.f32 %v5945_v46, %v2354_v7 }
 0x878   : > { %v2401_v63 = vmul.f32 1.442695, %v2382_v61  ;;  %v2362_v61 = vpop.xlane.xlu1 %2361 }
 0x879   : > { %v2360_v53 = vpop.xlane.xlu0 %2359  ;;  %v2386_v7 = vsub.f32 %v8235_v31, %v2362_v61 }
 0x87a   : > { %6623 = vpow2.f32 %v2401_v63  ;;  %v2385_v63 = vsub.f32 %v5948_v24, %v2360_v53 }
 0x87b   : > { %v2409_v62 = vmul.f32 1.442695, %v2386_v7 }
 0x87c   : > { %v8272_v3 = vpop.eup %6617  ;;  %v2358_v35 = vpop.xlane.xlu1 %2357  ;;  %v2407_v12 = vmul.f32 1.442695, %v2385_v63 }
 0x87d   : > { %2431 = vadd.xlane.f32.xlu1 %v8272_v3  ;;  %v2356_v46 = vpop.xlane.xlu0 %2355  ;;  %v2384_v15 = vsub.f32 %v8238_v22, %v2358_v35 }
 0x87e   : > { %v2383_v11 = vsub.f32 %v8233_v14, %v2356_v46  ;;  %6625 = vpow2.f32 %v2407_v12 }
 0x87f   : > { %v8275_v2 = vpop.eup %6619  ;;  %v2405_v41 = vmul.f32 1.442695, %v2384_v15 }
 0x880   : > { %v8277_v18 = vpop.eup %6621  ;;  %2429 = vadd.xlane.f32.xlu0 %v8275_v2  ;;  %v2370_v47 = vpop.xlane.xlu1 %2369  ;;  %v2403_v17 = vmul.f32 1.442695, %v2383_v11 }
 0x881   : > { %2427 = vadd.xlane.f32.xlu1 %v8277_v18  ;;  %v2368_v27 = vpop.xlane.xlu0 %2367  ;;  %v2390_v31 = vsub.f32 %v8246_v0, %v2370_v47 }
 0x882   : > { %v2389_v56 = vsub.f32 %v8241_v30, %v2368_v27  ;;  %6627 = vpow2.f32 %v2403_v17 }
 0x883   : > { %6629 = vpow2.f32 %v2405_v41  ;;  %v2417_v41 = vmul.f32 1.442695, %v2390_v31  ;;  %v10085_v31 = vld [vmem:[#allocation11_spill] sm:$0xff] }
 0x884   : > { %v8281_v39 = vpop.eup %6623  ;;  %v2366_v9 = vpop.xlane.xlu1 %2365  ;;  %v2415_v53 = vmul.f32 1.442695, %v2389_v56  ;;  %6631 = vpow2.f32 %v2409_v62 }
 0x885   : > { %2433 = vadd.xlane.f32.xlu1 %v8281_v39  ;;  %v2364_v43 = vpop.xlane.xlu0 %2363 }
 0x886   : > { %v2387_v14 = vsub.f32 %v8244_v55, %v2364_v43  ;;  %6633 = vpow2.f32 %v2415_v53  ;;  %v2388_v55 = vsub.f32 %v8249_v16, %v2366_v9  ;;  %v10080_v53 = vld [vmem:[#allocation18_spill] sm:$0xff] }
 0x888   : > { %v2411_v61 = vmul.f32 1.442695, %v2387_v14  ;;  %v8296_v35 = vpop.eup %6625  ;;  %v8298_v30 = vpop.permute.xlu1 %2708  ;;  %v2413_v27 = vmul.f32 1.442695, %v2388_v55  ;;  %v10081_v14 = vld [vmem:[#allocation17_spill] sm:$0xff] }
 0x889   : > { %v2376_v33 = vpop.xlane.xlu0 %2375 }
 0x88a   : > { %v2393_v24 = vsub.f32 %v8253_v8, %v2376_v33 }
 0x88c   : > { %v2423_v22 = vmul.f32 1.442695, %v2393_v24  ;;  %v8302_v62 = vpop.eup %6627 }
 0x88d   : > { %v2372_v46 = vpop.xlane.xlu0 %2371 }
 0x88e   : > { %v2391_v63 = vsub.f32 %v8256_v42, %v2372_v46  ;;  %6635 = vpow2.f32 %v2423_v22  ;;  %v8304_v42 = vpop.eup %6629  ;;  %v10082_v46 = vld [vmem:[#allocation21_spill] sm:$0xff]  ;;  %v10083_v22 = vld [vmem:[#allocation20_spill] sm:$0xff] }
 0x88f   : > { %6637 = vpow2.f32 %v2411_v61  ;;  %v8309_v12 = vpop.eup %6631 }
 0x890   : > { %v2419_v8 = vmul.f32 1.442695, %v2391_v63  ;;  %v8311_v16 = vpop.eup %6633  ;;  %v10084_v63 = vld [vmem:[#allocation10_spill] sm:$0xff] }
 0x891   : > { %v2707_v61 = vpop.permute.xlu0 %2706 }
 0x892   : > { %6639 = vpow2.f32 %v2419_v8 }
 0x893   : > { %6641 = vpow2.f32 %v2417_v41 }
 0x896   : > { %2712 = vrot.lane.b32.xlu1 %v7343_v49, %s7065_s14  ;;  %2710 = vrot.lane.b32.xlu0 %v7325_v36, %s7065_s14 }
 0x898   : > { %v8316_v15 = vpop.eup %6635 }
 0x899   : > { %v8318_v47 = vpop.eup %6637 }
 0x89c   : > { %v8322_v33 = vpop.eup %6639 }
 0x89d   : > { %v8324_v7 = vpop.eup %6641 }
 0x8b5   : > { %2439 = vadd.xlane.f32.xlu0 %v8296_v35 }
 0x8b8   : > { %v2378_v56 = vpop.xlane.xlu1 %2377 }
 0x8b9   : > { %v2394_v0 = vsub.f32 %v8258_v1, %v2378_v56  ;;  %2435 = vadd.xlane.f32.xlu0 %v8302_v62 }
 0x8ba   : > { %2437 = vadd.xlane.f32.xlu1 %v8304_v42 }
 0x8bb   : > { %v2425_v43 = vmul.f32 1.442695, %v2394_v0 }
 0x8bc   : > { %v2374_v11 = vpop.xlane.xlu1 %2373 }
 0x8bd   : > { %6643 = vpow2.f32 %v2425_v43  ;;  %v2392_v9 = vsub.f32 %v8260_v25, %v2374_v11  ;;  %2441 = vadd.xlane.f32.xlu0 %v8309_v12 }
 0x8be   : > { %2447 = vadd.xlane.f32.xlu1 %v8311_v16  ;;  %6645 = vpow2.f32 %v2413_v27 }
 0x8bf   : > { %v2421_v1 = vmul.f32 1.442695, %v2392_v9 }
 0x8c1   : > { %2455 = vadd.xlane.f32.xlu0 %v8316_v15  ;;  %6647 = vpow2.f32 %v2421_v1 }
 0x8c2   : > { %2443 = vadd.xlane.f32.xlu1 %v8318_v47 }
 0x8c5   : > { %2451 = vadd.xlane.f32.xlu0 %v8322_v33 }
 0x8c6   : > { %2449 = vadd.xlane.f32.xlu1 %v8324_v7 }
 0x8c7   : > { %v8328_v25 = vpop.eup %6643 }
 0x8c8   : > { %v8330_v17 = vpop.eup %6645 }
 0x8c9   : > { %2457 = vadd.xlane.f32.xlu0 %v8328_v25 }
 0x8ca   : > { %2445 = vadd.xlane.f32.xlu1 %v8330_v17 }
 0x8cb   : > { %v8334_v24 = vpop.eup %6647 }
 0x8ce   : > { %2453 = vadd.xlane.f32.xlu1 %v8334_v24 }
 0x8df   : > { %2714 = vrot.lane.b32.xlu0 %v7357_v60, %s7065_s14  ;;  %2716 = vrot.lane.b32.xlu1 %v7366_v5, %s7065_s14 }
 0x8e3   : > { %2686 = vrot.lane.b32.xlu0 %v7262_v52, %s7065_s14  ;;  %2688 = vrot.lane.b32.xlu1 %v7276_v59, %s7065_s14 }
 0x8e7   : > { %2690 = vrot.lane.b32.xlu0 %v7286_v6, %s7065_s14  ;;  %2692 = vrot.lane.b32.xlu1 %v10026_v51, %s7065_s14 }
 0x8eb   : > { %2694 = vrot.lane.b32.xlu0 %v7321_v32, %s7065_s14  ;;  %2696 = vrot.lane.b32.xlu1 %v10028_v54, %s7065_s14 }
 0x8ef   : > { %2698 = vrot.lane.b32.xlu0 %v7355_v57, %s7065_s14  ;;  %2700 = vrot.lane.b32.xlu1 %v10030_v37, %s7065_s14 }
 0x8f3   : > { %3032 = vrot.lane.b32.xlu0 %v10025_v48, %s7065_s14  ;;  %3034 = vrot.lane.b32.xlu1 %v10032_v44, %s7065_s14 }
 0x8f7   : > { %3036 = vrot.lane.b32.xlu0 %v10027_v19, %s7065_s14  ;;  %3038 = vrot.lane.b32.xlu1 %v10034_v28, %s7065_s14 }
 0x8fb   : > { %3040 = vrot.lane.b32.xlu0 %v10080_v53, %s7065_s14  ;;  %3042 = vrot.lane.b32.xlu1 %v10081_v14, %s7065_s14 }
 0x8ff   : > { %3044 = vrot.lane.b32.xlu0 %v10082_v46, %s7065_s14  ;;  %3046 = vrot.lane.b32.xlu1 %v10083_v22, %s7065_s14 }
 0x903   : > { %3218 = vrot.lane.b32.xlu0 %v10084_v63, %s7066_s15  ;;  %3220 = vrot.lane.b32.xlu1 %v10085_v31, %s7066_s15 }
 0x90a   : > { %v2432_v8 = vpop.xlane.xlu1 %2431 }
 0x90b   : > { %6649 = vrcp.f32 %v2432_v8 }
 0x90d   : > { %v2430_v41 = vpop.xlane.xlu0 %2429 }
 0x90e   : > { %6651 = vrcp.f32 %v2430_v41  ;;  %v2428_v55 = vpop.xlane.xlu1 %2427 }
 0x90f   : > { %6653 = vrcp.f32 %v2428_v55 }
 0x912   : > { %v2434_v56 = vpop.xlane.xlu1 %2433 }
 0x913   : > { %6655 = vrcp.f32 %v2434_v56 }
 0x915   : > { %v6650_v0 = vpop.eup %6649 }
 0x916   : > { %v2464_v27 = vmul.f32 %v6650_v0, %v8272_v3  ;;  %v2743_v3 = vsel %vm687_vm0, %v8133_v45, 0  ;;  %v2711_v45 = vpop.permute.xlu0 %2710 }
 0x917   : > { %v2755_v56 = vsel %vm687_vm0, %v2711_v45, 0 }
 0x918   : > { %v6652_v43 = vpop.eup %6651  ;;  %5289 = vst [vmem:[%s7541_s12 + $0x190] sm:$0xff] %v2464_v27 }
 0x919   : > { %v6654_v11 = vpop.eup %6653  ;;  %v2462_v9 = vmul.f32 %v6652_v43, %v8275_v2  ;;  %v2746_v2 = vsel %vm687_vm0, %v8270_v26, 0 }
 0x91a   : > { %v2460_v1 = vmul.f32 %v6654_v11, %v8277_v18  ;;  %v2749_v18 = vsel %vm687_vm0, %v2707_v61, 0 }
 0x91b   : > { %5288 = vst [vmem:[%s7541_s12 + $0x188] sm:$0xff] %v2462_v9 }
 0x91c   : > { %5287 = vst [vmem:[%s7541_s12 + $0x180] sm:$0xff] %v2460_v1  ;;  %v2508_v8 = vpack.c.bf16 %v2462_v9, %v2460_v1 }
 0x91d   : > { %v6656_v34 = vpop.eup %6655 }
 0x91e   : > { %v2466_v41 = vmul.f32 %v6656_v34, %v8281_v39  ;;  %5974 = vmatprep.mubr.bf16.mxu0 %v2508_v8  ;;  %v2752_v34 = vsel %vm687_vm0, %v8298_v30, 0 }
 0x920   : > { %5290 = vst [vmem:[%s7541_s12 + $0x198] sm:$0xff] %v2466_v41  ;;  %v2509_v55 = vpack.c.bf16 %v2466_v41, %v2464_v27 }
 0x922   : > { %5975 = vmatmul.mubr.bf16.vlgmr.msra.gmra.mrb[64].mxu0 %v2509_v55 }
 0x923   : > { %5991 = vmatpush3.bf16.xpose.msra.mxu0 %v2743_v3 }
 0x924   : > { %6279 = vmatprep.subr.msk.bf16.mxu0 %vm687_vm0, %v8270_v26  ;;  %v2713_v26 = vpop.permute.xlu1 %2712 }
 0x92b   : > { %5993 = vmatpush3.bf16.xpose.msra.mxu0 %v2746_v2 }
 0x92c   : > { %6280 = vmatprep.subr.msk.bf16.mxu0 %vm687_vm0, %v2707_v61 }
 0x933   : > { %5995 = vmatpush3.bf16.xpose.msra.mxu0 %v2749_v18 }
 0x934   : > { %6281 = vmatprep.subr.msk.bf16.mxu0 %vm687_vm0, %v8298_v30  ;;  %v2758_v30 = vsel %vm687_vm0, %v2713_v26, 0 }
 0x93b   : > { %5997 = vmatpush3.bf16.xpose.msra.mxu0 %v2752_v34 }
 0x93c   : > { %6282 = vmatprep.subr.msk.bf16.mxu0 %vm687_vm0, %v2711_v45 }
 0x942   : > { %v2440_v39 = vpop.xlane.xlu0 %2439 }
 0x943   : > { %6657 = vrcp.f32 %v2440_v39  ;;  %5999 = vmatpush3.bf16.xpose.msra.mxu0 %v2755_v56 }
 0x944   : > { %6283 = vmatprep.subr.msk.bf16.mxu0 %vm687_vm0, %v2713_v26 }
 0x946   : > { %v2436_v61 = vpop.xlane.xlu0 %2435 }
 0x947   : > { %6659 = vrcp.f32 %v2436_v61  ;;  %v2438_v0 = vpop.xlane.xlu1 %2437 }
 0x948   : > { %6661 = vrcp.f32 %v2438_v0 }
 0x94a   : > { %v2442_v27 = vpop.xlane.xlu0 %2441 }
 0x94b   : > { %6663 = vrcp.f32 %v2442_v27  ;;  %6001 = vmatpush3.bf16.xpose.msra.mxu0 %v2758_v30  ;;  %v2448_v43 = vpop.xlane.xlu1 %2447 }
 0x94c   : > { %6665 = vrcp.f32 %v2448_v43 }
 0x94d   : > { %v6658_v11 = vpop.eup %6657 }
 0x94e   : > { %v2456_v9 = vpop.xlane.xlu0 %2455  ;;  %v2472_v1 = vmul.f32 %v6658_v11, %v8296_v35 }
 0x94f   : > { %6667 = vrcp.f32 %v2456_v9  ;;  %v2444_v8 = vpop.xlane.xlu1 %2443 }
 0x950   : > { %6669 = vrcp.f32 %v2444_v8  ;;  %5293 = vst [vmem:[%s7541_s12 + $0x1b0] sm:$0xff] %v2472_v1 }
 0x951   : > { %v6660_v41 = vpop.eup %6659 }
 0x952   : > { %v6662_v55 = vpop.eup %6661  ;;  %v2452_v3 = vpop.xlane.xlu0 %2451  ;;  %v2468_v2 = vmul.f32 %v6660_v41, %v8302_v62 }
 0x953   : > { %6671 = vrcp.f32 %v2452_v3  ;;  %v2450_v18 = vpop.xlane.xlu1 %2449  ;;  %v2470_v34 = vmul.f32 %v6662_v55, %v8304_v42 }
 0x954   : > { %6673 = vrcp.f32 %v2450_v18  ;;  %5291 = vst [vmem:[%s7541_s12 + $0x1a0] sm:$0xff] %v2468_v2 }
 0x955   : > { %v6664_v45 = vpop.eup %6663  ;;  %5292 = vst [vmem:[%s7541_s12 + $0x1a8] sm:$0xff] %v2470_v34  ;;  %v2510_v35 = vpack.c.bf16 %v2470_v34, %v2468_v2 }
 0x956   : > { %v6666_v39 = vpop.eup %6665  ;;  %v2458_v56 = vpop.xlane.xlu0 %2457  ;;  %v2474_v26 = vmul.f32 %v6664_v45, %v8309_v12 }
 0x957   : > { %6675 = vrcp.f32 %v2458_v56  ;;  %5978 = vmatprep.mubr.bf16.mxu0 %v2510_v35  ;;  %v2446_v61 = vpop.xlane.xlu1 %2445  ;;  %v2480_v62 = vmul.f32 %v6666_v39, %v8311_v16 }
 0x958   : > { %6677 = vrcp.f32 %v2446_v61  ;;  %5294 = vst [vmem:[%s7541_s12 + $0x1b8] sm:$0xff] %v2474_v26  ;;  %v2511_v42 = vpack.c.bf16 %v2474_v26, %v2472_v1 }
 0x959   : > { %v6668_v0 = vpop.eup %6667  ;;  %5297 = vst [vmem:[%s7541_s12 + $0x1d0] sm:$0xff] %v2480_v62 }
 0x95a   : > { %v6670_v27 = vpop.eup %6669  ;;  %v2715_v30 = vpop.permute.xlu0 %2714  ;;  %5979 = vmatmul.mubr.bf16.gmra.mrb[68].mxu0 %v2511_v42  ;;  %v2488_v43 = vmul.f32 %v6668_v0, %v8316_v15 }
 0x95b   : > { %6284 = vmatprep.subr.msk.bf16.mxu0 %vm687_vm0, %v2715_v30  ;;  %v2454_v12 = vpop.xlane.xlu1 %2453  ;;  %v2761_v11 = vsel %vm687_vm0, %v2715_v30, 0  ;;  %v2476_v16 = vmul.f32 %v6670_v27, %v8318_v47 }
 0x95c   : > { %6679 = vrcp.f32 %v2454_v12  ;;  %6003 = vmatpush3.bf16.xpose.msra.mxu0 %v2761_v11  ;;  %5301 = vst [vmem:[%s7541_s12 + $0x1f0] sm:$0xff] %v2488_v43 }
 0x95d   : > { %v6672_v9 = vpop.eup %6671  ;;  %5295 = vst [vmem:[%s7541_s12 + $0x1c0] sm:$0xff] %v2476_v16 }
 0x95e   : > { %v6674_v1 = vpop.eup %6673  ;;  %v2687_v8 = vpop.permute.xlu0 %2686  ;;  %v2484_v15 = vmul.f32 %v6672_v9, %v8322_v33 }
 0x95f   : > { %v2717_v41 = vpop.permute.xlu1 %2716  ;;  %v2482_v55 = vmul.f32 %v6674_v1, %v8324_v7 }
 0x960   : > { %6285 = vmatprep.subr.msk.bf16.mxu0 %vm687_vm0, %v2717_v41  ;;  %5299 = vst [vmem:[%s7541_s12 + $0x1e0] sm:$0xff] %v2484_v15  ;;  %v2764_v45 = vsel %vm687_vm0, %v2717_v41, 0 }
 0x961   : > { %v6676_v3 = vpop.eup %6675  ;;  %5298 = vst [vmem:[%s7541_s12 + $0x1d8] sm:$0xff] %v2482_v55  ;;  %v2513_v56 = vpack.c.bf16 %v2482_v55, %v2480_v62 }
 0x962   : > { %v6678_v47 = vpop.eup %6677  ;;  %v2691_v2 = vpop.permute.xlu0 %2690  ;;  %v2490_v18 = vmul.f32 %v6676_v3, %v8328_v25 }
 0x963   : > { %v2689_v34 = vpop.permute.xlu1 %2688  ;;  %v2478_v35 = vmul.f32 %v6678_v47, %v8330_v17 }
 0x964   : > { %6005 = vmatpush3.bf16.xpose.msra.mxu0 %v2764_v45  ;;  %5302 = vst [vmem:[%s7541_s12 + $0x1f8] sm:$0xff] %v2490_v18  ;;  %v2515_v30 = vpack.c.bf16 %v2490_v18, %v2488_v43 }
 0x965   : > { %5296 = vst [vmem:[%s7541_s12 + $0x1c8] sm:$0xff] %v2478_v35  ;;  %v2512_v33 = vpack.c.bf16 %v2478_v35, %v2476_v16 }
 0x966   : > { %v6680_v7 = vpop.eup %6679  ;;  %v2695_v39 = vpop.permute.xlu0 %2694 }
 0x967   : > { %5982 = vmatprep.mubr.bf16.mxu0 %v2512_v33  ;;  %v2693_v26 = vpop.permute.xlu1 %2692  ;;  %v2486_v61 = vmul.f32 %v6680_v7, %v8334_v24 }
 0x968   : > { %5983 = vmatmul.mubr.bf16.gmra.mrb[72].mxu0 %v2513_v56 }
 0x969   : > { %5300 = vst [vmem:[%s7541_s12 + $0x1e8] sm:$0xff] %v2486_v61  ;;  %v2514_v42 = vpack.c.bf16 %v2486_v61, %v2484_v15 }
 0x96a   : > { %v2699_v25 = vpop.permute.xlu0 %2698 }
 0x96b   : > { %5986 = vmatprep.mubr.bf16.mxu0 %v2514_v42  ;;  %v2697_v0 = vpop.permute.xlu1 %2696 }
 0x96e   : > { %v3033_v27 = vpop.permute.xlu0 %3032 }
 0x96f   : > { %6022 = vmatprep.subr.bf16.mxu1 %v3033_v27  ;;  %v2701_v17 = vpop.permute.xlu1 %2700 }
 0x970   : > { %5987 = vmatmul.mubr.bf16.gmra.mrb[76].mxu0 %v2515_v30  ;;  %6023 = vmatpush3.bf16.msra.mxu1 %v3033_v27 }
 0x971   : > { %6006 = vmatprep.mubr.msk.bf16.mxu0 %vm687_vm0, %v2687_v8 }
 0x972   : > { %v3037_v62 = vpop.permute.xlu0 %3036 }
 0x973   : > { %v3035_v12 = vpop.permute.xlu1 %3034 }
 0x974   : > { %6024 = vmatprep.subr.bf16.mxu1 %v3035_v12 }
 0x975   : > { %6025 = vmatpush3.bf16.msra.mxu1 %v3035_v12 }
 0x976   : > { %6026 = vmatprep.subr.bf16.mxu1 %v3037_v62  ;;  %v3041_v11 = vpop.permute.xlu0 %3040 }
 0x977   : > { %v3039_v24 = vpop.permute.xlu1 %3038 }
 0x978   : > { %6007 = vmatmul.mubr.msk.bf16.vlgmr.msra.gmra.mrb[80].mxu0 %vm687_vm0, %v2689_v34 }
 0x979   : > { %6010 = vmatprep.mubr.msk.bf16.mxu0 %vm687_vm0, %v2691_v2  ;;  %6027 = vmatpush3.bf16.msra.mxu1 %v3037_v62 }
 0x97a   : > { %6028 = vmatprep.subr.bf16.mxu1 %v3039_v24  ;;  %v3045_v16 = vpop.permute.xlu0 %3044 }
 0x97b   : > { %v3043_v43 = vpop.permute.xlu1 %3042 }
 0x97d   : > { %6029 = vmatpush3.bf16.msra.mxu1 %v3039_v24 }
 0x97e   : > { %6030 = vmatprep.subr.bf16.mxu1 %v3041_v11  ;;  %v8436_v1 = vpop.permute.xlu0 %3218 }
 0x97f   : > { %v3047_v9 = vpop.permute.xlu1 %3046 }
 0x980   : > { %6011 = vmatmul.mubr.msk.bf16.gmra.mrb[84].mxu0 %vm687_vm0, %v2693_v26 }
 0x981   : > { %6014 = vmatprep.mubr.msk.bf16.mxu0 %vm687_vm0, %v2695_v39  ;;  %6031 = vmatpush3.bf16.msra.mxu1 %v3041_v11 }
 0x982   : > { %6032 = vmatprep.subr.bf16.mxu1 %v3043_v43 }
 0x985   : > { %6033 = vmatpush3.bf16.msra.mxu1 %v3043_v43 }
 0x986   : > { %6034 = vmatprep.subr.bf16.mxu1 %v3045_v16 }
 0x988   : > { %6015 = vmatmul.mubr.msk.bf16.gmra.mrb[88].mxu0 %vm687_vm0, %v2697_v0 }
 0x989   : > { %6018 = vmatprep.mubr.msk.bf16.mxu0 %vm687_vm0, %v2699_v25  ;;  %6035 = vmatpush3.bf16.msra.mxu1 %v3045_v16 }
 0x98a   : > { %6036 = vmatprep.subr.bf16.mxu1 %v3047_v9 }
 0x98d   : > { %6037 = vmatpush3.bf16.msra.mxu1 %v3047_v9 }
 0x98e   : > { %6286 = vmatprep.subr.msk.bf16.mxu1 %vm687_vm0, %v8436_v1 }
 0x990   : > { %6019 = vmatmul.mubr.msk.bf16.gmra.mrb[92].mxu0 %vm687_vm0, %v2701_v17 }
 0x9f5   : > { %v8441_v8 = vpop.f32.mrb[64].mxu0 }
 0x9f6   : > { %10086 = vst [vmem:[#allocation18_spill] sm:$0xff] %v8441_v8  ;;  %v8443_v15 = vpop.f32.mrb[65].mxu0 }
 0x9f7   : > { %v8445_v41 = vpop.f32.mrb[66].mxu0 }
 0x9f8   : > { %10087 = vst [vmem:[#allocation17_spill] sm:$0xff] %v8445_v41  ;;  %v8449_v3 = vpop.f32.mrb[67].mxu0 }
 0xa2d   : > { %v8453_v2 = vpop.f32.mrb[68].mxu0 }
 0xa2e   : > { %10088 = vst [vmem:[#allocation21_spill] sm:$0xff] %v8453_v2  ;;  %v8455_v18 = vpop.f32.mrb[69].mxu0 }
 0xa2f   : > { %10089 = vst [vmem:[#allocation20_spill] sm:$0xff] %v8455_v18  ;;  %v8457_v34 = vpop.f32.mrb[70].mxu0 }
 0xa30   : > { %10090 = vst [vmem:[#allocation10_spill] sm:$0xff] %v8457_v34  ;;  %v8461_v35 = vpop.f32.mrb[71].mxu0 }
 0xa31   : > { %10091 = vst [vmem:[#allocation11_spill] sm:$0xff] %v8461_v35 }
 0xa3b   : > { %v8465_v7 = vpop.f32.mrb[72].mxu0 }
 0xa3c   : > { %10092 = vst [vmem:[#allocation46_spill] sm:$0xff] %v8465_v7  ;;  %v8467_v39 = vpop.f32.mrb[73].mxu0 }
 0xa3d   : > { %10093 = vst [vmem:[#allocation47_spill] sm:$0xff] %v8467_v39  ;;  %v8469_v56 = vpop.f32.mrb[74].mxu0 }
 0xa3e   : > { %10094 = vst [vmem:[#allocation48_spill] sm:$0xff] %v8469_v56  ;;  %v8473_v61 = vpop.f32.mrb[75].mxu0 }
 0xa3f   : > { %10095 = vst [vmem:[#allocation49_spill] sm:$0xff] %v8473_v61 }
 0xa43   : > { %v8477_v25 = vpop.f32.mrb[76].mxu0 }
 0xa44   : > { %10096 = vst [vmem:[#allocation50_spill] sm:$0xff] %v8477_v25  ;;  %v8479_v0 = vpop.f32.mrb[77].mxu0 }
 0xa45   : > { %10097 = vst [vmem:[#allocation51_spill] sm:$0xff] %v8479_v0  ;;  %v8481_v27 = vpop.f32.mrb[78].mxu0  ;;  %v8526_v0 = vpop.permute.xlu1 %3220 }
 0xa46   : > { %10098 = vst [vmem:[#allocation52_spill] sm:$0xff] %v8481_v27  ;;  %v8485_v17 = vpop.f32.mrb[79].mxu0 }
 0xa47   : > { %10099 = vst [vmem:[#allocation53_spill] sm:$0xff] %v8485_v17 }
 0xa4b   : > { %v6008_v62 = vpop.f32.mrb[80].mxu0 }
 0xa4c   : > { %2867 = vmax.xlane.f32.xlu0 %v6008_v62  ;;  %v2800_v24 = vpop.f32.mrb[81].mxu0 }
 0xa4d   : > { %v6009_v11 = vpop.f32.mrb[82].mxu0 }
 0xa4e   : > { %v2803_v43 = vpop.f32.mrb[83].mxu0 }
 0xa4f   : > { %2865 = vmax.xlane.f32.xlu1 %v2803_v43 }
 0xa50   : > { %2863 = vmax.xlane.f32.xlu0 %v2800_v24 }
 0xa53   : > { %v6012_v16 = vpop.f32.mrb[84].mxu0 }
 0xa54   : > { %2869 = vmax.xlane.f32.xlu0 %v6009_v11  ;;  %v8489_v9 = vpop.f32.mrb[85].mxu0 }
 0xa55   : > { %v8491_v26 = vpop.f32.mrb[86].mxu0 }
 0xa56   : > { %2877 = vmax.xlane.f32.xlu1 %v8491_v26  ;;  %v8494_v30 = vpop.f32.mrb[87].mxu0 }
 0xa58   : > { %2875 = vmax.xlane.f32.xlu0 %v6012_v16 }
 0xa5a   : > { %2873 = vmax.xlane.f32.xlu1 %v8494_v30 }
 0xa5b   : > { %v8497_v12 = vpop.f32.mrb[88].mxu0 }
 0xa5c   : > { %2871 = vmax.xlane.f32.xlu0 %v8489_v9  ;;  %v8500_v42 = vpop.f32.mrb[89].mxu0 }
 0xa5d   : > { %v8502_v45 = vpop.f32.mrb[90].mxu0 }
 0xa5e   : > { %2885 = vmax.xlane.f32.xlu1 %v8502_v45  ;;  %v8505_v33 = vpop.f32.mrb[91].mxu0 }
 0xa60   : > { %2883 = vmax.xlane.f32.xlu0 %v8497_v12 }
 0xa62   : > { %2881 = vmax.xlane.f32.xlu1 %v8505_v33 }
 0xa63   : > { %v8509_v55 = vpop.f32.mrb[92].mxu0 }
 0xa64   : > { %2879 = vmax.xlane.f32.xlu0 %v8500_v42  ;;  %v8512_v47 = vpop.f32.mrb[93].mxu0 }
 0xa65   : > { %v8514_v25 = vpop.f32.mrb[94].mxu0 }
 0xa66   : > { %v8516_v27 = vpop.f32.mrb[95].mxu0 }
 0xa68   : > { %2891 = vmax.xlane.f32.xlu0 %v8509_v55 }
 0xa6c   : > { %2887 = vmax.xlane.f32.xlu0 %v8512_v47 }
 0xa73   : > { %3224 = vrot.lane.b32.xlu1 %v7307_v23, %s7066_s15 }
 0xa82   : > { %3222 = vrot.lane.b32.xlu0 %v7290_v10, %s7066_s15 }
 0xa97   : > { %2893 = vmax.xlane.f32.xlu1 %v8514_v25 }
 0xa9b   : > { %2889 = vmax.xlane.f32.xlu1 %v8516_v27 }
 0xad9   : > { %v2868_v17 = vpop.xlane.xlu0 %2867 }
 0xada   : > { %v2897_v7 = vsub.f32 %v6008_v62, %v2868_v17 }
 0xadc   : > { %v2915_v56 = vmul.f32 1.442695, %v2897_v7  ;;  %v2866_v39 = vpop.xlane.xlu1 %2865 }
 0xadd   : > { %v2896_v61 = vsub.f32 %v2803_v43, %v2866_v39  ;;  %v2864_v2 = vpop.xlane.xlu0 %2863 }
 0xade   : > { %6681 = vpow2.f32 %v2915_v56  ;;  %v2895_v34 = vsub.f32 %v2800_v24, %v2864_v2 }
 0xadf   : > { %v2913_v18 = vmul.f32 1.442695, %v2896_v61 }
 0xae0   : > { %v2911_v35 = vmul.f32 1.442695, %v2895_v34 }
 0xae1   : > { %6683 = vpow2.f32 %v2913_v18  ;;  %v2870_v50 = vpop.xlane.xlu0 %2869 }
 0xae2   : > { %6685 = vpow2.f32 %v2911_v35  ;;  %v2898_v8 = vsub.f32 %v6009_v11, %v2870_v50 }
 0xae4   : > { %v2917_v41 = vmul.f32 1.442695, %v2898_v8  ;;  %v2878_v8 = vpop.xlane.xlu1 %2877 }
 0xae5   : > { %v2876_v18 = vpop.xlane.xlu0 %2875  ;;  %v2902_v11 = vsub.f32 %v8491_v26, %v2878_v8 }
 0xae6   : > { %6687 = vpow2.f32 %v2917_v41  ;;  %v2901_v34 = vsub.f32 %v6012_v16, %v2876_v18 }
 0xae7   : > { %v2925_v38 = vmul.f32 1.442695, %v2902_v11 }
 0xae8   : > { %v8528_v58 = vpop.eup %6681  ;;  %v2874_v35 = vpop.xlane.xlu1 %2873  ;;  %v2923_v56 = vmul.f32 1.442695, %v2901_v34 }
 0xae9   : > { %2947 = vadd.xlane.f32.xlu1 %v8528_v58  ;;  %v2872_v50 = vpop.xlane.xlu0 %2871  ;;  %v2900_v17 = vsub.f32 %v8494_v30, %v2874_v35 }
 0xaea   : > { %v2899_v61 = vsub.f32 %v8489_v9, %v2872_v50  ;;  %6689 = vpow2.f32 %v2923_v56 }
 0xaeb   : > { %v8531_v4 = vpop.eup %6683  ;;  %v2921_v13 = vmul.f32 1.442695, %v2900_v17 }
 0xaec   : > { %v8533_v7 = vpop.eup %6685  ;;  %2945 = vadd.xlane.f32.xlu0 %v8531_v4  ;;  %v2886_v62 = vpop.xlane.xlu1 %2885  ;;  %v2919_v43 = vmul.f32 1.442695, %v2899_v61 }
 0xaed   : > { %2943 = vadd.xlane.f32.xlu1 %v8533_v7  ;;  %v2884_v41 = vpop.xlane.xlu0 %2883  ;;  %v2906_v26 = vsub.f32 %v8502_v45, %v2886_v62 }
 0xaee   : > { %v2905_v21 = vsub.f32 %v8497_v12, %v2884_v41  ;;  %6691 = vpow2.f32 %v2919_v43 }
 0xaef   : > { %6693 = vpow2.f32 %v2921_v13 }
 0xaf0   : > { %v8537_v2 = vpop.eup %6687  ;;  %v2882_v40 = vpop.xlane.xlu1 %2881  ;;  %v2931_v18 = vmul.f32 1.442695, %v2905_v21  ;;  %6695 = vpow2.f32 %v2925_v38  ;;  %v2933_v21 = vmul.f32 1.442695, %v2906_v26 }
 0xaf1   : > { %2949 = vadd.xlane.f32.xlu1 %v8537_v2  ;;  %v2880_v39 = vpop.xlane.xlu0 %2879 }
 0xaf2   : > { %v2903_v9 = vsub.f32 %v8500_v42, %v2880_v39  ;;  %6697 = vpow2.f32 %v2931_v18 }
 0xaf4   : > { %v2927_v8 = vmul.f32 1.442695, %v2903_v9  ;;  %v8552_v35 = vpop.eup %6689  ;;  %v8554_v12 = vpop.permute.xlu1 %3224 }
 0xaf5   : > { %v2892_v24 = vpop.xlane.xlu0 %2891 }
 0xaf6   : > { %v2909_v16 = vsub.f32 %v8509_v55, %v2892_v24  ;;  %v2904_v55 = vsub.f32 %v8505_v33, %v2882_v40 }
 0xaf8   : > { %v2939_v30 = vmul.f32 1.442695, %v2909_v16  ;;  %v8558_v38 = vpop.eup %6691  ;;  %v2929_v41 = vmul.f32 1.442695, %v2904_v55 }
 0xaf9   : > { %v2888_v50 = vpop.xlane.xlu0 %2887 }
 0xafa   : > { %v2907_v34 = vsub.f32 %v8512_v47, %v2888_v50  ;;  %6699 = vpow2.f32 %v2939_v30  ;;  %v8560_v47 = vpop.eup %6693 }
 0xafb   : > { %6701 = vpow2.f32 %v2927_v8  ;;  %v8565_v56 = vpop.eup %6695 }
 0xafc   : > { %v2935_v13 = vmul.f32 1.442695, %v2907_v34  ;;  %v8567_v40 = vpop.eup %6697 }
 0xafd   : > { %v3223_v18 = vpop.permute.xlu0 %3222 }
 0xafe   : > { %6703 = vpow2.f32 %v2935_v13 }
 0xaff   : > { %6705 = vpow2.f32 %v2933_v21 }
 0xb02   : > { %3228 = vrot.lane.b32.xlu1 %v7343_v49, %s7066_s15  ;;  %3226 = vrot.lane.b32.xlu0 %v7325_v36, %s7066_s15 }
 0xb04   : > { %v8572_v17 = vpop.eup %6699 }
 0xb05   : > { %v8574_v62 = vpop.eup %6701 }
 0xb08   : > { %v8578_v24 = vpop.eup %6703 }
 0xb09   : > { %v8580_v11 = vpop.eup %6705 }
 0xb21   : > { %2955 = vadd.xlane.f32.xlu0 %v8552_v35 }
 0xb24   : > { %v2894_v42 = vpop.xlane.xlu1 %2893 }
 0xb25   : > { %v2910_v45 = vsub.f32 %v8514_v25, %v2894_v42  ;;  %2951 = vadd.xlane.f32.xlu0 %v8558_v38 }
 0xb26   : > { %2953 = vadd.xlane.f32.xlu1 %v8560_v47 }
 0xb27   : > { %v2941_v39 = vmul.f32 1.442695, %v2910_v45 }
 0xb28   : > { %v2890_v61 = vpop.xlane.xlu1 %2889 }
 0xb29   : > { %6707 = vpow2.f32 %v2941_v39  ;;  %v2908_v33 = vsub.f32 %v8516_v27, %v2890_v61  ;;  %2957 = vadd.xlane.f32.xlu0 %v8565_v56 }
 0xb2a   : > { %2963 = vadd.xlane.f32.xlu1 %v8567_v40  ;;  %6709 = vpow2.f32 %v2929_v41 }
 0xb2b   : > { %v2937_v25 = vmul.f32 1.442695, %v2908_v33 }
 0xb2d   : > { %2971 = vadd.xlane.f32.xlu0 %v8572_v17  ;;  %6711 = vpow2.f32 %v2937_v25 }
 0xb2e   : > { %2959 = vadd.xlane.f32.xlu1 %v8574_v62 }
 0xb31   : > { %2967 = vadd.xlane.f32.xlu0 %v8578_v24 }
 0xb32   : > { %2965 = vadd.xlane.f32.xlu1 %v8580_v11 }
 0xb33   : > { %v8584_v27 = vpop.eup %6707 }
 0xb34   : > { %v8586_v43 = vpop.eup %6709 }
 0xb35   : > { %2973 = vadd.xlane.f32.xlu0 %v8584_v27 }
 0xb36   : > { %2961 = vadd.xlane.f32.xlu1 %v8586_v43 }
 0xb37   : > { %v8590_v16 = vpop.eup %6711 }
 0xb3a   : > { %2969 = vadd.xlane.f32.xlu1 %v8590_v16 }
 0xb4b   : > { %3230 = vrot.lane.b32.xlu0 %v7357_v60, %s7066_s15  ;;  %3232 = vrot.lane.b32.xlu1 %v7366_v5, %s7066_s15 }
 0xb4f   : > { %3202 = vrot.lane.b32.xlu0 %v7262_v52, %s7066_s15  ;;  %3204 = vrot.lane.b32.xlu1 %v7276_v59, %s7066_s15 }
 0xb53   : > { %3206 = vrot.lane.b32.xlu0 %v7286_v6, %s7066_s15  ;;  %3208 = vrot.lane.b32.xlu1 %v10026_v51, %s7066_s15 }
 0xb57   : > { %3210 = vrot.lane.b32.xlu0 %v7321_v32, %s7066_s15  ;;  %3212 = vrot.lane.b32.xlu1 %v10028_v54, %s7066_s15 }
 0xb5b   : > { %3214 = vrot.lane.b32.xlu0 %v7355_v57, %s7066_s15  ;;  %3216 = vrot.lane.b32.xlu1 %v10030_v37, %s7066_s15 }
 0xb5f   : > { %3548 = vrot.lane.b32.xlu0 %v10025_v48, %s7066_s15  ;;  %3550 = vrot.lane.b32.xlu1 %v10032_v44, %s7066_s15 }
 0xb63   : > { %3552 = vrot.lane.b32.xlu0 %v10027_v19, %s7066_s15  ;;  %3554 = vrot.lane.b32.xlu1 %v10034_v28, %s7066_s15 }
 0xb67   : > { %3556 = vrot.lane.b32.xlu0 %v10080_v53, %s7066_s15  ;;  %3558 = vrot.lane.b32.xlu1 %v10081_v14, %s7066_s15 }
 0xb6b   : > { %3560 = vrot.lane.b32.xlu0 %v10082_v46, %s7066_s15  ;;  %3562 = vrot.lane.b32.xlu1 %v10083_v22, %s7066_s15 }
 0xb6f   : > { %3734 = vrot.lane.b32.xlu0 %v10084_v63, %s9990_s16  ;;  %3736 = vrot.lane.b32.xlu1 %v10085_v31, %s9990_s16 }
 0xb76   : > { %v2948_v9 = vpop.xlane.xlu1 %2947 }
 0xb77   : > { %6713 = vrcp.f32 %v2948_v9 }
 0xb79   : > { %v2946_v50 = vpop.xlane.xlu0 %2945 }
 0xb7a   : > { %6715 = vrcp.f32 %v2946_v50  ;;  %v2944_v30 = vpop.xlane.xlu1 %2943 }
 0xb7b   : > { %6717 = vrcp.f32 %v2944_v30 }
 0xb7e   : > { %v2950_v34 = vpop.xlane.xlu1 %2949 }
 0xb7f   : > { %6719 = vrcp.f32 %v2950_v34 }
 0xb81   : > { %v6714_v26 = vpop.eup %6713 }
 0xb82   : > { %v2980_v8 = vmul.f32 %v6714_v26, %v8528_v58  ;;  %v3259_v58 = vsel %vm687_vm0, %v8436_v1, 0  ;;  %v3227_v1 = vpop.permute.xlu0 %3226 }
 0xb83   : > { %v3271_v25 = vsel %vm687_vm0, %v3227_v1, 0 }
 0xb84   : > { %v6716_v13 = vpop.eup %6715  ;;  %5313 = vst [vmem:[%s7541_s12 + $0x210] sm:$0xff] %v2980_v8 }
 0xb85   : > { %v6718_v21 = vpop.eup %6717  ;;  %v2978_v55 = vmul.f32 %v6716_v13, %v8531_v4  ;;  %v3262_v4 = vsel %vm687_vm0, %v8526_v0, 0 }
 0xb86   : > { %v2976_v42 = vmul.f32 %v6718_v21, %v8533_v7  ;;  %v3265_v7 = vsel %vm687_vm0, %v3223_v18, 0 }
 0xb87   : > { %5312 = vst [vmem:[%s7541_s12 + $0x208] sm:$0xff] %v2978_v55 }
 0xb88   : > { %5311 = vst [vmem:[%s7541_s12 + $0x200] sm:$0xff] %v2976_v42  ;;  %v3024_v45 = vpack.c.bf16 %v2978_v55, %v2976_v42 }
 0xb89   : > { %v6720_v41 = vpop.eup %6719 }
 0xb8a   : > { %v2982_v39 = vmul.f32 %v6720_v41, %v8537_v2  ;;  %6038 = vmatprep.mubr.bf16.mxu1 %v3024_v45  ;;  %v3268_v2 = vsel %vm687_vm0, %v8554_v12, 0 }
 0xb8c   : > { %5314 = vst [vmem:[%s7541_s12 + $0x218] sm:$0xff] %v2982_v39  ;;  %v3025_v61 = vpack.c.bf16 %v2982_v39, %v2980_v8 }
 0xb8e   : > { %6039 = vmatmul.mubr.bf16.vlgmr.msra.gmra.mrb[96].mxu1 %v3025_v61 }
 0xb8f   : > { %6055 = vmatpush3.bf16.xpose.msra.mxu1 %v3259_v58 }
 0xb90   : > { %6287 = vmatprep.subr.msk.bf16.mxu1 %vm687_vm0, %v8526_v0  ;;  %v3229_v0 = vpop.permute.xlu1 %3228 }
 0xb97   : > { %6057 = vmatpush3.bf16.xpose.msra.mxu1 %v3262_v4 }
 0xb98   : > { %6288 = vmatprep.subr.msk.bf16.mxu1 %vm687_vm0, %v3223_v18 }
 0xb9f   : > { %6059 = vmatpush3.bf16.xpose.msra.mxu1 %v3265_v7 }
 0xba0   : > { %6289 = vmatprep.subr.msk.bf16.mxu1 %vm687_vm0, %v8554_v12  ;;  %v3274_v12 = vsel %vm687_vm0, %v3229_v0, 0 }
 0xba7   : > { %6061 = vmatpush3.bf16.xpose.msra.mxu1 %v3268_v2 }
 0xba8   : > { %6290 = vmatprep.subr.msk.bf16.mxu1 %vm687_vm0, %v3227_v1 }
 0xbae   : > { %v2956_v33 = vpop.xlane.xlu0 %2955 }
 0xbaf   : > { %6721 = vrcp.f32 %v2956_v33  ;;  %6063 = vmatpush3.bf16.xpose.msra.mxu1 %v3271_v25 }
 0xbb0   : > { %6291 = vmatprep.subr.msk.bf16.mxu1 %vm687_vm0, %v3229_v0 }
 0xbb2   : > { %v2952_v18 = vpop.xlane.xlu0 %2951 }
 0xbb3   : > { %6723 = vrcp.f32 %v2952_v18  ;;  %v2954_v9 = vpop.xlane.xlu1 %2953 }
 0xbb4   : > { %6725 = vrcp.f32 %v2954_v9 }
 0xbb6   : > { %v2958_v50 = vpop.xlane.xlu0 %2957 }
 0xbb7   : > { %6727 = vrcp.f32 %v2958_v50  ;;  %6065 = vmatpush3.bf16.xpose.msra.mxu1 %v3274_v12  ;;  %v2964_v30 = vpop.xlane.xlu1 %2963 }
 0xbb8   : > { %6729 = vrcp.f32 %v2964_v30 }
 0xbb9   : > { %v6722_v34 = vpop.eup %6721 }
 0xbba   : > { %v2972_v26 = vpop.xlane.xlu0 %2971  ;;  %v2988_v8 = vmul.f32 %v6722_v34, %v8552_v35 }
 0xbbb   : > { %6731 = vrcp.f32 %v2972_v26  ;;  %v2960_v13 = vpop.xlane.xlu1 %2959 }
 0xbbc   : > { %6733 = vrcp.f32 %v2960_v13  ;;  %5317 = vst [vmem:[%s7541_s12 + $0x230] sm:$0xff] %v2988_v8 }
 0xbbd   : > { %v6724_v21 = vpop.eup %6723 }
 0xbbe   : > { %v6726_v55 = vpop.eup %6725  ;;  %v2968_v42 = vpop.xlane.xlu0 %2967  ;;  %v2984_v45 = vmul.f32 %v6724_v21, %v8558_v38 }
 0xbbf   : > { %6735 = vrcp.f32 %v2968_v42  ;;  %v2966_v41 = vpop.xlane.xlu1 %2965  ;;  %v2986_v39 = vmul.f32 %v6726_v55, %v8560_v47 }
 0xbc0   : > { %6737 = vrcp.f32 %v2966_v41  ;;  %5315 = vst [vmem:[%s7541_s12 + $0x220] sm:$0xff] %v2984_v45 }
 0xbc1   : > { %v6728_v61 = vpop.eup %6727  ;;  %5316 = vst [vmem:[%s7541_s12 + $0x228] sm:$0xff] %v2986_v39  ;;  %v3026_v35 = vpack.c.bf16 %v2986_v39, %v2984_v45 }
 0xbc2   : > { %v6730_v58 = vpop.eup %6729  ;;  %v2974_v4 = vpop.xlane.xlu0 %2973  ;;  %v2990_v7 = vmul.f32 %v6728_v61, %v8565_v56 }
 0xbc3   : > { %6739 = vrcp.f32 %v2974_v4  ;;  %6042 = vmatprep.mubr.bf16.mxu1 %v3026_v35  ;;  %v2962_v2 = vpop.xlane.xlu1 %2961  ;;  %v2996_v38 = vmul.f32 %v6730_v58, %v8567_v40 }
 0xbc4   : > { %6741 = vrcp.f32 %v2962_v2  ;;  %5318 = vst [vmem:[%s7541_s12 + $0x238] sm:$0xff] %v2990_v7  ;;  %v3027_v47 = vpack.c.bf16 %v2990_v7, %v2988_v8 }
 0xbc5   : > { %v6732_v1 = vpop.eup %6731  ;;  %5321 = vst [vmem:[%s7541_s12 + $0x250] sm:$0xff] %v2996_v38 }
 0xbc6   : > { %v6734_v33 = vpop.eup %6733  ;;  %v3231_v25 = vpop.permute.xlu0 %3230  ;;  %6043 = vmatmul.mubr.bf16.gmra.mrb[100].mxu1 %v3027_v47  ;;  %v3004_v0 = vmul.f32 %v6732_v1, %v8572_v17 }
 0xbc7   : > { %6292 = vmatprep.subr.msk.bf16.mxu1 %vm687_vm0, %v3231_v25  ;;  %v2970_v56 = vpop.xlane.xlu1 %2969  ;;  %v3277_v18 = vsel %vm687_vm0, %v3231_v25, 0  ;;  %v2992_v40 = vmul.f32 %v6734_v33, %v8574_v62 }
 0xbc8   : > { %6743 = vrcp.f32 %v2970_v56  ;;  %6067 = vmatpush3.bf16.xpose.msra.mxu1 %v3277_v18  ;;  %5325 = vst [vmem:[%s7541_s12 + $0x270] sm:$0xff] %v3004_v0 }
 0xbc9   : > { %v6736_v9 = vpop.eup %6735  ;;  %5319 = vst [vmem:[%s7541_s12 + $0x240] sm:$0xff] %v2992_v40 }
 0xbca   : > { %v6738_v50 = vpop.eup %6737  ;;  %v3203_v12 = vpop.permute.xlu0 %3202  ;;  %v3000_v17 = vmul.f32 %v6736_v9, %v8578_v24 }
 0xbcb   : > { %v3233_v30 = vpop.permute.xlu1 %3232  ;;  %v2998_v34 = vmul.f32 %v6738_v50, %v8580_v11 }
 0xbcc   : > { %6293 = vmatprep.subr.msk.bf16.mxu1 %vm687_vm0, %v3233_v30  ;;  %5323 = vst [vmem:[%s7541_s12 + $0x260] sm:$0xff] %v3000_v17  ;;  %v3280_v55 = vsel %vm687_vm0, %v3233_v30, 0 }
 0xbcd   : > { %v6740_v26 = vpop.eup %6739  ;;  %5322 = vst [vmem:[%s7541_s12 + $0x258] sm:$0xff] %v2998_v34  ;;  %v3029_v41 = vpack.c.bf16 %v2998_v34, %v2996_v38 }
 0xbce   : > { %v6742_v62 = vpop.eup %6741  ;;  %v3207_v8 = vpop.permute.xlu0 %3206  ;;  %v3006_v13 = vmul.f32 %v6740_v26, %v8584_v27 }
 0xbcf   : > { %v3205_v21 = vpop.permute.xlu1 %3204  ;;  %v2994_v42 = vmul.f32 %v6742_v62, %v8586_v43 }
 0xbd0   : > { %6069 = vmatpush3.bf16.xpose.msra.mxu1 %v3280_v55  ;;  %5326 = vst [vmem:[%s7541_s12 + $0x278] sm:$0xff] %v3006_v13  ;;  %v3031_v7 = vpack.c.bf16 %v3006_v13, %v3004_v0 }
 0xbd1   : > { %5320 = vst [vmem:[%s7541_s12 + $0x248] sm:$0xff] %v2994_v42  ;;  %v3028_v24 = vpack.c.bf16 %v2994_v42, %v2992_v40 }
 0xbd2   : > { %v6744_v11 = vpop.eup %6743  ;;  %v3211_v45 = vpop.permute.xlu0 %3210 }
 0xbd3   : > { %6046 = vmatprep.mubr.bf16.mxu1 %v3028_v24  ;;  %v3209_v39 = vpop.permute.xlu1 %3208  ;;  %v3002_v61 = vmul.f32 %v6744_v11, %v8590_v16 }
 0xbd4   : > { %6047 = vmatmul.mubr.bf16.gmra.mrb[104].mxu1 %v3029_v41 }
 0xbd5   : > { %5324 = vst [vmem:[%s7541_s12 + $0x268] sm:$0xff] %v3002_v61  ;;  %v3030_v35 = vpack.c.bf16 %v3002_v61, %v3000_v17 }
 0xbd6   : > { %v3215_v27 = vpop.permute.xlu0 %3214 }
 0xbd7   : > { %6050 = vmatprep.mubr.bf16.mxu1 %v3030_v35  ;;  %v3213_v58 = vpop.permute.xlu1 %3212 }
 0xbda   : > { %v3549_v4 = vpop.permute.xlu0 %3548 }
 0xbdb   : > { %6086 = vmatprep.subr.bf16.mxu0 %v3549_v4  ;;  %v3217_v43 = vpop.permute.xlu1 %3216 }
 0xbdc   : > { %6051 = vmatmul.mubr.bf16.gmra.mrb[108].mxu1 %v3031_v7  ;;  %6087 = vmatpush3.bf16.msra.mxu0 %v3549_v4 }
 0xbdd   : > { %6070 = vmatprep.mubr.msk.bf16.mxu1 %vm687_vm0, %v3203_v12 }
 0xbde   : > { %v3553_v38 = vpop.permute.xlu0 %3552 }
 0xbdf   : > { %v3551_v2 = vpop.permute.xlu1 %3550 }
 0xbe0   : > { %6088 = vmatprep.subr.bf16.mxu0 %v3551_v2 }
 0xbe1   : > { %6089 = vmatpush3.bf16.msra.mxu0 %v3551_v2 }
 0xbe2   : > { %6090 = vmatprep.subr.bf16.mxu0 %v3553_v38  ;;  %v3557_v47 = vpop.permute.xlu0 %3556 }
 0xbe3   : > { %v3555_v16 = vpop.permute.xlu1 %3554 }
 0xbe4   : > { %6071 = vmatmul.mubr.msk.bf16.vlgmr.msra.gmra.mrb[112].mxu1 %vm687_vm0, %v3205_v21 }
 0xbe5   : > { %6074 = vmatprep.mubr.msk.bf16.mxu1 %vm687_vm0, %v3207_v8  ;;  %6091 = vmatpush3.bf16.msra.mxu0 %v3553_v38 }
 0xbe6   : > { %6092 = vmatprep.subr.bf16.mxu0 %v3555_v16  ;;  %v3561_v33 = vpop.permute.xlu0 %3560 }
 0xbe7   : > { %v3559_v1 = vpop.permute.xlu1 %3558 }
 0xbe9   : > { %6093 = vmatpush3.bf16.msra.mxu0 %v3555_v16 }
 0xbea   : > { %6094 = vmatprep.subr.bf16.mxu0 %v3557_v47  ;;  %v8692_v0 = vpop.permute.xlu0 %3734 }
 0xbeb   : > { %v3563_v25 = vpop.permute.xlu1 %3562 }
 0xbec   : > { %6075 = vmatmul.mubr.msk.bf16.gmra.mrb[116].mxu1 %vm687_vm0, %v3209_v39 }
 0xbed   : > { %6078 = vmatprep.mubr.msk.bf16.mxu1 %vm687_vm0, %v3211_v45  ;;  %6095 = vmatpush3.bf16.msra.mxu0 %v3557_v47 }
 0xbee   : > { %6096 = vmatprep.subr.bf16.mxu0 %v3559_v1 }
 0xbef   : > { %v8782_v8 = vpop.permute.xlu1 %3736 }
 0xbf1   : > { %6097 = vmatpush3.bf16.msra.mxu0 %v3559_v1 }
 0xbf2   : > { %6098 = vmatprep.subr.bf16.mxu0 %v3561_v33 }
 0xbf4   : > { %6079 = vmatmul.mubr.msk.bf16.gmra.mrb[120].mxu1 %vm687_vm0, %v3213_v58 }
 0xbf5   : > { %6082 = vmatprep.mubr.msk.bf16.mxu1 %vm687_vm0, %v3215_v27  ;;  %6099 = vmatpush3.bf16.msra.mxu0 %v3561_v33 }
 0xbf6   : > { %6100 = vmatprep.subr.bf16.mxu0 %v3563_v25 }
 0xbf9   : > { %6101 = vmatpush3.bf16.msra.mxu0 %v3563_v25 }
 0xbfa   : > { %6294 = vmatprep.subr.msk.bf16.mxu0 %vm687_vm0, %v8692_v0 }
 0xbfc   : > { %6083 = vmatmul.mubr.msk.bf16.gmra.mrb[124].mxu1 %vm687_vm0, %v3217_v43 }
 0xc61   : > { %v8697_v56 = vpop.f32.mrb[96].mxu1 }
 0xc62   : > { %10100 = vst [vmem:[#allocation54_spill] sm:$0xff] %v8697_v56  ;;  %v8699_v18 = vpop.f32.mrb[97].mxu1 }
 0xc63   : > { %10101 = vst [vmem:[#allocation55_spill] sm:$0xff] %v8699_v18  ;;  %v8701_v40 = vpop.f32.mrb[98].mxu1 }
 0xc64   : > { %10102 = vst [vmem:[#allocation56_spill] sm:$0xff] %v8701_v40  ;;  %v8705_v50 = vpop.f32.mrb[99].mxu1 }
 0xc65   : > { %10103 = vst [vmem:[#allocation57_spill] sm:$0xff] %v8705_v50 }
 0xc99   : > { %v8709_v17 = vpop.f32.mrb[100].mxu1 }
 0xc9a   : > { %10104 = vst [vmem:[#allocation58_spill] sm:$0xff] %v8709_v17  ;;  %v8711_v30 = vpop.f32.mrb[101].mxu1 }
 0xc9b   : > { %10105 = vst [vmem:[#allocation59_spill] sm:$0xff] %v8711_v30  ;;  %v8713_v34 = vpop.f32.mrb[102].mxu1 }
 0xc9c   : > { %10106 = vst [vmem:[#allocation60_spill] sm:$0xff] %v8713_v34  ;;  %v8717_v62 = vpop.f32.mrb[103].mxu1 }
 0xc9d   : > { %10107 = vst [vmem:[#allocation61_spill] sm:$0xff] %v8717_v62 }
 0xca7   : > { %v8721_v13 = vpop.f32.mrb[104].mxu1 }
 0xca8   : > { %10108 = vst [vmem:[#allocation62_spill] sm:$0xff] %v8721_v13  ;;  %v8723_v21 = vpop.f32.mrb[105].mxu1 }
 0xca9   : > { %10109 = vst [vmem:[#allocation63_spill] sm:$0xff] %v8723_v21  ;;  %v8725_v55 = vpop.f32.mrb[106].mxu1 }
 0xcaa   : > { %10110 = vst [vmem:[#allocation64_spill] sm:$0xff] %v8725_v55  ;;  %v8729_v24 = vpop.f32.mrb[107].mxu1 }
 0xcab   : > { %10111 = vst [vmem:[#allocation65_spill] sm:$0xff] %v8729_v24 }
 0xcaf   : > { %v8733_v45 = vpop.f32.mrb[108].mxu1 }
 0xcb0   : > { %10112 = vst [vmem:[#allocation66_spill] sm:$0xff] %v8733_v45  ;;  %v8735_v41 = vpop.f32.mrb[109].mxu1 }
 0xcb1   : > { %10113 = vst [vmem:[#allocation67_spill] sm:$0xff] %v8735_v41  ;;  %v8737_v39 = vpop.f32.mrb[110].mxu1 }
 0xcb2   : > { %10114 = vst [vmem:[#allocation68_spill] sm:$0xff] %v8737_v39  ;;  %v8741_v35 = vpop.f32.mrb[111].mxu1 }
 0xcb3   : > { %10115 = vst [vmem:[#allocation69_spill] sm:$0xff] %v8741_v35 }
 0xcb7   : > { %v6072_v58 = vpop.f32.mrb[112].mxu1 }
 0xcb8   : > { %3383 = vmax.xlane.f32.xlu0 %v6072_v58  ;;  %v3316_v4 = vpop.f32.mrb[113].mxu1 }
 0xcb9   : > { %v6073_v7 = vpop.f32.mrb[114].mxu1 }
 0xcba   : > { %v3319_v43 = vpop.f32.mrb[115].mxu1 }
 0xcbb   : > { %3381 = vmax.xlane.f32.xlu1 %v3319_v43 }
 0xcbc   : > { %3379 = vmax.xlane.f32.xlu0 %v3316_v4 }
 0xcbf   : > { %v6076_v2 = vpop.f32.mrb[116].mxu1 }
 0xcc0   : > { %3385 = vmax.xlane.f32.xlu0 %v6073_v7  ;;  %v8745_v38 = vpop.f32.mrb[117].mxu1 }
 0xcc1   : > { %v8747_v16 = vpop.f32.mrb[118].mxu1 }
 0xcc2   : > { %3393 = vmax.xlane.f32.xlu1 %v8747_v16  ;;  %v8750_v47 = vpop.f32.mrb[119].mxu1 }
 0xcc4   : > { %3391 = vmax.xlane.f32.xlu0 %v6076_v2 }
 0xcc6   : > { %3389 = vmax.xlane.f32.xlu1 %v8750_v47 }
 0xcc7   : > { %v8753_v1 = vpop.f32.mrb[120].mxu1 }
 0xcc8   : > { %3387 = vmax.xlane.f32.xlu0 %v8745_v38  ;;  %v8756_v33 = vpop.f32.mrb[121].mxu1 }
 0xcc9   : > { %v8758_v25 = vpop.f32.mrb[122].mxu1 }
 0xcca   : > { %3401 = vmax.xlane.f32.xlu1 %v8758_v25  ;;  %v8761_v61 = vpop.f32.mrb[123].mxu1 }
 0xccc   : > { %3399 = vmax.xlane.f32.xlu0 %v8753_v1 }
 0xcce   : > { %3397 = vmax.xlane.f32.xlu1 %v8761_v61 }
 0xccf   : > { %v8765_v27 = vpop.f32.mrb[124].mxu1 }
 0xcd0   : > { %3395 = vmax.xlane.f32.xlu0 %v8756_v33  ;;  %v8768_v42 = vpop.f32.mrb[125].mxu1 }
 0xcd1   : > { %v8770_v11 = vpop.f32.mrb[126].mxu1 }
 0xcd2   : > { %v8772_v26 = vpop.f32.mrb[127].mxu1 }
 0xcd4   : > { %3407 = vmax.xlane.f32.xlu0 %v8765_v27 }
 0xcd8   : > { %3403 = vmax.xlane.f32.xlu0 %v8768_v42 }
 0xcdf   : > { %3740 = vrot.lane.b32.xlu1 %v7307_v23, %s9990_s16 }
 0xcee   : > { %3738 = vrot.lane.b32.xlu0 %v7290_v10, %s9990_s16 }
 0xd03   : > { %3409 = vmax.xlane.f32.xlu1 %v8770_v11 }
 0xd07   : > { %3405 = vmax.xlane.f32.xlu1 %v8772_v26 }
 0xd45   : > { %v3384_v9 = vpop.xlane.xlu0 %3383 }
 0xd46   : > { %v3413_v12 = vsub.f32 %v6072_v58, %v3384_v9 }
 0xd48   : > { %v3431_v45 = vmul.f32 1.442695, %v3413_v12  ;;  %v3382_v39 = vpop.xlane.xlu1 %3381 }
 0xd49   : > { %v3412_v41 = vsub.f32 %v3319_v43, %v3382_v39  ;;  %v3380_v35 = vpop.xlane.xlu0 %3379 }
 0xd4a   : > { %6745 = vpow2.f32 %v3431_v45  ;;  %v3411_v13 = vsub.f32 %v3316_v4, %v3380_v35 }
 0xd4b   : > { %v3429_v55 = vmul.f32 1.442695, %v3412_v41 }
 0xd4c   : > { %v3427_v21 = vmul.f32 1.442695, %v3411_v13 }
 0xd4d   : > { %6747 = vpow2.f32 %v3429_v55  ;;  %v3386_v24 = vpop.xlane.xlu0 %3385 }
 0xd4e   : > { %6749 = vpow2.f32 %v3427_v21  ;;  %v3414_v17 = vsub.f32 %v6073_v7, %v3386_v24 }
 0xd50   : > { %v3433_v34 = vmul.f32 1.442695, %v3414_v17 }
 0xd51   : > { %v3392_v13 = vpop.xlane.xlu0 %3391 }
 0xd52   : > { %6751 = vpow2.f32 %v3433_v34  ;;  %v3394_v34 = vpop.xlane.xlu1 %3393  ;;  %v3417_v55 = vsub.f32 %v6076_v2, %v3392_v13 }
 0xd53   : > { %v3418_v7 = vsub.f32 %v8747_v16, %v3394_v34 }
 0xd54   : > { %v8784_v30 = vpop.eup %6745  ;;  %v3439_v41 = vmul.f32 1.442695, %v3417_v55 }
 0xd55   : > { %3463 = vadd.xlane.f32.xlu1 %v8784_v30  ;;  %v3388_v17 = vpop.xlane.xlu0 %3387  ;;  %v3441_v18 = vmul.f32 1.442695, %v3418_v7 }
 0xd56   : > { %v3390_v24 = vpop.xlane.xlu1 %3389  ;;  %v3415_v39 = vsub.f32 %v8745_v38, %v3388_v17  ;;  %6753 = vpow2.f32 %v3439_v41 }
 0xd57   : > { %v8787_v62 = vpop.eup %6747  ;;  %v3416_v35 = vsub.f32 %v8750_v47, %v3390_v24 }
 0xd58   : > { %v8789_v9 = vpop.eup %6749  ;;  %3461 = vadd.xlane.f32.xlu0 %v8787_v62  ;;  %v3435_v43 = vmul.f32 1.442695, %v3415_v39 }
 0xd59   : > { %3459 = vadd.xlane.f32.xlu1 %v8789_v9  ;;  %v3400_v21 = vpop.xlane.xlu0 %3399  ;;  %v3437_v56 = vmul.f32 1.442695, %v3416_v35 }
 0xd5a   : > { %v3402_v58 = vpop.xlane.xlu1 %3401  ;;  %v3421_v40 = vsub.f32 %v8753_v1, %v3400_v21  ;;  %6755 = vpow2.f32 %v3435_v43 }
 0xd5b   : > { %6757 = vpow2.f32 %v3437_v56  ;;  %v3422_v16 = vsub.f32 %v8758_v25, %v3402_v58 }
 0xd5c   : > { %v8793_v12 = vpop.eup %6751  ;;  %v3447_v13 = vmul.f32 1.442695, %v3421_v40  ;;  %6759 = vpow2.f32 %v3441_v18 }
 0xd5d   : > { %3465 = vadd.xlane.f32.xlu1 %v8793_v12  ;;  %v3396_v45 = vpop.xlane.xlu0 %3395  ;;  %v3449_v40 = vmul.f32 1.442695, %v3422_v16 }
 0xd5e   : > { %v3398_v50 = vpop.xlane.xlu1 %3397  ;;  %v3419_v38 = vsub.f32 %v8756_v33, %v3396_v45  ;;  %6761 = vpow2.f32 %v3447_v13 }
 0xd60   : > { %v3443_v34 = vmul.f32 1.442695, %v3419_v38  ;;  %v8808_v24 = vpop.eup %6753 }
 0xd61   : > { %v3408_v4 = vpop.xlane.xlu0 %3407 }
 0xd62   : > { %v3425_v2 = vsub.f32 %v8765_v27, %v3408_v4  ;;  %v8810_v1 = vpop.permute.xlu1 %3740  ;;  %v3420_v27 = vsub.f32 %v8761_v61, %v3398_v50 }
 0xd64   : > { %v3455_v47 = vmul.f32 1.442695, %v3425_v2  ;;  %v8814_v18 = vpop.eup %6755  ;;  %v3445_v21 = vmul.f32 1.442695, %v3420_v27 }
 0xd65   : > { %v3404_v17 = vpop.xlane.xlu0 %3403 }
 0xd66   : > { %v3423_v55 = vsub.f32 %v8768_v42, %v3404_v17  ;;  %6763 = vpow2.f32 %v3455_v47  ;;  %v8816_v42 = vpop.eup %6757 }
 0xd67   : > { %6765 = vpow2.f32 %v3443_v34  ;;  %v8821_v41 = vpop.eup %6759 }
 0xd68   : > { %v3451_v56 = vmul.f32 1.442695, %v3423_v55  ;;  %v8823_v50 = vpop.eup %6761 }
 0xd69   : > { %v3739_v13 = vpop.permute.xlu0 %3738 }
 0xd6a   : > { %6767 = vpow2.f32 %v3451_v56 }
 0xd6b   : > { %6769 = vpow2.f32 %v3449_v40 }
 0xd6e   : > { %3744 = vrot.lane.b32.xlu1 %v7343_v49, %s9990_s16  ;;  %3742 = vrot.lane.b32.xlu0 %v7325_v36, %s9990_s16 }
 0xd70   : > { %v8828_v35 = vpop.eup %6763 }
 0xd71   : > { %v8830_v58 = vpop.eup %6765 }
 0xd74   : > { %v8834_v4 = vpop.eup %6767 }
 0xd75   : > { %v8836_v7 = vpop.eup %6769 }
 0xd8d   : > { %3471 = vadd.xlane.f32.xlu0 %v8808_v24 }
 0xd90   : > { %v3410_v33 = vpop.xlane.xlu1 %3409 }
 0xd91   : > { %v3426_v25 = vsub.f32 %v8770_v11, %v3410_v33  ;;  %3467 = vadd.xlane.f32.xlu0 %v8814_v18 }
 0xd92   : > { %3469 = vadd.xlane.f32.xlu1 %v8816_v42 }
 0xd93   : > { %v3457_v45 = vmul.f32 1.442695, %v3426_v25 }
 0xd94   : > { %v3406_v39 = vpop.xlane.xlu1 %3405 }
 0xd95   : > { %6771 = vpow2.f32 %v3457_v45  ;;  %v3424_v61 = vsub.f32 %v8772_v26, %v3406_v39  ;;  %3473 = vadd.xlane.f32.xlu0 %v8821_v41 }
 0xd96   : > { %3479 = vadd.xlane.f32.xlu1 %v8823_v50  ;;  %6773 = vpow2.f32 %v3445_v21 }
 0xd97   : > { %v3453_v11 = vmul.f32 1.442695, %v3424_v61 }
 0xd99   : > { %3487 = vadd.xlane.f32.xlu0 %v8828_v35  ;;  %6775 = vpow2.f32 %v3453_v11 }
 0xd9a   : > { %3475 = vadd.xlane.f32.xlu1 %v8830_v58 }
 0xd9d   : > { %3483 = vadd.xlane.f32.xlu0 %v8834_v4 }
 0xd9e   : > { %3481 = vadd.xlane.f32.xlu1 %v8836_v7 }
 0xd9f   : > { %v8840_v26 = vpop.eup %6771 }
 0xda0   : > { %v8842_v43 = vpop.eup %6773 }
 0xda1   : > { %3489 = vadd.xlane.f32.xlu0 %v8840_v26 }
 0xda2   : > { %3477 = vadd.xlane.f32.xlu1 %v8842_v43 }
 0xda3   : > { %v8846_v2 = vpop.eup %6775 }
 0xda6   : > { %3485 = vadd.xlane.f32.xlu1 %v8846_v2 }
 0xdb7   : > { %3746 = vrot.lane.b32.xlu0 %v7357_v60, %s9990_s16  ;;  %3748 = vrot.lane.b32.xlu1 %v7366_v5, %s9990_s16 }
 0xdbb   : > { %3718 = vrot.lane.b32.xlu0 %v7262_v52, %s9990_s16  ;;  %3720 = vrot.lane.b32.xlu1 %v7276_v59, %s9990_s16 }
 0xdbf   : > { %3722 = vrot.lane.b32.xlu0 %v7286_v6, %s9990_s16  ;;  %3724 = vrot.lane.b32.xlu1 %v10026_v51, %s9990_s16 }
 0xdc3   : > { %3726 = vrot.lane.b32.xlu0 %v7321_v32, %s9990_s16  ;;  %3728 = vrot.lane.b32.xlu1 %v10028_v54, %s9990_s16 }
 0xdc7   : > { %3730 = vrot.lane.b32.xlu0 %v7355_v57, %s9990_s16  ;;  %3732 = vrot.lane.b32.xlu1 %v10030_v37, %s9990_s16 }
 0xdcb   : > { %4064 = vrot.lane.b32.xlu0 %v10025_v48, %s9990_s16  ;;  %4066 = vrot.lane.b32.xlu1 %v10032_v44, %s9990_s16 }
 0xdcf   : > { %4068 = vrot.lane.b32.xlu0 %v10027_v19, %s9990_s16  ;;  %4070 = vrot.lane.b32.xlu1 %v10034_v28, %s9990_s16 }
 0xdd3   : > { %4072 = vrot.lane.b32.xlu0 %v10080_v53, %s9990_s16  ;;  %4074 = vrot.lane.b32.xlu1 %v10081_v14, %s9990_s16 }
 0xdd7   : > { %4076 = vrot.lane.b32.xlu0 %v10082_v46, %s9990_s16  ;;  %4078 = vrot.lane.b32.xlu1 %v10083_v22, %s9990_s16 }
 0xddb   : > { %4250 = vrot.lane.b32.xlu0 %v10084_v63, %s9992_s17  ;;  %4252 = vrot.lane.b32.xlu1 %v10085_v31, %s9992_s17 }
 0xde2   : > { %v3464_v38 = vpop.xlane.xlu1 %3463 }
 0xde3   : > { %6777 = vrcp.f32 %v3464_v38 }
 0xde5   : > { %v3462_v17 = vpop.xlane.xlu0 %3461 }
 0xde6   : > { %6779 = vrcp.f32 %v3462_v17  ;;  %v3460_v47 = vpop.xlane.xlu1 %3459 }
 0xde7   : > { %6781 = vrcp.f32 %v3460_v47 }
 0xdea   : > { %v3466_v55 = vpop.xlane.xlu1 %3465 }
 0xdeb   : > { %6783 = vrcp.f32 %v3466_v55 }
 0xded   : > { %v6778_v16 = vpop.eup %6777 }
 0xdee   : > { %v3496_v34 = vmul.f32 %v6778_v16, %v8784_v30  ;;  %v3775_v30 = vsel %vm687_vm0, %v8692_v0, 0  ;;  %v3743_v0 = vpop.permute.xlu0 %3742 }
 0xdef   : > { %v3787_v39 = vsel %vm687_vm0, %v3743_v0, 0 }
 0xdf0   : > { %v6780_v56 = vpop.eup %6779  ;;  %5337 = vst [vmem:[%s7541_s12 + $0x290] sm:$0xff] %v3496_v34 }
 0xdf1   : > { %v6782_v63 = vpop.eup %6781  ;;  %v3494_v31 = vmul.f32 %v6780_v56, %v8787_v62  ;;  %v3778_v62 = vsel %vm687_vm0, %v8782_v8, 0 }
 0xdf2   : > { %v3492_v40 = vmul.f32 %v6782_v63, %v8789_v9  ;;  %v3781_v9 = vsel %vm687_vm0, %v3739_v13, 0 }
 0xdf3   : > { %5336 = vst [vmem:[%s7541_s12 + $0x288] sm:$0xff] %v3494_v31 }
 0xdf4   : > { %5335 = vst [vmem:[%s7541_s12 + $0x280] sm:$0xff] %v3492_v40  ;;  %v3540_v27 = vpack.c.bf16 %v3494_v31, %v3492_v40 }
 0xdf5   : > { %v6784_v33 = vpop.eup %6783 }
 0xdf6   : > { %v3498_v25 = vmul.f32 %v6784_v33, %v8793_v12  ;;  %6102 = vmatprep.mubr.bf16.mxu0 %v3540_v27  ;;  %v3784_v12 = vsel %vm687_vm0, %v8810_v1, 0 }
 0xdf8   : > { %5338 = vst [vmem:[%s7541_s12 + $0x298] sm:$0xff] %v3498_v25  ;;  %v3541_v21 = vpack.c.bf16 %v3498_v25, %v3496_v34 }
 0xdfa   : > { %6103 = vmatmul.mubr.bf16.vlgmr.msra.gmra.mrb[96].mxu0 %v3541_v21 }
 0xdfb   : > { %6119 = vmatpush3.bf16.xpose.msra.mxu0 %v3775_v30 }
 0xdfc   : > { %6295 = vmatprep.subr.msk.bf16.mxu0 %vm687_vm0, %v8782_v8  ;;  %v3745_v8 = vpop.permute.xlu1 %3744 }
 0xe03   : > { %6121 = vmatpush3.bf16.xpose.msra.mxu0 %v3778_v62 }
 0xe04   : > { %6296 = vmatprep.subr.msk.bf16.mxu0 %vm687_vm0, %v3739_v13 }
 0xe0b   : > { %6123 = vmatpush3.bf16.xpose.msra.mxu0 %v3781_v9 }
 0xe0c   : > { %6297 = vmatprep.subr.msk.bf16.mxu0 %vm687_vm0, %v8810_v1  ;;  %v3790_v1 = vsel %vm687_vm0, %v3745_v8, 0 }
 0xe13   : > { %6125 = vmatpush3.bf16.xpose.msra.mxu0 %v3784_v12 }
 0xe14   : > { %6298 = vmatprep.subr.msk.bf16.mxu0 %vm687_vm0, %v3743_v0 }
 0xe1a   : > { %v3472_v45 = vpop.xlane.xlu0 %3471 }
 0xe1b   : > { %6785 = vrcp.f32 %v3472_v45  ;;  %6127 = vmatpush3.bf16.xpose.msra.mxu0 %v3787_v39 }
 0xe1c   : > { %6299 = vmatprep.subr.msk.bf16.mxu0 %vm687_vm0, %v3745_v8 }
 0xe1e   : > { %v3468_v61 = vpop.xlane.xlu0 %3467 }
 0xe1f   : > { %6787 = vrcp.f32 %v3468_v61  ;;  %v3470_v11 = vpop.xlane.xlu1 %3469 }
 0xe20   : > { %6789 = vrcp.f32 %v3470_v11 }
 0xe22   : > { %v3474_v13 = vpop.xlane.xlu0 %3473 }
 0xe23   : > { %6791 = vrcp.f32 %v3474_v13  ;;  %6129 = vmatpush3.bf16.xpose.msra.mxu0 %v3790_v1  ;;  %v3480_v38 = vpop.xlane.xlu1 %3479 }
 0xe24   : > { %6793 = vrcp.f32 %v3480_v38 }
 0xe25   : > { %v6786_v17 = vpop.eup %6785 }
 0xe26   : > { %v3488_v47 = vpop.xlane.xlu0 %3487  ;;  %v3504_v55 = vmul.f32 %v6786_v17, %v8808_v24 }
 0xe27   : > { %6795 = vrcp.f32 %v3488_v47  ;;  %v3476_v16 = vpop.xlane.xlu1 %3475 }
 0xe28   : > { %6797 = vrcp.f32 %v3476_v16  ;;  %5341 = vst [vmem:[%s7541_s12 + $0x2b0] sm:$0xff] %v3504_v55 }
 0xe29   : > { %v6788_v34 = vpop.eup %6787 }
 0xe2a   : > { %v6790_v56 = vpop.eup %6789  ;;  %v3484_v63 = vpop.xlane.xlu0 %3483  ;;  %v3500_v31 = vmul.f32 %v6788_v34, %v8814_v18 }
 0xe2b   : > { %6799 = vrcp.f32 %v3484_v63  ;;  %v3482_v40 = vpop.xlane.xlu1 %3481  ;;  %v3502_v27 = vmul.f32 %v6790_v56, %v8816_v42 }
 0xe2c   : > { %6801 = vrcp.f32 %v3482_v40  ;;  %5339 = vst [vmem:[%s7541_s12 + $0x2a0] sm:$0xff] %v3500_v31 }
 0xe2d   : > { %v6792_v33 = vpop.eup %6791  ;;  %5340 = vst [vmem:[%s7541_s12 + $0x2a8] sm:$0xff] %v3502_v27  ;;  %v3542_v24 = vpack.c.bf16 %v3502_v27, %v3500_v31 }
 0xe2e   : > { %v6794_v25 = vpop.eup %6793  ;;  %v3490_v21 = vpop.xlane.xlu0 %3489  ;;  %v3506_v30 = vmul.f32 %v6792_v33, %v8821_v41 }
 0xe2f   : > { %6803 = vrcp.f32 %v3490_v21  ;;  %6106 = vmatprep.mubr.bf16.mxu0 %v3542_v24  ;;  %v3478_v62 = vpop.xlane.xlu1 %3477  ;;  %v3512_v18 = vmul.f32 %v6794_v25, %v8823_v50 }
 0xe30   : > { %6805 = vrcp.f32 %v3478_v62  ;;  %5342 = vst [vmem:[%s7541_s12 + $0x2b8] sm:$0xff] %v3506_v30  ;;  %v3543_v42 = vpack.c.bf16 %v3506_v30, %v3504_v55 }
 0xe31   : > { %v6796_v9 = vpop.eup %6795  ;;  %5345 = vst [vmem:[%s7541_s12 + $0x2d0] sm:$0xff] %v3512_v18 }
 0xe32   : > { %v6798_v12 = vpop.eup %6797  ;;  %v3747_v0 = vpop.permute.xlu0 %3746  ;;  %6107 = vmatmul.mubr.bf16.gmra.mrb[100].mxu0 %v3543_v42  ;;  %v3520_v45 = vmul.f32 %v6796_v9, %v8828_v35 }
 0xe33   : > { %6300 = vmatprep.subr.msk.bf16.mxu0 %vm687_vm0, %v3747_v0  ;;  %v3486_v41 = vpop.xlane.xlu1 %3485  ;;  %v3793_v39 = vsel %vm687_vm0, %v3747_v0, 0  ;;  %v3508_v50 = vmul.f32 %v6798_v12, %v8830_v58 }
 0xe34   : > { %6807 = vrcp.f32 %v3486_v41  ;;  %6131 = vmatpush3.bf16.xpose.msra.mxu0 %v3793_v39  ;;  %5349 = vst [vmem:[%s7541_s12 + $0x2f0] sm:$0xff] %v3520_v45 }
 0xe35   : > { %v6800_v8 = vpop.eup %6799  ;;  %5343 = vst [vmem:[%s7541_s12 + $0x2c0] sm:$0xff] %v3508_v50 }
 0xe36   : > { %v6802_v61 = vpop.eup %6801  ;;  %v3719_v11 = vpop.permute.xlu0 %3718  ;;  %v3516_v35 = vmul.f32 %v6800_v8, %v8834_v4 }
 0xe37   : > { %v3749_v13 = vpop.permute.xlu1 %3748  ;;  %v3514_v1 = vmul.f32 %v6802_v61, %v8836_v7 }
 0xe38   : > { %6301 = vmatprep.subr.msk.bf16.mxu0 %vm687_vm0, %v3749_v13  ;;  %5347 = vst [vmem:[%s7541_s12 + $0x2e0] sm:$0xff] %v3516_v35  ;;  %v3796_v16 = vsel %vm687_vm0, %v3749_v13, 0 }
 0xe39   : > { %v6804_v38 = vpop.eup %6803  ;;  %5346 = vst [vmem:[%s7541_s12 + $0x2d8] sm:$0xff] %v3514_v1  ;;  %v3545_v63 = vpack.c.bf16 %v3514_v1, %v3512_v18 }
 0xe3a   : > { %v6806_v58 = vpop.eup %6805  ;;  %v3723_v17 = vpop.permute.xlu0 %3722  ;;  %v3522_v47 = vmul.f32 %v6804_v38, %v8840_v26 }
 0xe3b   : > { %v3721_v55 = vpop.permute.xlu1 %3720  ;;  %v3510_v34 = vmul.f32 %v6806_v58, %v8842_v43 }
 0xe3c   : > { %6133 = vmatpush3.bf16.xpose.msra.mxu0 %v3796_v16  ;;  %5350 = vst [vmem:[%s7541_s12 + $0x2f8] sm:$0xff] %v3522_v47  ;;  %v3547_v25 = vpack.c.bf16 %v3522_v47, %v3520_v45 }
 0xe3d   : > { %5344 = vst [vmem:[%s7541_s12 + $0x2c8] sm:$0xff] %v3510_v34  ;;  %v3544_v4 = vpack.c.bf16 %v3510_v34, %v3508_v50 }
 0xe3e   : > { %v6808_v7 = vpop.eup %6807  ;;  %v3727_v56 = vpop.permute.xlu0 %3726 }
 0xe3f   : > { %6110 = vmatprep.mubr.bf16.mxu0 %v3544_v4  ;;  %v3725_v31 = vpop.permute.xlu1 %3724  ;;  %v3518_v40 = vmul.f32 %v6808_v7, %v8846_v2 }
 0xe40   : > { %6111 = vmatmul.mubr.bf16.gmra.mrb[104].mxu0 %v3545_v63 }
 0xe41   : > { %5348 = vst [vmem:[%s7541_s12 + $0x2e8] sm:$0xff] %v3518_v40  ;;  %v3546_v27 = vpack.c.bf16 %v3518_v40, %v3516_v35 }
 0xe42   : > { %v3731_v26 = vpop.permute.xlu0 %3730 }
 0xe43   : > { %6114 = vmatprep.mubr.bf16.mxu0 %v3546_v27  ;;  %v3729_v33 = vpop.permute.xlu1 %3728 }
 0xe46   : > { %v4065_v24 = vpop.permute.xlu0 %4064 }
 0xe47   : > { %6150 = vmatprep.subr.bf16.mxu1 %v4065_v24  ;;  %v3733_v43 = vpop.permute.xlu1 %3732 }
 0xe48   : > { %6115 = vmatmul.mubr.bf16.gmra.mrb[108].mxu0 %v3547_v25  ;;  %6151 = vmatpush3.bf16.msra.mxu1 %v4065_v24 }
 0xe49   : > { %6134 = vmatprep.mubr.msk.bf16.mxu0 %vm687_vm0, %v3719_v11 }
 0xe4a   : > { %v4069_v30 = vpop.permute.xlu0 %4068 }
 0xe4b   : > { %v4067_v21 = vpop.permute.xlu1 %4066 }
 0xe4c   : > { %6152 = vmatprep.subr.bf16.mxu1 %v4067_v21 }
 0xe4d   : > { %6153 = vmatpush3.bf16.msra.mxu1 %v4067_v21 }
 0xe4e   : > { %6154 = vmatprep.subr.bf16.mxu1 %v4069_v30  ;;  %v4073_v62 = vpop.permute.xlu0 %4072 }
 0xe4f   : > { %v4071_v2 = vpop.permute.xlu1 %4070 }
 0xe50   : > { %6135 = vmatmul.mubr.msk.bf16.vlgmr.msra.gmra.mrb[112].mxu0 %vm687_vm0, %v3721_v55 }
 0xe51   : > { %6138 = vmatprep.mubr.msk.bf16.mxu0 %vm687_vm0, %v3723_v17  ;;  %6155 = vmatpush3.bf16.msra.mxu1 %v4069_v30 }
 0xe52   : > { %6156 = vmatprep.subr.bf16.mxu1 %v4071_v2  ;;  %v4077_v42 = vpop.permute.xlu0 %4076 }
 0xe53   : > { %v4075_v18 = vpop.permute.xlu1 %4074 }
 0xe55   : > { %6157 = vmatpush3.bf16.msra.mxu1 %v4071_v2 }
 0xe56   : > { %6158 = vmatprep.subr.bf16.mxu1 %v4073_v62  ;;  %v8948_v12 = vpop.permute.xlu0 %4250 }
 0xe57   : > { %v4079_v9 = vpop.permute.xlu1 %4078 }
 0xe58   : > { %6139 = vmatmul.mubr.msk.bf16.gmra.mrb[116].mxu0 %vm687_vm0, %v3725_v31 }
 0xe59   : > { %6142 = vmatprep.mubr.msk.bf16.mxu0 %vm687_vm0, %v3727_v56  ;;  %6159 = vmatpush3.bf16.msra.mxu1 %v4073_v62 }
 0xe5a   : > { %6160 = vmatprep.subr.bf16.mxu1 %v4075_v18 }
 0xe5b   : > { %v9038_v34 = vpop.permute.xlu1 %4252 }
 0xe5d   : > { %6161 = vmatpush3.bf16.msra.mxu1 %v4075_v18 }
 0xe5e   : > { %6162 = vmatprep.subr.bf16.mxu1 %v4077_v42 }
 0xe60   : > { %6143 = vmatmul.mubr.msk.bf16.gmra.mrb[120].mxu0 %vm687_vm0, %v3729_v33 }
 0xe61   : > { %6146 = vmatprep.mubr.msk.bf16.mxu0 %vm687_vm0, %v3731_v26  ;;  %6163 = vmatpush3.bf16.msra.mxu1 %v4077_v42 }
 0xe62   : > { %6164 = vmatprep.subr.bf16.mxu1 %v4079_v9 }
 0xe65   : > { %6165 = vmatpush3.bf16.msra.mxu1 %v4079_v9 }
 0xe66   : > { %6302 = vmatprep.subr.msk.bf16.mxu1 %vm687_vm0, %v8948_v12 }
 0xe68   : > { %6147 = vmatmul.mubr.msk.bf16.gmra.mrb[124].mxu0 %vm687_vm0, %v3733_v43 }
 0xecd   : > { %v8953_v0 = vpop.f32.mrb[96].mxu0 }
 0xece   : > { %v8955_v45 = vpop.f32.mrb[97].mxu0 }
 0xecf   : > { %v8957_v41 = vpop.f32.mrb[98].mxu0 }
 0xed0   : > { %v8961_v50 = vpop.f32.mrb[99].mxu0 }
 0xf05   : > { %v8965_v61 = vpop.f32.mrb[100].mxu0 }
 0xf06   : > { %10116 = vst [vmem:[#allocation70_spill] sm:$0xff] %v8965_v61  ;;  %v8967_v11 = vpop.f32.mrb[101].mxu0 }
 0xf07   : > { %v8969_v35 = vpop.f32.mrb[102].mxu0 }
 0xf08   : > { %10117 = vst [vmem:[#allocation71_spill] sm:$0xff] %v8969_v35  ;;  %v8973_v1 = vpop.f32.mrb[103].mxu0 }
 0xf13   : > { %v8977_v58 = vpop.f32.mrb[104].mxu0 }
 0xf14   : > { %10118 = vst [vmem:[#allocation72_spill] sm:$0xff] %v8977_v58  ;;  %v8979_v17 = vpop.f32.mrb[105].mxu0 }
 0xf15   : > { %10119 = vst [vmem:[#allocation73_spill] sm:$0xff] %v8979_v17  ;;  %v8981_v47 = vpop.f32.mrb[106].mxu0 }
 0xf16   : > { %10120 = vst [vmem:[#allocation74_spill] sm:$0xff] %v8981_v47  ;;  %v8985_v16 = vpop.f32.mrb[107].mxu0 }
 0xf17   : > { %10121 = vst [vmem:[#allocation75_spill] sm:$0xff] %v8985_v16 }
 0xf1b   : > { %v8989_v4 = vpop.f32.mrb[108].mxu0 }
 0xf1c   : > { %10122 = vst [vmem:[#allocation76_spill] sm:$0xff] %v8989_v4  ;;  %v8991_v7 = vpop.f32.mrb[109].mxu0 }
 0xf1d   : > { %10123 = vst [vmem:[#allocation77_spill] sm:$0xff] %v8991_v7  ;;  %v8993_v56 = vpop.f32.mrb[110].mxu0 }
 0xf1e   : > { %10124 = vst [vmem:[#allocation78_spill] sm:$0xff] %v8993_v56  ;;  %v8997_v31 = vpop.f32.mrb[111].mxu0 }
 0xf1f   : > { %10125 = vst [vmem:[#allocation79_spill] sm:$0xff] %v8997_v31 }
 0xf23   : > { %v6136_v27 = vpop.f32.mrb[112].mxu0 }
 0xf24   : > { %3899 = vmax.xlane.f32.xlu0 %v6136_v27  ;;  %v3832_v26 = vpop.f32.mrb[113].mxu0 }
 0xf25   : > { %v6137_v33 = vpop.f32.mrb[114].mxu0 }
 0xf26   : > { %v3835_v24 = vpop.f32.mrb[115].mxu0 }
 0xf27   : > { %3897 = vmax.xlane.f32.xlu1 %v3835_v24 }
 0xf28   : > { %3895 = vmax.xlane.f32.xlu0 %v3832_v26 }
 0xf2b   : > { %v6140_v25 = vpop.f32.mrb[116].mxu0 }
 0xf2c   : > { %3901 = vmax.xlane.f32.xlu0 %v6137_v33  ;;  %v9001_v43 = vpop.f32.mrb[117].mxu0 }
 0xf2d   : > { %v9003_v21 = vpop.f32.mrb[118].mxu0 }
 0xf2e   : > { %3909 = vmax.xlane.f32.xlu1 %v9003_v21  ;;  %v9006_v30 = vpop.f32.mrb[119].mxu0 }
 0xf30   : > { %3907 = vmax.xlane.f32.xlu0 %v6140_v25 }
 0xf32   : > { %3905 = vmax.xlane.f32.xlu1 %v9006_v30 }
 0xf33   : > { %v9009_v2 = vpop.f32.mrb[120].mxu0 }
 0xf34   : > { %3903 = vmax.xlane.f32.xlu0 %v9001_v43  ;;  %v9012_v62 = vpop.f32.mrb[121].mxu0 }
 0xf35   : > { %v9014_v18 = vpop.f32.mrb[122].mxu0 }
 0xf36   : > { %3917 = vmax.xlane.f32.xlu1 %v9014_v18  ;;  %v9017_v42 = vpop.f32.mrb[123].mxu0 }
 0xf38   : > { %3915 = vmax.xlane.f32.xlu0 %v9009_v2 }
 0xf3a   : > { %3913 = vmax.xlane.f32.xlu1 %v9017_v42 }
 0xf3b   : > { %v9021_v9 = vpop.f32.mrb[124].mxu0 }
 0xf3c   : > { %3911 = vmax.xlane.f32.xlu0 %v9012_v62  ;;  %v9024_v63 = vpop.f32.mrb[125].mxu0 }
 0xf3d   : > { %v9026_v40 = vpop.f32.mrb[126].mxu0 }
 0xf3e   : > { %v9028_v55 = vpop.f32.mrb[127].mxu0 }
 0xf40   : > { %3923 = vmax.xlane.f32.xlu0 %v9021_v9 }
 0xf44   : > { %3919 = vmax.xlane.f32.xlu0 %v9024_v63 }
 0xf4b   : > { %4256 = vrot.lane.b32.xlu1 %v7307_v23, %s9992_s17 }
 0xf5a   : > { %4254 = vrot.lane.b32.xlu0 %v7290_v10, %s9992_s17 }
 0xf6f   : > { %3925 = vmax.xlane.f32.xlu1 %v9026_v40 }
 0xf73   : > { %3921 = vmax.xlane.f32.xlu1 %v9028_v55 }
 0xfb1   : > { %v3900_v13 = vpop.xlane.xlu0 %3899 }
 0xfb2   : > { %v3929_v38 = vsub.f32 %v6136_v27, %v3900_v13 }
 0xfb4   : > { %v3947_v39 = vmul.f32 1.442695, %v3929_v38  ;;  %v3898_v8 = vpop.xlane.xlu1 %3897 }
 0xfb5   : > { %v3928_v4 = vsub.f32 %v3835_v24, %v3898_v8  ;;  %v3896_v56 = vpop.xlane.xlu0 %3895 }
 0xfb6   : > { %6809 = vpow2.f32 %v3947_v39  ;;  %v3927_v7 = vsub.f32 %v3832_v26, %v3896_v56 }
 0xfb7   : > { %v3945_v31 = vmul.f32 1.442695, %v3928_v4 }
 0xfb8   : > { %v3943_v58 = vmul.f32 1.442695, %v3927_v7 }
 0xfb9   : > { %6811 = vpow2.f32 %v3945_v31  ;;  %v3902_v23 = vpop.xlane.xlu0 %3901 }
 0xfba   : > { %6813 = vpow2.f32 %v3943_v58  ;;  %v3930_v10 = vsub.f32 %v6137_v33, %v3902_v23 }
 0xfbb   : > { %v3910_v58 = vpop.xlane.xlu1 %3909 }
 0xfbc   : > { %v3949_v47 = vmul.f32 1.442695, %v3930_v10  ;;  %v3934_v23 = vsub.f32 %v9003_v21, %v3910_v58 }
 0xfbd   : > { %v3908_v8 = vpop.xlane.xlu0 %3907 }
 0xfbe   : > { %6815 = vpow2.f32 %v3949_v47  ;;  %v3933_v4 = vsub.f32 %v6140_v25, %v3908_v8  ;;  %v3957_v61 = vmul.f32 1.442695, %v3934_v23 }
 0xfbf   : > { %v3906_v7 = vpop.xlane.xlu1 %3905 }
 0xfc0   : > { %v9040_v17 = vpop.eup %6809  ;;  %v3955_v31 = vmul.f32 1.442695, %v3933_v4  ;;  %v3932_v26 = vsub.f32 %v9006_v30, %v3906_v7 }
 0xfc1   : > { %3979 = vadd.xlane.f32.xlu1 %v9040_v17  ;;  %v3904_v38 = vpop.xlane.xlu0 %3903 }
 0xfc2   : > { %v3931_v27 = vsub.f32 %v9001_v43, %v3904_v38  ;;  %6817 = vpow2.f32 %v3955_v31  ;;  %v3953_v10 = vmul.f32 1.442695, %v3932_v26 }
 0xfc3   : > { %v9043_v16 = vpop.eup %6811  ;;  %v3918_v33 = vpop.xlane.xlu1 %3917 }
 0xfc4   : > { %v9045_v13 = vpop.eup %6813  ;;  %3977 = vadd.xlane.f32.xlu0 %v9043_v16  ;;  %v3938_v21 = vsub.f32 %v9014_v18, %v3918_v33 }
 0xfc5   : > { %3975 = vadd.xlane.f32.xlu1 %v9045_v13  ;;  %v3916_v47 = vpop.xlane.xlu0 %3915 }
 0xfc7   : > { %v3914_v35 = vpop.xlane.xlu1 %3913 }
 0xfc8   : > { %v9049_v39 = vpop.eup %6815 }
 0xfc9   : > { %3981 = vadd.xlane.f32.xlu1 %v9049_v39  ;;  %v3912_v56 = vpop.xlane.xlu0 %3911 }
 0xfca   : > { %v3935_v43 = vsub.f32 %v9012_v62, %v3912_v56  ;;  %v3936_v62 = vsub.f32 %v9017_v42, %v3914_v35 }
 0xfcc   : > { %v3959_v58 = vmul.f32 1.442695, %v3935_v43  ;;  %v9064_v7 = vpop.eup %6817  ;;  %v3961_v31 = vmul.f32 1.442695, %v3936_v62 }
 0xfcd   : > { %v3924_v24 = vpop.xlane.xlu0 %3923 }
 0xfce   : > { %v3941_v25 = vsub.f32 %v9021_v9, %v3924_v24 }
 0xfd0   : > { %v3971_v30 = vmul.f32 1.442695, %v3941_v25 }
 0xfd1   : > { %v3920_v38 = vpop.xlane.xlu0 %3919 }
 0xfd2   : > { %v3939_v4 = vsub.f32 %v9024_v63, %v3920_v38 }
 0xfd4   : > { %v3967_v9 = vmul.f32 1.442695, %v3939_v4 }
 0xfda   : > { %4260 = vrot.lane.b32.xlu1 %v7343_v49, %s9992_s17  ;;  %4258 = vrot.lane.b32.xlu0 %v7325_v36, %s9992_s17  ;;  %v3951_v49 = vmul.f32 1.442695, %v3931_v27  ;;  %v3937_v36 = vsub.f32 %v9009_v2, %v3916_v47  ;;  %v9066_v2 = vpop.permute.xlu1 %4256  ;;  %v3965_v47 = vmul.f32 1.442695, %v3938_v21 }
 0xfdc   : > { %6819 = vpow2.f32 %v3951_v49  ;;  %v3963_v8 = vmul.f32 1.442695, %v3937_v36 }
 0xfdd   : > { %6821 = vpow2.f32 %v3953_v10 }
 0xfde   : > { %6823 = vpow2.f32 %v3957_v61 }
 0xfdf   : > { %6825 = vpow2.f32 %v3963_v8 }
 0xfe0   : > { %6827 = vpow2.f32 %v3971_v30 }
 0xfe1   : > { %6829 = vpow2.f32 %v3959_v58 }
 0xfe2   : > { %6831 = vpow2.f32 %v3967_v9 }
 0xfe3   : > { %6833 = vpow2.f32 %v3965_v47 }
 0xfe6   : > { %v9070_v61 = vpop.eup %6819 }
 0xfe7   : > { %v9072_v63 = vpop.eup %6821 }
 0xfe8   : > { %v9077_v26 = vpop.eup %6823 }
 0xfe9   : > { %v9079_v35 = vpop.eup %6825 }
 0xfea   : > { %v9084_v24 = vpop.eup %6827 }
 0xfeb   : > { %v9086_v23 = vpop.eup %6829 }
 0xfec   : > { %v9090_v49 = vpop.eup %6831 }
 0xfed   : > { %v9092_v10 = vpop.eup %6833 }
 0xff9   : > { %3987 = vadd.xlane.f32.xlu0 %v9064_v7 }
 0xffc   : > { %v3926_v56 = vpop.xlane.xlu1 %3925 }
 0xffd   : > { %v3942_v18 = vsub.f32 %v9026_v40, %v3926_v56  ;;  %3983 = vadd.xlane.f32.xlu0 %v9070_v61 }
 0xffe   : > { %3985 = vadd.xlane.f32.xlu1 %v9072_v63 }
 0xfff   : > { %v3973_v27 = vmul.f32 1.442695, %v3942_v18 }
0x1000   : > { %v3922_v33 = vpop.xlane.xlu1 %3921 }
0x1001   : > { %6835 = vpow2.f32 %v3973_v27  ;;  %v3940_v42 = vsub.f32 %v9028_v55, %v3922_v33  ;;  %3989 = vadd.xlane.f32.xlu0 %v9077_v26 }
0x1002   : > { %3995 = vadd.xlane.f32.xlu1 %v9079_v35  ;;  %6837 = vpow2.f32 %v3961_v31 }
0x1003   : > { %v3969_v40 = vmul.f32 1.442695, %v3940_v42 }
0x1005   : > { %4003 = vadd.xlane.f32.xlu0 %v9084_v24  ;;  %6839 = vpow2.f32 %v3969_v40 }
0x1006   : > { %3991 = vadd.xlane.f32.xlu1 %v9086_v23 }
0x1009   : > { %3999 = vadd.xlane.f32.xlu0 %v9090_v49 }
0x100a   : > { %3997 = vadd.xlane.f32.xlu1 %v9092_v10 }
0x100b   : > { %v9096_v55 = vpop.eup %6835 }
0x100c   : > { %v9098_v36 = vpop.eup %6837 }
0x100d   : > { %4005 = vadd.xlane.f32.xlu0 %v9096_v55 }
0x100e   : > { %3993 = vadd.xlane.f32.xlu1 %v9098_v36 }
0x100f   : > { %v9102_v25 = vpop.eup %6839 }
0x1012   : > { %4001 = vadd.xlane.f32.xlu1 %v9102_v25 }
0x1023   : > { %4262 = vrot.lane.b32.xlu0 %v7357_v60, %s9992_s17  ;;  %4264 = vrot.lane.b32.xlu1 %v7366_v5, %s9992_s17 }
0x1027   : > { %4234 = vrot.lane.b32.xlu0 %v7262_v52, %s9992_s17  ;;  %4236 = vrot.lane.b32.xlu1 %v7276_v59, %s9992_s17  ;;  %v4255_v52 = vpop.permute.xlu0 %4254 }
0x102b   : > { %4238 = vrot.lane.b32.xlu0 %v7286_v6, %s9992_s17  ;;  %4240 = vrot.lane.b32.xlu1 %v10026_v51, %s9992_s17 }
0x102f   : > { %4242 = vrot.lane.b32.xlu0 %v7321_v32, %s9992_s17  ;;  %4244 = vrot.lane.b32.xlu1 %v10028_v54, %s9992_s17 }
0x1033   : > { %4246 = vrot.lane.b32.xlu0 %v7355_v57, %s9992_s17  ;;  %4248 = vrot.lane.b32.xlu1 %v10030_v37, %s9992_s17 }
0x1037   : > { %4580 = vrot.lane.b32.xlu0 %v10025_v48, %s9992_s17  ;;  %4582 = vrot.lane.b32.xlu1 %v10032_v44, %s9992_s17 }
0x103b   : > { %4584 = vrot.lane.b32.xlu0 %v10027_v19, %s9992_s17 }
0x103f   : > { %4586 = vrot.lane.b32.xlu0 %v10034_v28, %s9992_s17 }
0x104e   : > { %v3980_v59 = vpop.xlane.xlu1 %3979 }
0x104f   : > { %6841 = vrcp.f32 %v3980_v59 }
0x1051   : > { %v3978_v6 = vpop.xlane.xlu0 %3977 }
0x1052   : > { %6843 = vrcp.f32 %v3978_v6  ;;  %v3976_v32 = vpop.xlane.xlu1 %3975 }
0x1053   : > { %6845 = vrcp.f32 %v3976_v32 }
0x1056   : > { %v3982_v57 = vpop.xlane.xlu1 %3981 }
0x1057   : > { %6847 = vrcp.f32 %v3982_v57 }
0x1059   : > { %v6842_v60 = vpop.eup %6841 }
0x105a   : > { %v4012_v5 = vmul.f32 %v6842_v60, %v9040_v17  ;;  %v4291_v17 = vsel %vm687_vm0, %v8948_v12, 0  ;;  %v4259_v12 = vpop.permute.xlu0 %4258 }
0x105b   : > { %v4303_v38 = vsel %vm687_vm0, %v4259_v12, 0 }
0x105c   : > { %v6844_v48 = vpop.eup %6843  ;;  %5361 = vst [vmem:[%s7541_s12 + $0x310] sm:$0xff] %v4012_v5 }
0x105d   : > { %v6846_v51 = vpop.eup %6845  ;;  %v4010_v19 = vmul.f32 %v6844_v48, %v9043_v16  ;;  %v4294_v16 = vsel %vm687_vm0, %v9038_v34, 0 }
0x105e   : > { %v4008_v54 = vmul.f32 %v6846_v51, %v9045_v13  ;;  %v4297_v13 = vsel %vm687_vm0, %v4255_v52, 0 }
0x105f   : > { %5360 = vst [vmem:[%s7541_s12 + $0x308] sm:$0xff] %v4010_v19 }
0x1060   : > { %5359 = vst [vmem:[%s7541_s12 + $0x300] sm:$0xff] %v4008_v54  ;;  %v4056_v37 = vpack.c.bf16 %v4010_v19, %v4008_v54 }
0x1061   : > { %v6848_v44 = vpop.eup %6847 }
0x1062   : > { %v4014_v28 = vmul.f32 %v6848_v44, %v9049_v39  ;;  %6166 = vmatprep.mubr.bf16.mxu1 %v4056_v37  ;;  %v4300_v39 = vsel %vm687_vm0, %v9066_v2, 0 }
0x1064   : > { %5362 = vst [vmem:[%s7541_s12 + $0x318] sm:$0xff] %v4014_v28  ;;  %v4057_v8 = vpack.c.bf16 %v4014_v28, %v4012_v5 }
0x1066   : > { %6167 = vmatmul.mubr.bf16.vlgmr.msra.gmra.mrb[128].mxu1 %v4057_v8 }
0x1067   : > { %6183 = vmatpush3.bf16.xpose.msra.mxu1 %v4291_v17 }
0x1068   : > { %6303 = vmatprep.subr.msk.bf16.mxu1 %vm687_vm0, %v9038_v34  ;;  %v4261_v34 = vpop.permute.xlu1 %4260 }
0x1069   : > { %v4306_v58 = vsel %vm687_vm0, %v4261_v34, 0 }
0x106f   : > { %6185 = vmatpush3.bf16.xpose.msra.mxu1 %v4294_v16 }
0x1070   : > { %6304 = vmatprep.subr.msk.bf16.mxu1 %vm687_vm0, %v4255_v52 }
0x1077   : > { %6187 = vmatpush3.bf16.xpose.msra.mxu1 %v4297_v13 }
0x1078   : > { %6305 = vmatprep.subr.msk.bf16.mxu1 %vm687_vm0, %v9066_v2 }
0x107f   : > { %6189 = vmatpush3.bf16.xpose.msra.mxu1 %v4300_v39 }
0x1080   : > { %6306 = vmatprep.subr.msk.bf16.mxu1 %vm687_vm0, %v4259_v12 }
0x1086   : > { %v3988_v43 = vpop.xlane.xlu0 %3987 }
0x1087   : > { %6849 = vrcp.f32 %v3988_v43  ;;  %6191 = vmatpush3.bf16.xpose.msra.mxu1 %v4303_v38 }
0x1088   : > { %6307 = vmatprep.subr.msk.bf16.mxu1 %vm687_vm0, %v4261_v34 }
0x108a   : > { %v3984_v30 = vpop.xlane.xlu0 %3983 }
0x108b   : > { %6851 = vrcp.f32 %v3984_v30  ;;  %v3986_v4 = vpop.xlane.xlu1 %3985 }
0x108c   : > { %6853 = vrcp.f32 %v3986_v4 }
0x108e   : > { %v3990_v21 = vpop.xlane.xlu0 %3989 }
0x108f   : > { %6855 = vrcp.f32 %v3990_v21  ;;  %6193 = vmatpush3.bf16.xpose.msra.mxu1 %v4306_v58  ;;  %v3996_v2 = vpop.xlane.xlu1 %3995 }
0x1090   : > { %6857 = vrcp.f32 %v3996_v2 }
0x1091   : > { %v6850_v9 = vpop.eup %6849 }
0x1092   : > { %v4004_v47 = vpop.xlane.xlu0 %4003  ;;  %v4020_v62 = vmul.f32 %v6850_v9, %v9064_v7 }
0x1093   : > { %6859 = vrcp.f32 %v4004_v47  ;;  %v3992_v56 = vpop.xlane.xlu1 %3991 }
0x1094   : > { %6861 = vrcp.f32 %v3992_v56  ;;  %5365 = vst [vmem:[%s7541_s12 + $0x330] sm:$0xff] %v4020_v62 }
0x1095   : > { %v6852_v18 = vpop.eup %6851 }
0x1096   : > { %v6854_v31 = vpop.eup %6853  ;;  %v4000_v27 = vpop.xlane.xlu0 %3999  ;;  %v4016_v33 = vmul.f32 %v6852_v18, %v9070_v61 }
0x1097   : > { %6863 = vrcp.f32 %v4000_v27  ;;  %v3998_v42 = vpop.xlane.xlu1 %3997  ;;  %v4018_v40 = vmul.f32 %v6854_v31, %v9072_v63 }
0x1098   : > { %6865 = vrcp.f32 %v3998_v42  ;;  %5363 = vst [vmem:[%s7541_s12 + $0x320] sm:$0xff] %v4016_v33 }
0x1099   : > { %v6856_v52 = vpop.eup %6855  ;;  %5364 = vst [vmem:[%s7541_s12 + $0x328] sm:$0xff] %v4018_v40  ;;  %v4058_v7 = vpack.c.bf16 %v4018_v40, %v4016_v33 }
0x109a   : > { %v6858_v59 = vpop.eup %6857  ;;  %v4006_v6 = vpop.xlane.xlu0 %4005  ;;  %v4022_v32 = vmul.f32 %v6856_v52, %v9077_v26 }
0x109b   : > { %6867 = vrcp.f32 %v4006_v6  ;;  %6170 = vmatprep.mubr.bf16.mxu1 %v4058_v7  ;;  %v3994_v57 = vpop.xlane.xlu1 %3993  ;;  %v4028_v61 = vmul.f32 %v6858_v59, %v9079_v35 }
0x109c   : > { %6869 = vrcp.f32 %v3994_v57  ;;  %5366 = vst [vmem:[%s7541_s12 + $0x338] sm:$0xff] %v4022_v32  ;;  %v4059_v63 = vpack.c.bf16 %v4022_v32, %v4020_v62 }
0x109d   : > { %v6860_v60 = vpop.eup %6859  ;;  %5369 = vst [vmem:[%s7541_s12 + $0x350] sm:$0xff] %v4028_v61 }
0x109e   : > { %v6862_v5 = vpop.eup %6861  ;;  %v4263_v48 = vpop.permute.xlu0 %4262  ;;  %6171 = vmatmul.mubr.bf16.gmra.mrb[132].mxu1 %v4059_v63  ;;  %v4036_v51 = vmul.f32 %v6860_v60, %v9084_v24 }
0x109f   : > { %6308 = vmatprep.subr.msk.bf16.mxu1 %vm687_vm0, %v4263_v48  ;;  %v4002_v26 = vpop.xlane.xlu1 %4001  ;;  %v4309_v19 = vsel %vm687_vm0, %v4263_v48, 0  ;;  %v4024_v35 = vmul.f32 %v6862_v5, %v9086_v23 }
0x10a0   : > { %6871 = vrcp.f32 %v4002_v26  ;;  %6195 = vmatpush3.bf16.xpose.msra.mxu1 %v4309_v19  ;;  %5373 = vst [vmem:[%s7541_s12 + $0x370] sm:$0xff] %v4036_v51 }
0x10a1   : > { %v6864_v54 = vpop.eup %6863  ;;  %5367 = vst [vmem:[%s7541_s12 + $0x340] sm:$0xff] %v4024_v35 }
0x10a2   : > { %v6866_v37 = vpop.eup %6865  ;;  %v4235_v44 = vpop.permute.xlu0 %4234  ;;  %v4032_v24 = vmul.f32 %v6864_v54, %v9090_v49 }
0x10a3   : > { %v4265_v28 = vpop.permute.xlu1 %4264  ;;  %v4030_v8 = vmul.f32 %v6866_v37, %v9092_v10 }
0x10a4   : > { %6309 = vmatprep.subr.msk.bf16.mxu1 %vm687_vm0, %v4265_v28  ;;  %5371 = vst [vmem:[%s7541_s12 + $0x360] sm:$0xff] %v4032_v24  ;;  %v4312_v12 = vsel %vm687_vm0, %v4265_v28, 0 }
0x10a5   : > { %v6868_v17 = vpop.eup %6867  ;;  %5370 = vst [vmem:[%s7541_s12 + $0x358] sm:$0xff] %v4030_v8  ;;  %v4061_v34 = vpack.c.bf16 %v4030_v8, %v4028_v61 }
0x10a6   : > { %v6870_v23 = vpop.eup %6869  ;;  %v4239_v16 = vpop.permute.xlu0 %4238  ;;  %v4038_v13 = vmul.f32 %v6868_v17, %v9096_v55 }
0x10a7   : > { %v4237_v39 = vpop.permute.xlu1 %4236  ;;  %v4026_v43 = vmul.f32 %v6870_v23, %v9098_v36 }
0x10a8   : > { %6197 = vmatpush3.bf16.xpose.msra.mxu1 %v4312_v12  ;;  %5374 = vst [vmem:[%s7541_s12 + $0x378] sm:$0xff] %v4038_v13  ;;  %v4063_v9 = vpack.c.bf16 %v4038_v13, %v4036_v51 }
0x10a9   : > { %5368 = vst [vmem:[%s7541_s12 + $0x348] sm:$0xff] %v4026_v43  ;;  %v4060_v49 = vpack.c.bf16 %v4026_v43, %v4024_v35 }
0x10aa   : > { %v6872_v10 = vpop.eup %6871  ;;  %v4243_v38 = vpop.permute.xlu0 %4242 }
0x10ab   : > { %6174 = vmatprep.mubr.bf16.mxu1 %v4060_v49  ;;  %v4241_v30 = vpop.permute.xlu1 %4240  ;;  %v4034_v4 = vmul.f32 %v6872_v10, %v9102_v25 }
0x10ac   : > { %6175 = vmatmul.mubr.bf16.gmra.mrb[136].mxu1 %v4061_v34 }
0x10ad   : > { %5372 = vst [vmem:[%s7541_s12 + $0x368] sm:$0xff] %v4034_v4  ;;  %v4062_v21 = vpack.c.bf16 %v4034_v4, %v4032_v24 }
0x10ae   : > { %v4247_v55 = vpop.permute.xlu0 %4246 }
0x10af   : > { %6178 = vmatprep.mubr.bf16.mxu1 %v4062_v21  ;;  %v4245_v58 = vpop.permute.xlu1 %4244 }
0x10b2   : > { %v4581_v2 = vpop.permute.xlu0 %4580 }
0x10b3   : > { %6214 = vmatprep.subr.bf16.mxu0 %v4581_v2  ;;  %v4249_v36 = vpop.permute.xlu1 %4248 }
0x10b4   : > { %6179 = vmatmul.mubr.bf16.gmra.mrb[140].mxu1 %v4063_v9  ;;  %6215 = vmatpush3.bf16.msra.mxu0 %v4581_v2 }
0x10b5   : > { %6198 = vmatprep.mubr.msk.bf16.mxu1 %vm687_vm0, %v4235_v44 }
0x10b6   : > { %v4585_v47 = vpop.permute.xlu0 %4584 }
0x10b7   : > { %v4583_v62 = vpop.permute.xlu1 %4582 }
0x10b8   : > { %6216 = vmatprep.subr.bf16.mxu0 %v4583_v62 }
0x10b9   : > { %6217 = vmatpush3.bf16.msra.mxu0 %v4583_v62 }
0x10ba   : > { %6218 = vmatprep.subr.bf16.mxu0 %v4585_v47  ;;  %v4587_v25 = vpop.permute.xlu0 %4586 }
0x10bc   : > { %6199 = vmatmul.mubr.msk.bf16.vlgmr.msra.gmra.mrb[144].mxu1 %vm687_vm0, %v4237_v39 }
0x10bd   : > { %6202 = vmatprep.mubr.msk.bf16.mxu1 %vm687_vm0, %v4239_v16  ;;  %6219 = vmatpush3.bf16.msra.mxu0 %v4585_v47 }
0x10be   : > { %6220 = vmatprep.subr.bf16.mxu0 %v4587_v25 }
0x10c1   : > { %6221 = vmatpush3.bf16.msra.mxu0 %v4587_v25 }
0x10c4   : > { %6203 = vmatmul.mubr.msk.bf16.gmra.mrb[148].mxu1 %vm687_vm0, %v4241_v30 }
0x10c5   : > { %6206 = vmatprep.mubr.msk.bf16.mxu1 %vm687_vm0, %v4243_v38 }
0x10cc   : > { %6207 = vmatmul.mubr.msk.bf16.gmra.mrb[152].mxu1 %vm687_vm0, %v4245_v58 }
0x10cd   : > { %6210 = vmatprep.mubr.msk.bf16.mxu1 %vm687_vm0, %v4247_v55 }
0x10d4   : > { %6211 = vmatmul.mubr.msk.bf16.gmra.mrb[156].mxu1 %vm687_vm0, %v4249_v36 }
0x1139   : > { %v9193_v56 = vpop.f32.mrb[128].mxu1 }
0x113a   : > { %v9195_v18 = vpop.f32.mrb[129].mxu1 }
0x113b   : > { %v9197_v31 = vpop.f32.mrb[130].mxu1 }
0x113c   : > { %v4186_v27 = vpack.c.bf16 %v9197_v31, %v9193_v56  ;;  %v9201_v33 = vpop.f32.mrb[131].mxu1  ;;  %v10157_v31 = vld [vmem:[#allocation61_spill] sm:$0xff] }
0x113d   : > { %v4185_v42 = vpack.c.bf16 %v9201_v33, %v9195_v18  ;;  %v10147_v33 = vpack.c.bf16 %v8957_v41, %v8953_v0  ;;  %v10160_v41 = vpack.c.bf16 %v8973_v1, %v8967_v11  ;;  %v10168_v11 = vld [vmem:[#allocation60_spill] sm:$0xff]  ;;  %v10169_v1 = vld [vmem:[#allocation58_spill] sm:$0xff] }
0x1171   : > { %v9205_v40 = vpop.f32.mrb[132].mxu1 }
0x1172   : > { %v9207_v52 = vpop.f32.mrb[133].mxu1 }
0x1173   : > { %v9209_v7 = vpop.f32.mrb[134].mxu1 }
0x1174   : > { %v9213_v6 = vpop.f32.mrb[135].mxu1 }
0x117f   : > { %v9217_v57 = vpop.f32.mrb[136].mxu1 }
0x1180   : > { %v9219_v61 = vpop.f32.mrb[137].mxu1 }
0x1181   : > { %v9221_v63 = vpop.f32.mrb[138].mxu1 }
0x1182   : > { %v9225_v5 = vpop.f32.mrb[139].mxu1 }
0x1187   : > { %v9229_v51 = vpop.f32.mrb[140].mxu1 }
0x1188   : > { %v9231_v26 = vpop.f32.mrb[141].mxu1 }
0x1189   : > { %v9233_v19 = vpop.f32.mrb[142].mxu1 }
0x118a   : > { %v9237_v54 = vpop.f32.mrb[143].mxu1 }
0x118f   : > { %v6200_v44 = vpop.f32.mrb[144].mxu1 }
0x1190   : > { %4415 = vmax.xlane.f32.xlu0 %v6200_v44  ;;  %v4348_v24 = vpop.f32.mrb[145].mxu1 }
0x1191   : > { %v6201_v28 = vpop.f32.mrb[146].mxu1 }
0x1192   : > { %v4351_v8 = vpop.f32.mrb[147].mxu1 }
0x1193   : > { %4413 = vmax.xlane.f32.xlu1 %v4351_v8 }
0x1194   : > { %4411 = vmax.xlane.f32.xlu0 %v4348_v24 }
0x1197   : > { %v6204_v17 = vpop.f32.mrb[148].mxu1 }
0x1198   : > { %4417 = vmax.xlane.f32.xlu0 %v6201_v28  ;;  %v4364_v23 = vpop.f32.mrb[149].mxu1 }
0x1199   : > { %v6205_v16 = vpop.f32.mrb[150].mxu1 }
0x119a   : > { %4425 = vmax.xlane.f32.xlu1 %v6205_v16  ;;  %v4367_v13 = vpop.f32.mrb[151].mxu1 }
0x119c   : > { %4423 = vmax.xlane.f32.xlu0 %v6204_v17 }
0x119e   : > { %4421 = vmax.xlane.f32.xlu1 %v4367_v13 }
0x119f   : > { %v9241_v39 = vpop.f32.mrb[152].mxu1 }
0x11a0   : > { %4419 = vmax.xlane.f32.xlu0 %v4364_v23  ;;  %v9243_v12 = vpop.f32.mrb[153].mxu1 }
0x11a1   : > { %v9245_v43 = vpop.f32.mrb[154].mxu1 }
0x11a2   : > { %4433 = vmax.xlane.f32.xlu1 %v9245_v43  ;;  %v9248_v49 = vpop.f32.mrb[155].mxu1 }
0x11a4   : > { %4431 = vmax.xlane.f32.xlu0 %v9241_v39 }
0x11a6   : > { %4429 = vmax.xlane.f32.xlu1 %v9248_v49 }
0x11a7   : > { %v9252_v10 = vpop.f32.mrb[156].mxu1 }
0x11a8   : > { %4427 = vmax.xlane.f32.xlu0 %v9243_v12  ;;  %v9255_v38 = vpop.f32.mrb[157].mxu1 }
0x11a9   : > { %v9257_v34 = vpop.f32.mrb[158].mxu1 }
0x11aa   : > { %v9259_v30 = vpop.f32.mrb[159].mxu1 }
0x11ac   : > { %4439 = vmax.xlane.f32.xlu0 %v9252_v10 }
0x11b0   : > { %4435 = vmax.xlane.f32.xlu0 %v9255_v38 }
0x11b7   : > { %4590 = vrot.lane.b32.xlu1 %v10081_v14, %s9992_s17 }
0x11c6   : > { %4588 = vrot.lane.b32.xlu0 %v10080_v53, %s9992_s17 }
0x11db   : > { %4441 = vmax.xlane.f32.xlu1 %v9257_v34 }
0x11df   : > { %4437 = vmax.xlane.f32.xlu1 %v9259_v30 }
0x121d   : > { %v4416_v4 = vpop.xlane.xlu0 %4415 }
0x121e   : > { %v4445_v21 = vsub.f32 %v6200_v44, %v4416_v4 }
0x1220   : > { %v4463_v55 = vmul.f32 1.442695, %v4445_v21  ;;  %v4414_v2 = vpop.xlane.xlu1 %4413 }
0x1221   : > { %v4412_v58 = vpop.xlane.xlu0 %4411  ;;  %v4444_v47 = vsub.f32 %v4351_v8, %v4414_v2 }
0x1222   : > { %6873 = vpow2.f32 %v4463_v55  ;;  %v4443_v9 = vsub.f32 %v4348_v24, %v4412_v58 }
0x1223   : > { %v4461_v37 = vmul.f32 1.442695, %v4444_v47 }
0x1224   : > { %v4459_v36 = vmul.f32 1.442695, %v4443_v9 }
0x1225   : > { %v4418_v62 = vpop.xlane.xlu0 %4417 }
0x1226   : > { %6875 = vpow2.f32 %v4459_v36  ;;  %v4446_v25 = vsub.f32 %v6201_v28, %v4418_v62 }
0x1227   : > { %v4426_v14 = vpop.xlane.xlu1 %4425 }
0x1228   : > { %v4465_v35 = vmul.f32 1.442695, %v4446_v25  ;;  %v4450_v53 = vsub.f32 %v6205_v16, %v4426_v14 }
0x1229   : > { %v4424_v60 = vpop.xlane.xlu0 %4423 }
0x122a   : > { %6877 = vpow2.f32 %v4465_v35  ;;  %v4449_v48 = vsub.f32 %v6204_v17, %v4424_v60  ;;  %v4473_v4 = vmul.f32 1.442695, %v4450_v53 }
0x122b   : > { %v4422_v59 = vpop.xlane.xlu1 %4421  ;;  %6879 = vpow2.f32 %v4461_v37 }
0x122c   : > { %v9269_v32 = vpop.eup %6873  ;;  %v4471_v44 = vmul.f32 1.442695, %v4449_v48  ;;  %v4448_v24 = vsub.f32 %v4367_v13, %v4422_v59 }
0x122d   : > { %v4420_v21 = vpop.xlane.xlu0 %4419  ;;  %4495 = vadd.xlane.f32.xlu1 %v9269_v32 }
0x122e   : > { %6881 = vpow2.f32 %v4471_v44  ;;  %v4447_v8 = vsub.f32 %v4364_v23, %v4420_v21  ;;  %v4469_v60 = vmul.f32 1.442695, %v4448_v24 }
0x122f   : > { %6883 = vpow2.f32 %v4473_v4  ;;  %v4434_v17 = vpop.xlane.xlu1 %4433 }
0x1230   : > { %v9272_v28 = vpop.eup %6875  ;;  %v4467_v55 = vmul.f32 1.442695, %v4447_v8  ;;  %v4454_v14 = vsub.f32 %v9245_v43, %v4434_v17 }
0x1231   : > { %v4432_v16 = vpop.xlane.xlu0 %4431  ;;  %4491 = vadd.xlane.f32.xlu1 %v9272_v28 }
0x1232   : > { %6885 = vpow2.f32 %v4467_v55  ;;  %v4481_v4 = vmul.f32 1.442695, %v4454_v14  ;;  %v4453_v21 = vsub.f32 %v9241_v39, %v4432_v16  ;;  %v10129_v14 = vld [vmem:[#allocation14_spill] sm:$0xff] }
0x1233   : > { %6887 = vpow2.f32 %v4469_v60  ;;  %v4430_v2 = vpop.xlane.xlu1 %4429 }
0x1234   : > { %v9275_v35 = vpop.eup %6877  ;;  %v4452_v53 = vsub.f32 %v9248_v49, %v4430_v2  ;;  %v4479_v55 = vmul.f32 1.442695, %v4453_v21 }
0x1235   : > { %v4428_v48 = vpop.xlane.xlu0 %4427  ;;  %4497 = vadd.xlane.f32.xlu1 %v9275_v35  ;;  %v9278_v37 = vpop.eup %6879 }
0x1236   : > { %v4451_v25 = vsub.f32 %v9243_v12, %v4428_v48  ;;  %v4477_v24 = vmul.f32 1.442695, %v4452_v53 }
0x1237   : > { %v4591_v62 = vpop.permute.xlu1 %4590 }
0x1238   : > { %v9280_v59 = vpop.eup %6881  ;;  %v4475_v44 = vmul.f32 1.442695, %v4451_v25  ;;  %v10128_v25 = vld [vmem:[#allocation19_spill] sm:$0xff] }
0x1239   : > { %v4440_v23 = vpop.xlane.xlu0 %4439  ;;  %4503 = vadd.xlane.f32.xlu0 %v9280_v59  ;;  %4493 = vadd.xlane.f32.xlu1 %v9278_v37  ;;  %v9284_v13 = vpop.eup %6883  ;;  %v10130_v53 = vpack.c.bf16 %v10128_v25, %v10129_v14  ;;  %v10162_v25 = vld [vmem:[#allocation36_spill] sm:$0xff]  ;;  %v10163_v14 = vld [vmem:[#allocation34_spill] sm:$0xff] }
0x123a   : > { %6889 = vpow2.f32 %v4475_v44  ;;  %v4457_v43 = vsub.f32 %v9252_v10, %v4440_v23  ;;  %v10131_v44 = vld [vmem:[#allocation57_spill] sm:$0xff] }
0x123b   : > { %6891 = vpow2.f32 %v4481_v4  ;;  %v10132_v4 = vld [vmem:[#allocation55_spill] sm:$0xff] }
0x123c   : > { %v9286_v58 = vpop.eup %6885  ;;  %6893 = vpow2.f32 %v4477_v24  ;;  %v4487_v16 = vmul.f32 1.442695, %v4457_v43  ;;  %v10133_v21 = vpack.c.bf16 %v10131_v44, %v10132_v4  ;;  %v10138_v24 = vld [vmem:[#allocation16_spill] sm:$0xff]  ;;  %v10165_v44 = vld [vmem:[#allocation15_spill] sm:$0xff]  ;;  %v10166_v4 = vld [vmem:[#allocation22_spill] sm:$0xff] }
0x123d   : > { %v4436_v9 = vpop.xlane.xlu0 %4435  ;;  %4499 = vadd.xlane.f32.xlu1 %v9286_v58  ;;  %4505 = vadd.xlane.f32.xlu0 %v9284_v13  ;;  %v9290_v36 = vpop.eup %6887  ;;  %6895 = vpow2.f32 %v4479_v55 }
0x1241   : > { %v4589_v47 = vpop.permute.xlu0 %4588  ;;  %4501 = vadd.xlane.f32.xlu0 %v9290_v36 }
0x1242   : > { %6222 = vmatprep.subr.bf16.mxu0 %v4589_v47 }
0x1243   : > { %6223 = vmatpush3.bf16.msra.mxu0 %v4589_v47  ;;  %v10126_v47 = vpack.c.bf16 %v8193_v29, %v8187_v20  ;;  %v10134_v20 = vpack.c.bf16 %v8961_v50, %v8955_v45  ;;  %v10135_v29 = vld [vmem:[#allocation33_spill] sm:$0xff] }
0x1244   : > { %6224 = vmatprep.subr.bf16.mxu0 %v4591_v62  ;;  %v9305_v17 = vpop.eup %6889  ;;  %v10144_v50 = vld [vmem:[#allocation17_spill] sm:$0xff] }
0x1245   : > { %v9308_v2 = vpop.eup %6891 }
0x1247   : > { %6225 = vmatpush3.bf16.msra.mxu0 %v4591_v62  ;;  %v10127_v62 = vpack.c.bf16 %v8449_v3, %v8443_v15  ;;  %v10136_v15 = vld [vmem:[#allocation32_spill] sm:$0xff] }
0x1248   : > { %v10137_v3 = vpack.c.bf16 %v10135_v29, %v10136_v15  ;;  %v10170_v29 = vpack.c.bf16 %v10168_v11, %v10169_v1 }
0x124e   : > { %4594 = vrot.lane.b32.xlu1 %v10083_v22, %s9992_s17  ;;  %v4455_v22 = vsub.f32 %v9255_v38, %v4436_v9  ;;  %v9310_v38 = vpop.eup %6893 }
0x124f   : > { %v9314_v10 = vpop.eup %6895 }
0x1250   : > { %v4483_v49 = vmul.f32 1.442695, %v4455_v22  ;;  %v10141_v22 = vld [vmem:[#allocation56_spill] sm:$0xff] }
0x1257   : > { %4592 = vrot.lane.b32.xlu0 %v10082_v46, %s9992_s17 }
0x1268   : > { %v4442_v8 = vpop.xlane.xlu1 %4441 }
0x1269   : > { %v4458_v46 = vsub.f32 %v9257_v34, %v4442_v8  ;;  %v10139_v8 = vld [vmem:[#allocation13_spill] sm:$0xff] }
0x126a   : > { %v10140_v55 = vpack.c.bf16 %v10138_v24, %v10139_v8  ;;  %v10174_v24 = vpack.c.bf16 %v9209_v7, %v9205_v40  ;;  %v10175_v8 = vld [vmem:[#allocation71_spill] sm:$0xff] }
0x126b   : > { %v4489_v39 = vmul.f32 1.442695, %v4458_v46  ;;  %v10145_v46 = vld [vmem:[#allocation18_spill] sm:$0xff] }
0x126c   : > { %v4438_v60 = vpop.xlane.xlu1 %4437  ;;  %v10146_v18 = vpack.c.bf16 %v10144_v50, %v10145_v46  ;;  %v10179_v50 = vld [vmem:[#allocation27_spill] sm:$0xff] }
0x126d   : > { %v4456_v12 = vsub.f32 %v9259_v30, %v4438_v60  ;;  %v10142_v60 = vld [vmem:[#allocation54_spill] sm:$0xff] }
0x126e   : > { %v10143_v45 = vpack.c.bf16 %v10141_v22, %v10142_v60 }
0x126f   : > { %v4485_v48 = vmul.f32 1.442695, %v4456_v12  ;;  %v10149_v12 = vld [vmem:[#allocation12_spill] sm:$0xff] }
0x1271   : > { %6897 = vpow2.f32 %v4485_v48  ;;  %v10152_v48 = vld [vmem:[#allocation35_spill] sm:$0xff] }
0x1272   : > { %4507 = vadd.xlane.f32.xlu1 %v9305_v17  ;;  %6899 = vpow2.f32 %v4483_v49  ;;  %v10151_v49 = vld [vmem:[#allocation37_spill] sm:$0xff] }
0x1273   : > { %6901 = vpow2.f32 %v4489_v39  ;;  %v10153_v39 = vpack.c.bf16 %v10151_v49, %v10152_v48 }
0x1274   : > { %6903 = vpow2.f32 %v4487_v16  ;;  %v10154_v16 = vld [vmem:[#allocation11_spill] sm:$0xff] }
0x1276   : > { %4513 = vadd.xlane.f32.xlu1 %v9308_v2  ;;  %4509 = vadd.xlane.f32.xlu0 %v9310_v38 }
0x127a   : > { %4511 = vadd.xlane.f32.xlu0 %v9314_v10 }
0x127b   : > { %v9317_v34 = vpop.eup %6897 }
0x127c   : > { %4517 = vadd.xlane.f32.xlu1 %v9317_v34  ;;  %v9320_v30 = vpop.eup %6899 }
0x127d   : > { %v9323_v23 = vpop.eup %6901 }
0x127e   : > { %4515 = vadd.xlane.f32.xlu0 %v9320_v30  ;;  %v9326_v9 = vpop.eup %6903 }
0x1280   : > { %4521 = vadd.xlane.f32.xlu1 %v9323_v23 }
0x1282   : > { %4519 = vadd.xlane.f32.xlu0 %v9326_v9 }
0x1291   : > { %2137 = vrot.lane.b32.xlu1 %v10126_v47, %s9990_s16  ;;  %v10155_v47 = vld [vmem:[#allocation20_spill] sm:$0xff] }
0x1292   : > { %v10156_v56 = vpack.c.bf16 %v10154_v16, %v10155_v47 }
0x1295   : > { %2653 = vrot.lane.b32.xlu1 %v10127_v62, %s7066_s15  ;;  %v10161_v62 = vpack.c.bf16 %v9213_v6, %v9207_v52  ;;  %v10171_v52 = vld [vmem:[#allocation10_spill] sm:$0xff]  ;;  %v10172_v6 = vld [vmem:[#allocation21_spill] sm:$0xff] }
0x1296   : > { %v10173_v15 = vpack.c.bf16 %v10171_v52, %v10172_v6 }
0x1298   : > { %1621 = vrot.lane.b32.xlu0 %v10130_v53, %s9992_s17  ;;  %v10164_v53 = vpack.c.bf16 %v10162_v25, %v10163_v14 }
0x1299   : > { %3169 = vrot.lane.b32.xlu1 %v10133_v21, %s7065_s14  ;;  %v10167_v21 = vpack.c.bf16 %v10165_v44, %v10166_v4 }
0x129c   : > { %3685 = vrot.lane.b32.xlu0 %v10134_v20, %s9994_s13 }
0x129d   : > { %4201 = vrot.lane.b32.xlu1 %v4185_v42, %s9996_s11  ;;  %v10148_v42 = vld [vmem:[#allocation23_spill] sm:$0xff] }
0x129e   : > { %v10150_v43 = vpack.c.bf16 %v10148_v42, %v10149_v12  ;;  %v10182_v42 = vld [vmem:[#allocation39_spill] sm:$0xff] }
0x12a0   : > { %2139 = vrot.lane.b32.xlu0 %v10137_v3, %s9990_s16 }
0x12a1   : > { %1623 = vrot.lane.b32.xlu1 %v10140_v55, %s9992_s17  ;;  %v10176_v55 = vld [vmem:[#allocation70_spill] sm:$0xff] }
0x12a2   : > { %v10177_v22 = vpack.c.bf16 %v10175_v8, %v10176_v55 }
0x12a4   : > { %3171 = vrot.lane.b32.xlu0 %v10143_v45, %s7065_s14  ;;  %v10178_v45 = vld [vmem:[#allocation29_spill] sm:$0xff] }
0x12a5   : > { %2655 = vrot.lane.b32.xlu1 %v10146_v18, %s7066_s15  ;;  %v10180_v46 = vpack.c.bf16 %v10178_v45, %v10179_v50 }
0x12a8   : > { %4203 = vrot.lane.b32.xlu0 %v4186_v27, %s9996_s11  ;;  %v10158_v27 = vld [vmem:[#allocation59_spill] sm:$0xff] }
0x12a9   : > { %3687 = vrot.lane.b32.xlu1 %v10147_v33, %s9994_s13  ;;  %v10159_v0 = vpack.c.bf16 %v10157_v31, %v10158_v27  ;;  %v10181_v33 = vld [vmem:[#allocation41_spill] sm:$0xff] }
0x12aa   : > { %v10183_v12 = vpack.c.bf16 %v10181_v33, %v10182_v42 }
0x12ac   : > { %1625 = vrot.lane.b32.xlu0 %v10150_v43, %s9992_s17 }
0x12ad   : > { %2141 = vrot.lane.b32.xlu1 %v10153_v39, %s9990_s16 }
0x12b0   : > { %2657 = vrot.lane.b32.xlu0 %v10156_v56, %s7066_s15 }
0x12b1   : > { %3173 = vrot.lane.b32.xlu1 %v10159_v0, %s7065_s14 }
0x12b4   : > { %3689 = vrot.lane.b32.xlu0 %v10160_v41, %s9994_s13 }
0x12b5   : > { %4205 = vrot.lane.b32.xlu1 %v10161_v62, %s9996_s11 }
0x12b8   : > { %2143 = vrot.lane.b32.xlu0 %v10164_v53, %s9990_s16 }
0x12b9   : > { %1627 = vrot.lane.b32.xlu1 %v10167_v21, %s9992_s17 }
0x12ba   : > { %v4496_v20 = vpop.xlane.xlu1 %4495 }
0x12bb   : > { %6905 = vrcp.f32 %v4496_v20 }
0x12bc   : > { %3175 = vrot.lane.b32.xlu0 %v10170_v29, %s7065_s14 }
0x12bd   : > { %2659 = vrot.lane.b32.xlu1 %v10173_v15, %s7066_s15 }
0x12be   : > { %v4492_v3 = vpop.xlane.xlu1 %4491 }
0x12bf   : > { %6907 = vrcp.f32 %v4492_v3 }
0x12c0   : > { %4207 = vrot.lane.b32.xlu0 %v10174_v24, %s9996_s11 }
0x12c1   : > { %3691 = vrot.lane.b32.xlu1 %v10177_v22, %s9994_s13  ;;  %s5427_s13 = sshll.u32 %s7130_s25, 11 }
0x12c2   : > { %v4498_v60 = vpop.xlane.xlu1 %4497 }
0x12c3   : > { %6909 = vrcp.f32 %v4498_v60 }
0x12c4   : > { %1629 = vrot.lane.b32.xlu0 %v10180_v46, %s9992_s17 }
0x12c5   : > { %v6906_v18 = vpop.eup %6905  ;;  %2145 = vrot.lane.b32.xlu1 %v10183_v12, %s9990_s16 }
0x12c6   : > { %v4528_v40 = vmul.f32 %v6906_v18, %v9269_v32  ;;  %v4504_v7 = vpop.xlane.xlu0 %4503  ;;  %v4494_v43 = vpop.xlane.xlu1 %4493 }
0x12c7   : > { %6911 = vrcp.f32 %v4504_v7 }
0x12c8   : > { %5385 = vst [vmem:[%s7541_s12 + $0x390] sm:$0xff] %v4528_v40  ;;  %6913 = vrcp.f32 %v4494_v43 }
0x12c9   : > { %v6908_v49 = vpop.eup %6907 }
0x12ca   : > { %v4506_v48 = vpop.xlane.xlu0 %4505  ;;  %v4500_v39 = vpop.xlane.xlu1 %4499  ;;  %v4524_v16 = vmul.f32 %v6908_v49, %v9272_v28 }
0x12cb   : > { %6915 = vrcp.f32 %v4506_v48 }
0x12cc   : > { %6917 = vrcp.f32 %v4500_v39  ;;  %5383 = vst [vmem:[%s7541_s12 + $0x380] sm:$0xff] %v4524_v16 }
0x12cd   : > { %v6910_v47 = vpop.eup %6909 }
0x12ce   : > { %v4530_v56 = vmul.f32 %v6910_v47, %v9275_v35  ;;  %v4502_v32 = vpop.xlane.xlu0 %4501  ;;  %v4595_v62 = vpop.permute.xlu1 %4594 }
0x12cf   : > { %6919 = vrcp.f32 %v4502_v32 }
0x12d0   : > { %5386 = vst [vmem:[%s7541_s12 + $0x398] sm:$0xff] %v4530_v56  ;;  %v4573_v4 = vpack.c.bf16 %v4530_v56, %v4528_v40  ;;  %v10184_v56 = vmov 0  }
0x12d1   : > { %v6912_v31 = vpop.eup %6911 }
0x12d2   : > { %v6914_v27 = vpop.eup %6913  ;;  %v4593_v0 = vpop.permute.xlu0 %4592  ;;  %v4536_v41 = vmul.f32 %v6912_v31, %v9280_v59 }
0x12d3   : > { %6226 = vmatprep.subr.bf16.mxu0 %v4593_v0  ;;  %v4526_v28 = vmul.f32 %v6914_v27, %v9278_v37 }
0x12d4   : > { %6227 = vmatpush3.bf16.msra.mxu0 %v4593_v0  ;;  %5389 = vst [vmem:[%s7541_s12 + $0x3b0] sm:$0xff] %v4536_v41 }
0x12d5   : > { %v6916_v25 = vpop.eup %6915  ;;  %6228 = vmatprep.subr.bf16.mxu0 %v4595_v62  ;;  %5384 = vst [vmem:[%s7541_s12 + $0x388] sm:$0xff] %v4526_v28  ;;  %v4572_v35 = vpack.c.bf16 %v4526_v28, %v4524_v16 }
0x12d6   : > { %v6918_v14 = vpop.eup %6917  ;;  %v4538_v53 = vmul.f32 %v6916_v25, %v9284_v13 }
0x12d7   : > { %6230 = vmatprep.mubr.bf16.mxu0 %v4572_v35  ;;  %v4532_v44 = vmul.f32 %v6918_v14, %v9286_v58 }
0x12d8   : > { %6229 = vmatpush3.bf16.msra.mxu0 %v4595_v62  ;;  %5390 = vst [vmem:[%s7541_s12 + $0x3b8] sm:$0xff] %v4538_v53  ;;  %v4575_v20 = vpack.c.bf16 %v4538_v53, %v4536_v41 }
0x12d9   : > { %v6920_v59 = vpop.eup %6919  ;;  %5387 = vst [vmem:[%s7541_s12 + $0x3a0] sm:$0xff] %v4532_v44 }
0x12da   : > { %v4534_v37 = vmul.f32 %v6920_v59, %v9290_v36 }
0x12db   : > { %6231 = vmatmul.mubr.bf16.vlgmr.msra.gmra.mrb[128].mxu0 %v4573_v4 }
0x12dc   : > { %5388 = vst [vmem:[%s7541_s12 + $0x3a8] sm:$0xff] %v4534_v37  ;;  %v4574_v21 = vpack.c.bf16 %v4534_v37, %v4532_v44 }
0x12de   : > { %6234 = vmatprep.mubr.bf16.mxu0 %v4574_v21 }
0x12e3   : > { %6235 = vmatmul.mubr.bf16.gmra.mrb[132].mxu0 %v4575_v20  ;;  %v6401_v20 = vld [vmem:[%s9878_s2] ss:$8 sps:$4 sm:$0xff]  }
0x12ff   : > { %v4508_v11 = vpop.xlane.xlu1 %4507 }
0x1300   : > { %6921 = vrcp.f32 %v4508_v11  ;;  %v6403_v11 = vld [vmem:[%s9878_s2 + $0x4] ss:$8 sps:$4 sm:$0xff]  }
0x1301   : > { %4866 = vmatprep.subr.bf16.mxu0 %v6403_v11  ;;  %v10219_v11 = vld [vmem:[#allocation28_spill] sm:$0xff] }
0x1302   : > { %4867 = vmatpush1.bf16.msra.mxu0 %v6401_v20  ;;  %v10218_v20 = vld [vmem:[#allocation31_spill] sm:$0xff] }
0x1303   : > { %v4510_v13 = vpop.xlane.xlu0 %4509  ;;  %v4514_v1 = vpop.xlane.xlu1 %4513 }
0x1304   : > { %6923 = vrcp.f32 %v4510_v13  ;;  %v6406_v13 = vld [vmem:[%s9878_s2 + $0x14] ss:$8 sps:$4 sm:$0xff]  }
0x1305   : > { %6925 = vrcp.f32 %v4514_v1  ;;  %v6404_v1 = vld [vmem:[%s9878_s2 + $0x10] ss:$8 sps:$4 sm:$0xff]   ;;  %4868 = vmatprep.subr.bf16.mxu0 %v6406_v13  ;;  %v10220_v13 = vpack.c.bf16 %v10218_v20, %v10219_v11 }
0x1306   : > { %4869 = vmatpush1.bf16.msra.mxu0 %v6404_v1 }
0x1307   : > { %v4512_v58 = vpop.xlane.xlu0 %4511 }
0x1308   : > { %6927 = vrcp.f32 %v4512_v58  ;;  %v6409_v58 = vld [vmem:[%s9878_s2 + $0x24] ss:$8 sps:$4 sm:$0xff]  }
0x1309   : > { %v4518_v29 = vpop.xlane.xlu1 %4517  ;;  %4870 = vmatprep.subr.bf16.mxu0 %v6409_v58 }
0x130a   : > { %v6922_v52 = vpop.eup %6921  ;;  %6929 = vrcp.f32 %v4518_v29  ;;  %v6407_v29 = vld [vmem:[%s9878_s2 + $0x20] ss:$8 sps:$4 sm:$0xff]  }
0x130b   : > { %v4516_v36 = vpop.xlane.xlu0 %4515  ;;  %v4540_v6 = vmul.f32 %v6922_v52, %v9305_v17  ;;  %v6412_v52 = vld [vmem:[%s9878_s2 + $0x34] ss:$8 sps:$4 sm:$0xff]   ;;  %4871 = vmatpush1.bf16.msra.mxu0 %v6407_v29 }
0x130c   : > { %6931 = vrcp.f32 %v4516_v36  ;;  %v6410_v36 = vld [vmem:[%s9878_s2 + $0x30] ss:$8 sps:$4 sm:$0xff]   ;;  %4872 = vmatprep.subr.bf16.mxu0 %v6412_v52 }
0x130d   : > { %v4522_v15 = vpop.xlane.xlu1 %4521  ;;  %5391 = vst [vmem:[%s7541_s12 + $0x3c0] sm:$0xff] %v4540_v6 }
0x130e   : > { %v6924_v3 = vpop.eup %6923  ;;  %6933 = vrcp.f32 %v4522_v15  ;;  %v6413_v15 = vld [vmem:[%s9878_s2 + $0x40] ss:$8 sps:$4 sm:$0xff]  }
0x130f   : > { %v6926_v24 = vpop.eup %6925  ;;  %v4520_v8 = vpop.xlane.xlu0 %4519  ;;  %v4542_v55 = vmul.f32 %v6924_v3, %v9310_v38  ;;  %4873 = vmatpush1.bf16.msra.mxu0 %v6410_v36  ;;  %v6418_v3 = vld [vmem:[%s9878_s2 + $0x54] ss:$8 sps:$4 sm:$0xff]  }
0x1310   : > { %6935 = vrcp.f32 %v4520_v8  ;;  %v4546_v22 = vmul.f32 %v6926_v24, %v9308_v2  ;;  %v6416_v24 = vld [vmem:[%s9878_s2 + $0x50] ss:$8 sps:$4 sm:$0xff]   ;;  %v6419_v8 = vld [vmem:[%s9878_s2 + $0x60] ss:$8 sps:$4 sm:$0xff]  }
0x1311   : > { %v2138_v60 = vpop.permute.xlu1 %2137  ;;  %5392 = vst [vmem:[%s7541_s12 + $0x3c8] sm:$0xff] %v4542_v55  ;;  %v4576_v45 = vpack.c.bf16 %v4542_v55, %v4540_v6  ;;  %v6415_v6 = vld [vmem:[%s9878_s2 + $0x44] ss:$8 sps:$4 sm:$0xff]  }
0x1312   : > { %v6928_v50 = vpop.eup %6927  ;;  %5394 = vst [vmem:[%s7541_s12 + $0x3d8] sm:$0xff] %v4546_v22  ;;  %4874 = vmatprep.subr.bf16.mxu0 %v6415_v6  ;;  %v6421_v55 = vld [vmem:[%s9878_s2 + $0x64] ss:$8 sps:$4 sm:$0xff]  }
0x1313   : > { %v1622_v17 = vpop.permute.xlu0 %1621  ;;  %6238 = vmatprep.mubr.bf16.mxu0 %v4576_v45  ;;  %v4544_v46 = vmul.f32 %v6928_v50, %v9314_v10  ;;  %4875 = vmatpush1.bf16.msra.mxu0 %v6413_v15  ;;  %v10222_v15 = vld [vmem:[#allocation67_spill] sm:$0xff] }
0x1314   : > { %v6930_v18 = vpop.eup %6929  ;;  %1646 = vst.msk [vmem:[#allocation2] sm:$0xff] %vm1645_vm1, %v1622_v17  ;;  %4876 = vmatprep.subr.bf16.mxu0 %v6418_v3 }
0x1315   : > { %2162 = vst.msk [vmem:[#allocation2] sm:$0xff] %vm2161_vm2, %v2138_v60  ;;  %v2654_v2 = vpop.permute.xlu1 %2653  ;;  %5393 = vst [vmem:[%s7541_s12 + $0x3d0] sm:$0xff] %v4544_v46  ;;  %v4577_v38 = vpack.c.bf16 %v4546_v22, %v4544_v46  ;;  %v4550_v33 = vmul.f32 %v6930_v18, %v9317_v34  ;;  %v6424_v22 = vld [vmem:[%s9878_s2 + $0x74] ss:$8 sps:$4 sm:$0xff]   ;;  %v6422_v60 = vld [vmem:[%s9878_s2 + $0x70] ss:$8 sps:$4 sm:$0xff]  }
0x1316   : > { %v6932_v42 = vpop.eup %6931  ;;  %2678 = vst.msk [vmem:[#allocation2] sm:$0xff] %vm2677_vm3, %v2654_v2 }
0x1317   : > { %v3686_v12 = vpop.permute.xlu0 %3685  ;;  %6239 = vmatmul.mubr.bf16.gmra.mrb[136].mxu0 %v4577_v38  ;;  %v4548_v10 = vmul.f32 %v6932_v42, %v9320_v30  ;;  %5396 = vst [vmem:[%s7541_s12 + $0x3e8] sm:$0xff] %v4550_v33  ;;  %v10186_v42 = vld [vmem:[#allocation63_spill] sm:$0xff] }
0x1318   : > { %v6934_v40 = vpop.eup %6933  ;;  %4877 = vmatpush1.bf16.msra.mxu0 %v6416_v24 }
0x1319   : > { %v3170_v7 = vpop.permute.xlu1 %3169  ;;  %5395 = vst [vmem:[%s7541_s12 + $0x3e0] sm:$0xff] %v4548_v10  ;;  %v4578_v43 = vpack.c.bf16 %v4550_v33, %v4548_v10  ;;  %v4554_v49 = vmul.f32 %v6934_v40, %v9323_v23  ;;  %4878 = vmatprep.subr.bf16.mxu0 %v6421_v55  ;;  %v10185_v33 = vld [vmem:[#allocation65_spill] sm:$0xff]  ;;  %v10225_v55 = vld [vmem:[#allocation51_spill] sm:$0xff] }
0x131a   : > { %v6936_v48 = vpop.eup %6935  ;;  %3194 = vst.msk [vmem:[#allocation2] sm:$0xff] %vm3193_vm4, %v3170_v7  ;;  %v10188_v40 = vld [vmem:[#allocation49_spill] sm:$0xff]  ;;  %v10189_v7 = vld [vmem:[#allocation47_spill] sm:$0xff] }
0x131b   : > { %v2140_v34 = vpop.permute.xlu0 %2139  ;;  %6242 = vmatprep.mubr.bf16.mxu0 %v4578_v43  ;;  %3710 = vst.msk [vmem:[#allocation2] sm:$0xff] %vm3709_vm5, %v3686_v12  ;;  %v4552_v39 = vmul.f32 %v6936_v48, %v9326_v9  ;;  %5398 = vst [vmem:[%s7541_s12 + $0x3f8] sm:$0xff] %v4554_v49  ;;  %v10187_v12 = vpack.c.bf16 %v10185_v33, %v10186_v42  ;;  %v10190_v43 = vpack.c.bf16 %v10188_v40, %v10189_v7  ;;  %v10231_v33 = vld [vmem:[#allocation30_spill] sm:$0xff] }
0x131c   : > { %4879 = vmatpush1.bf16.msra.mxu0 %v6419_v8  ;;  %v10224_v8 = vld [vmem:[#allocation53_spill] sm:$0xff]  ;;  %v10232_v42 = vld [vmem:[#allocation26_spill] sm:$0xff] }
0x131d   : > { %v4202_v30 = vpop.permute.xlu1 %4201  ;;  %5397 = vst [vmem:[%s7541_s12 + $0x3f0] sm:$0xff] %v4552_v39  ;;  %v4579_v16 = vpack.c.bf16 %v4554_v49, %v4552_v39  ;;  %4880 = vmatprep.subr.bf16.mxu0 %v6424_v22  ;;  %v10226_v22 = vpack.c.bf16 %v10224_v8, %v10225_v55  ;;  %v10235_v40 = vld [vmem:[#allocation42_spill] sm:$0xff] }
0x131e   : > { %4226 = vst.msk [vmem:[#allocation2] sm:$0xff] %vm4225_vm6, %v4202_v30  ;;  %v10192_v30 = vpack.c.bf16 %v9225_v5, %v9219_v61  ;;  %v10208_v5 = vld [vmem:[#allocation64_spill] sm:$0xff] }
0x131f   : > { %v3172_v47 = vpop.permute.xlu0 %3171  ;;  %6243 = vmatmul.mubr.bf16.gmra.mrb[140].mxu0 %v4579_v16  ;;  %v10194_v16 = vld [vmem:[#allocation75_spill] sm:$0xff] }
0x1320   : > { %4898 = vmatprep.mubr.bf16.mxu0 %v10184_v56  ;;  %4881 = vmatpush1.bf16.msra.mxu0 %v6422_v60 }
0x1321   : > { %v1624_v23 = vpop.permute.xlu1 %1623 }
0x1322   : > { %1647 = vst.msk [vmem:[#allocation2 + $0x8] sm:$0xff] %vm1645_vm1, %v1624_v23 }
0x1323   : > { %2163 = vst.msk [vmem:[#allocation2 + $0x8] sm:$0xff] %vm2161_vm2, %v2140_v34  ;;  %v4204_v32 = vpop.permute.xlu0 %4203 }
0x1325   : > { %v2656_v31 = vpop.permute.xlu1 %2655 }
0x1326   : > { %2679 = vst.msk [vmem:[#allocation2 + $0x8] sm:$0xff] %vm2677_vm3, %v2656_v31  ;;  %v10199_v31 = vld [vmem:[#allocation24_spill] sm:$0xff] }
0x1327   : > { %3195 = vst.msk [vmem:[#allocation2 + $0x8] sm:$0xff] %vm3193_vm4, %v3172_v47  ;;  %v1626_v9 = vpop.permute.xlu0 %1625  ;;  %v10195_v47 = vld [vmem:[#allocation73_spill] sm:$0xff] }
0x1328   : > { %1648 = vst.msk [vmem:[#allocation2 + $0x10] sm:$0xff] %vm1645_vm1, %v1626_v9  ;;  %v10196_v23 = vpack.c.bf16 %v10194_v16, %v10195_v47  ;;  %v10246_v47 = vpack.c.bf16 %v9233_v19, %v9229_v51 }
0x1329   : > { %v3688_v27 = vpop.permute.xlu1 %3687 }
0x132a   : > { %3711 = vst.msk [vmem:[#allocation2 + $0x8] sm:$0xff] %vm3709_vm5, %v3688_v27  ;;  %v10202_v27 = vld [vmem:[#allocation40_spill] sm:$0xff] }
0x132b   : > { %4227 = vst.msk [vmem:[#allocation2 + $0x8] sm:$0xff] %vm4225_vm6, %v4204_v32  ;;  %v2658_v0 = vpop.permute.xlu0 %2657  ;;  %v10198_v32 = vld [vmem:[#allocation25_spill] sm:$0xff] }
0x132c   : > { %v10200_v9 = vpack.c.bf16 %v10198_v32, %v10199_v31 }
0x132d   : > { %v2142_v41 = vpop.permute.xlu1 %2141 }
0x132e   : > { %2164 = vst.msk [vmem:[#allocation2 + $0x10] sm:$0xff] %vm2161_vm2, %v2142_v41 }
0x132f   : > { %2680 = vst.msk [vmem:[#allocation2 + $0x10] sm:$0xff] %vm2677_vm3, %v2658_v0  ;;  %v3690_v28 = vpop.permute.xlu0 %3689  ;;  %v10203_v0 = vld [vmem:[#allocation38_spill] sm:$0xff] }
0x1330   : > { %v10204_v41 = vpack.c.bf16 %v10202_v27, %v10203_v0 }
0x1331   : > { %v3174_v62 = vpop.permute.xlu1 %3173 }
0x1332   : > { %3196 = vst.msk [vmem:[#allocation2 + $0x10] sm:$0xff] %vm3193_vm4, %v3174_v62  ;;  %v10206_v62 = vld [vmem:[#allocation46_spill] sm:$0xff] }
0x1333   : > { %3712 = vst.msk [vmem:[#allocation2 + $0x10] sm:$0xff] %vm3709_vm5, %v3690_v28  ;;  %v2144_v25 = vpop.permute.xlu0 %2143  ;;  %v10205_v28 = vld [vmem:[#allocation48_spill] sm:$0xff] }
0x1334   : > { %v10207_v61 = vpack.c.bf16 %v10205_v28, %v10206_v62 }
0x1335   : > { %v4206_v35 = vpop.permute.xlu1 %4205 }
0x1336   : > { %4228 = vst.msk [vmem:[#allocation2 + $0x10] sm:$0xff] %vm4225_vm6, %v4206_v35 }
0x1337   : > { %v3176_v14 = vpop.permute.xlu0 %3175 }
0x1339   : > { %v1628_v53 = vpop.permute.xlu1 %1627 }
0x133a   : > { %1649 = vst.msk [vmem:[#allocation2 + $0x18] sm:$0xff] %vm1645_vm1, %v1628_v53  ;;  %v10212_v53 = vld [vmem:[#allocation72_spill] sm:$0xff] }
0x133b   : > { %2165 = vst.msk [vmem:[#allocation2 + $0x18] sm:$0xff] %vm2161_vm2, %v2144_v25  ;;  %v4208_v44 = vpop.permute.xlu0 %4207  ;;  %v10209_v25 = vld [vmem:[#allocation62_spill] sm:$0xff] }
0x133c   : > { %v10210_v35 = vpack.c.bf16 %v10208_v5, %v10209_v25 }
0x133d   : > { %v2660_v59 = vpop.permute.xlu1 %2659 }
0x133e   : > { %2681 = vst.msk [vmem:[#allocation2 + $0x18] sm:$0xff] %vm2677_vm3, %v2660_v59  ;;  %v10214_v59 = vpack.c.bf16 %v9221_v63, %v9217_v57  ;;  %v10221_v63 = vld [vmem:[#allocation69_spill] sm:$0xff] }
0x133f   : > { %3197 = vst.msk [vmem:[#allocation2 + $0x18] sm:$0xff] %vm3193_vm4, %v3176_v14  ;;  %v1630_v4 = vpop.permute.xlu0 %1629  ;;  %v10211_v14 = vld [vmem:[#allocation74_spill] sm:$0xff]  ;;  %v10223_v3 = vpack.c.bf16 %v10221_v63, %v10222_v15 }
0x1340   : > { %1650 = vst.msk [vmem:[#allocation2 + $0x20] sm:$0xff] %vm1645_vm1, %v1630_v4  ;;  %v10215_v4 = vld [vmem:[#allocation45_spill] sm:$0xff] }
0x1341   : > { %v3692_v37 = vpop.permute.xlu1 %3691 }
0x1342   : > { %3713 = vst.msk [vmem:[#allocation2 + $0x18] sm:$0xff] %vm3709_vm5, %v3692_v37  ;;  %v10216_v37 = vld [vmem:[#allocation43_spill] sm:$0xff] }
0x1343   : > { %4229 = vst.msk [vmem:[#allocation2 + $0x18] sm:$0xff] %vm4225_vm6, %v4208_v44  ;;  %v10213_v44 = vpack.c.bf16 %v10211_v14, %v10212_v53 }
0x1345   : > { %v2146_v21 = vpop.permute.xlu1 %2145 }
0x1346   : > { %2166 = vst.msk [vmem:[#allocation2 + $0x20] sm:$0xff] %vm2161_vm2, %v2146_v21  ;;  %v10217_v21 = vpack.c.bf16 %v10215_v4, %v10216_v37 }
0x13ae   : > { %v6232_v45 = vpop.f32.mrb[128].mxu0 }
0x13af   : > { %v4638_v50 = vpop.f32.mrb[129].mxu0 }
0x13b0   : > { %v6233_v17 = vpop.f32.mrb[130].mxu0 }
0x13b1   : > { %v4702_v46 = vpack.c.bf16 %v6233_v17, %v6232_v45  ;;  %v4641_v18 = vpop.f32.mrb[131].mxu0 }
0x13b2   : > { %v4701_v2 = vpack.c.bf16 %v4641_v18, %v4638_v50  ;;  %v10228_v18 = vld [vmem:[#allocation79_spill] sm:$0xff] }
0x13b3   : > { %4719 = vrot.lane.b32.xlu1 %v4702_v46, %s7063_s29  ;;  %v10227_v46 = vpack.c.bf16 %v9237_v54, %v9231_v26  ;;  %v10240_v54 = vld [vmem:[#allocation78_spill] sm:$0xff] }
0x13b4   : > { %4717 = vrot.lane.b32.xlu0 %v4701_v2, %s7063_s29  ;;  %v10229_v2 = vld [vmem:[#allocation77_spill] sm:$0xff] }
0x13b6   : > { %v6236_v38 = vpop.f32.mrb[132].mxu0 }
0x13b7   : > { %3177 = vrot.lane.b32.xlu1 %v10187_v12, %s7065_s14  ;;  %v4654_v10 = vpop.f32.mrb[133].mxu0  ;;  %v10233_v12 = vpack.c.bf16 %v10231_v33, %v10232_v42 }
0x13b8   : > { %2661 = vrot.lane.b32.xlu0 %v10190_v43, %s7066_s15  ;;  %v6237_v49 = vpop.f32.mrb[134].mxu0  ;;  %v10237_v43 = vld [vmem:[#allocation52_spill] sm:$0xff] }
0x13b9   : > { %v4704_v48 = vpack.c.bf16 %v6237_v49, %v6236_v38  ;;  %v4657_v34 = vpop.f32.mrb[135].mxu0  ;;  %v10230_v38 = vpack.c.bf16 %v10228_v18, %v10229_v2  ;;  %v10238_v49 = vld [vmem:[#allocation50_spill] sm:$0xff] }
0x13ba   : > { %v4703_v39 = vpack.c.bf16 %v4657_v34, %v4654_v10  ;;  %v10234_v10 = vld [vmem:[#allocation44_spill] sm:$0xff]  ;;  %v10239_v26 = vpack.c.bf16 %v10237_v43, %v10238_v49 }
0x13bb   : > { %4209 = vrot.lane.b32.xlu1 %v10192_v30, %s10191_s20  ;;  %v10236_v7 = vpack.c.bf16 %v10234_v10, %v10235_v40  ;;  %v10244_v30 = vld [vmem:[#allocation66_spill] sm:$0xff] }
0x13bc   : > { %3693 = vrot.lane.b32.xlu0 %v10196_v23, %s10193_s26 }
0x13bf   : > { %1631 = vrot.lane.b32.xlu1 %v10200_v9, %s10197_s28 }
0x13c0   : > { %2147 = vrot.lane.b32.xlu0 %v10204_v41, %s10201_s10 }
0x13c3   : > { %2663 = vrot.lane.b32.xlu1 %v10207_v61, %s7066_s15 }
0x13c4   : > { %4721 = vrot.lane.b32.xlu0 %v4703_v39, %s7063_s29  ;;  %v10243_v39 = vld [vmem:[#allocation68_spill] sm:$0xff] }
0x13c5   : > { %v10245_v16 = vpack.c.bf16 %v10243_v39, %v10244_v30 }
0x13c7   : > { %4723 = vrot.lane.b32.xlu1 %v4704_v48, %s7063_s29  ;;  %v10241_v48 = vld [vmem:[#allocation76_spill] sm:$0xff] }
0x13c8   : > { %3179 = vrot.lane.b32.xlu0 %v10210_v35, %s7065_s14  ;;  %v10242_v34 = vpack.c.bf16 %v10240_v54, %v10241_v48 }
0x13cb   : > { %3695 = vrot.lane.b32.xlu1 %v10213_v44, %s10193_s26 }
0x13cc   : > { %4211 = vrot.lane.b32.xlu0 %v10214_v59, %s10191_s20 }
0x13cf   : > { %2149 = vrot.lane.b32.xlu1 %v10217_v21, %s10201_s10 }
0x13d0   : > { %1633 = vrot.lane.b32.xlu0 %v10220_v13, %s10197_s28 }
0x13ea   : > { %v6240_v1 = vpop.f32.mrb[136].mxu0 }
0x13eb   : > { %v4670_v58 = vpop.f32.mrb[137].mxu0 }
0x13ec   : > { %v6241_v29 = vpop.f32.mrb[138].mxu0 }
0x13ed   : > { %v4706_v52 = vpack.c.bf16 %v6241_v29, %v6240_v1  ;;  %v4673_v36 = vpop.f32.mrb[139].mxu0 }
0x13ee   : > { %v4705_v6 = vpack.c.bf16 %v4673_v36, %v4670_v58 }
0x13ef   : > { %4727 = vrot.lane.b32.xlu1 %v4706_v52, %s7063_s29 }
0x13f0   : > { %4725 = vrot.lane.b32.xlu0 %v4705_v6, %s7063_s29 }
0x13f2   : > { %v6244_v57 = vpop.f32.mrb[140].mxu0 }
0x13f3   : > { %3181 = vrot.lane.b32.xlu1 %v10223_v3, %s7065_s14  ;;  %v4686_v24 = vpop.f32.mrb[141].mxu0 }
0x13f4   : > { %2665 = vrot.lane.b32.xlu0 %v10226_v22, %s7066_s15  ;;  %v6245_v60 = vpop.f32.mrb[142].mxu0  ;;  %v4776_v22 = vlaneseq }
0x13f5   : > { %v4708_v45 = vpack.c.bf16 %v6245_v60, %v6244_v57  ;;  %v4689_v50 = vpop.f32.mrb[143].mxu0 }
0x13f6   : > { %v4707_v17 = vpack.c.bf16 %v4689_v50, %v4686_v24  ;;  %v4777_v60 = vshrl.u32 %v4776_v22, 7  ;;  %v4774_v50 = vld [vmem:[%s9879_s3] sm:$0x3] }
0x13f7   : > { %4213 = vrot.lane.b32.xlu1 %v10227_v46, %s10191_s20 }
0x13f8   : > { %3697 = vrot.lane.b32.xlu0 %v10230_v38, %s10193_s26 }
0x13fb   : > { %1635 = vrot.lane.b32.xlu1 %v10233_v12, %s10197_s28 }
0x13fc   : > { %2151 = vrot.lane.b32.xlu0 %v10236_v7, %s10201_s10 }
0x13ff   : > { %2667 = vrot.lane.b32.xlu1 %v10239_v26, %s7066_s15  ;;  %s5194_s15 = sshll.u32 %s7537_s9, 7 }
0x1400   : > { %4729 = vrot.lane.b32.xlu0 %v4707_v17, %s7063_s29  ;;  %v4782_v17 = vsub.s32 1, %v4777_v60  ;;  %s9683_s16 = scalar_lea.vmem [#allocation3], %s5194_s15  ;;  %s9687_s17 = scalar_lea.vmem [#allocation5], %s5194_s15 }
0x1401   : > { %s5035_s18 = sshll.u32 %s9683_s16, 4  ;;  %s5051_s19 = sshll.u32 %s9687_s17, 4  ;;  %s9756_s18 = int_to_ptr.vmem [resolvable:$true] %s5035_s18  ;;  %s9765_s19 = int_to_ptr.vmem [resolvable:$true] %s5051_s19 }
0x1402   : > { %v9679_v18 = vrot.slane %v4774_v50, %v4782_v17  ;;  %s6937_s1 = scalar_lea.vmem %s9756_s18, 2048 }
0x1403   : > { %3699 = vrot.lane.b32.xlu1 %v10242_v34, %s10193_s26  ;;  %s5067_s26 = sshll.u32 %s7541_s12, 4  ;;  %s9763_s12 = scalar_lea.hbm %s9881_s5, %s5427_s13  ;;  %s9773_s26 = int_to_ptr.vmem [resolvable:$true] %s5067_s26 }
0x1404   : > { %3183 = vrot.lane.b32.xlu0 %v10245_v16, %s7065_s14  ;;  %p6938_p11 = scmp.ne.s32.totalorder %s9756_s18, %s6937_s1  ;;  %s7069_s14 = smov [#allocation3]  }
0x1406   : > { %p6939_p12 = pnand %p6938_p11, %p7149_p5 }
0x1407   : > { %4731 = vrot.lane.b32.xlu1 %v4708_v45, %s7063_s29  ;;  %v4778_v45 = vsub.s32 0, %v4777_v60  ;;  %s9754_s29 = scalar_lea.hbm %s9880_s4, %s5427_s13  ;;  %s6941_s13 = sshll.u32 %s7069_s14, 4  ;;  %s6942_s13 = int_to_ptr.vmem [resolvable:$false] %s6941_s13 }
0x1408   : > { %4215 = vrot.lane.b32.xlu0 %v10246_v47, %s10191_s20  ;;  %s5429_s20 = sshll.u32 %s7130_s25, 14  ;;  %p6940_p13 = pneg %p6939_p12 }
0x1409   : > { %v9677_v46 = vrot.slane %v4774_v50, %v4778_v45  ;;  %s9771_s10 = scalar_lea.hbm %s9882_s6, %s5429_s20  ;;  %s6943_s15 = scalar_lea.vmem %s6942_s13, 4096 }
0x140a   : > { %p6944_p0 = scmp.lt.s32.totalorder %s9756_s18, %s6942_s13  ;;  %p6945_p1 = scmp.lt.s32.totalorder %s6943_s15, %s6937_s1 }
0x140c   : > { %p6946_p2 = por %p6945_p1, %p6944_p0 }
0x140e   : > { %p6947_p3 = pnand %p6946_p2, %p6940_p13 }
0x1425   : > { %v4720_v23 = vpop.permute.xlu1 %4719 }
0x1426   : > { %4743 = vst.msk [vmem:[#allocation2 + $0x8] sm:$0xff] %vm4741_vm7, %v4720_v23  ;;  %v4718_v32 = vpop.permute.xlu0 %4717 }
0x1427   : > { %4742 = vst.msk [vmem:[#allocation2] sm:$0xff] %vm4741_vm7, %v4718_v32 }
0x1429   : > { %v3178_v31 = vpop.permute.xlu1 %3177 }
0x142a   : > { %v2662_v9 = vpop.permute.xlu0 %2661 }
0x142b   : > { %2682 = vst.msk [vmem:[#allocation2 + $0x20] sm:$0xff] %vm2677_vm3, %v2662_v9 }
0x142c   : > { %3198 = vst.msk [vmem:[#allocation2 + $0x20] sm:$0xff] %vm3193_vm4, %v3178_v31 }
0x142d   : > { %v4210_v27 = vpop.permute.xlu1 %4209  ;;  %v4751_v61 = vld [vmem:[#allocation2 + $0x8] sm:$0xff] }
0x142e   : > { %v3694_v0 = vpop.permute.xlu0 %3693  ;;  %v4750_v41 = vld [vmem:[#allocation2] sm:$0xff] }
0x142f   : > { %3714 = vst.msk [vmem:[#allocation2 + $0x20] sm:$0xff] %vm3709_vm5, %v3694_v0  ;;  %4899 = vmatmul.mubr.bf16.vlgmr.msra.gmra.mrb[144].mxu0 %v4750_v41 }
0x1430   : > { %4230 = vst.msk [vmem:[#allocation2 + $0x20] sm:$0xff] %vm4225_vm6, %v4210_v27  ;;  %4908 = vmatprep.mubr.bf16.mxu0 %v10184_v56 }
0x1431   : > { %v1632_v51 = vpop.permute.xlu1 %1631 }
0x1432   : > { %1651 = vst.msk [vmem:[#allocation2 + $0x28] sm:$0xff] %vm1645_vm1, %v1632_v51  ;;  %v2148_v19 = vpop.permute.xlu0 %2147 }
0x1433   : > { %2167 = vst.msk [vmem:[#allocation2 + $0x28] sm:$0xff] %vm2161_vm2, %v2148_v19 }
0x1435   : > { %v2664_v28 = vpop.permute.xlu1 %2663 }
0x1436   : > { %2683 = vst.msk [vmem:[#allocation2 + $0x28] sm:$0xff] %vm2677_vm3, %v2664_v28  ;;  %v4722_v62 = vpop.permute.xlu0 %4721 }
0x1437   : > { %4744 = vst.msk [vmem:[#allocation2 + $0x10] sm:$0xff] %vm4741_vm7, %v4722_v62  ;;  %4909 = vmatmul.mubr.bf16.gmra.mrb[148].mxu0 %v4751_v61 }
0x1438   : > { %4918 = vmatprep.mubr.bf16.mxu0 %v10184_v56 }
0x1439   : > { %v4724_v5 = vpop.permute.xlu1 %4723 }
0x143a   : > { %4745 = vst.msk [vmem:[#allocation2 + $0x18] sm:$0xff] %vm4741_vm7, %v4724_v5  ;;  %v3180_v25 = vpop.permute.xlu0 %3179 }
0x143b   : > { %3199 = vst.msk [vmem:[#allocation2 + $0x28] sm:$0xff] %vm3193_vm4, %v3180_v25 }
0x143d   : > { %v3696_v35 = vpop.permute.xlu1 %3695 }
0x143e   : > { %3715 = vst.msk [vmem:[#allocation2 + $0x28] sm:$0xff] %vm3709_vm5, %v3696_v35  ;;  %v4212_v14 = vpop.permute.xlu0 %4211  ;;  %v4752_v53 = vld [vmem:[#allocation2 + $0x10] sm:$0xff] }
0x143f   : > { %4231 = vst.msk [vmem:[#allocation2 + $0x28] sm:$0xff] %vm4225_vm6, %v4212_v14  ;;  %4919 = vmatmul.mubr.bf16.gmra.mrb[152].mxu0 %v4752_v53 }
0x1440   : > { %4928 = vmatprep.mubr.bf16.mxu0 %v10184_v56 }
0x1441   : > { %v2150_v59 = vpop.permute.xlu1 %2149  ;;  %v4753_v4 = vld [vmem:[#allocation2 + $0x18] sm:$0xff] }
0x1442   : > { %v1634_v44 = vpop.permute.xlu0 %1633 }
0x1443   : > { %1652 = vst.msk [vmem:[#allocation2 + $0x30] sm:$0xff] %vm1645_vm1, %v1634_v44 }
0x1444   : > { %2168 = vst.msk [vmem:[#allocation2 + $0x30] sm:$0xff] %vm2161_vm2, %v2150_v59 }
0x1447   : > { %4929 = vmatmul.mubr.bf16.gmra.mrb[156].mxu0 %v4753_v4 }
0x1448   : > { %4938 = vmatprep.mubr.bf16.mxu0 %v10184_v56 }
0x1461   : > { %v4728_v37 = vpop.permute.xlu1 %4727 }
0x1462   : > { %4747 = vst.msk [vmem:[#allocation2 + $0x28] sm:$0xff] %vm4741_vm7, %v4728_v37  ;;  %v4726_v21 = vpop.permute.xlu0 %4725 }
0x1463   : > { %4746 = vst.msk [vmem:[#allocation2 + $0x20] sm:$0xff] %vm4741_vm7, %v4726_v21 }
0x1465   : > { %v3182_v20 = vpop.permute.xlu1 %3181 }
0x1466   : > { %v2666_v11 = vpop.permute.xlu0 %2665 }
0x1467   : > { %2684 = vst.msk [vmem:[#allocation2 + $0x30] sm:$0xff] %vm2677_vm3, %v2666_v11 }
0x1468   : > { %3200 = vst.msk [vmem:[#allocation2 + $0x30] sm:$0xff] %vm3193_vm4, %v3182_v20 }
0x1469   : > { %v4214_v13 = vpop.permute.xlu1 %4213  ;;  %v4755_v57 = vld [vmem:[#allocation2 + $0x28] sm:$0xff] }
0x146a   : > { %v3698_v1 = vpop.permute.xlu0 %3697  ;;  %v4754_v58 = vld [vmem:[#allocation2 + $0x20] sm:$0xff] }
0x146b   : > { %3716 = vst.msk [vmem:[#allocation2 + $0x30] sm:$0xff] %vm3709_vm5, %v3698_v1  ;;  %4939 = vmatmul.mubr.bf16.gmra.mrb[160].mxu0 %v4754_v58 }
0x146c   : > { %4232 = vst.msk [vmem:[#allocation2 + $0x30] sm:$0xff] %vm4225_vm6, %v4214_v13  ;;  %4948 = vmatprep.mubr.bf16.mxu0 %v10184_v56 }
0x146d   : > { %v1636_v29 = vpop.permute.xlu1 %1635 }
0x146e   : > { %1653 = vst.msk [vmem:[#allocation2 + $0x38] sm:$0xff] %vm1645_vm1, %v1636_v29  ;;  %v2152_v52 = vpop.permute.xlu0 %2151 }
0x146f   : > { %2169 = vst.msk [vmem:[#allocation2 + $0x38] sm:$0xff] %vm2161_vm2, %v2152_v52 }
0x1471   : > { %v2668_v36 = vpop.permute.xlu1 %2667 }
0x1472   : > { %2685 = vst.msk [vmem:[#allocation2 + $0x38] sm:$0xff] %vm2677_vm3, %v2668_v36  ;;  %v4730_v6 = vpop.permute.xlu0 %4729 }
0x1473   : > { %4748 = vst.msk [vmem:[#allocation2 + $0x30] sm:$0xff] %vm4741_vm7, %v4730_v6  ;;  %4949 = vmatmul.mubr.bf16.gmra.mrb[164].mxu0 %v4755_v57 }
0x1474   : > { %4958 = vmatprep.mubr.bf16.mxu0 %v10184_v56 }
0x1475   : > { %v3700_v63 = vpop.permute.xlu1 %3699 }
0x1476   : > { %v3184_v15 = vpop.permute.xlu0 %3183 }
0x1477   : > { %3201 = vst.msk [vmem:[#allocation2 + $0x38] sm:$0xff] %vm3193_vm4, %v3184_v15 }
0x1478   : > { %3717 = vst.msk [vmem:[#allocation2 + $0x38] sm:$0xff] %vm3709_vm5, %v3700_v63 }
0x1479   : > { %v4732_v8 = vpop.permute.xlu1 %4731 }
0x147a   : > { %v4216_v3 = vpop.permute.xlu0 %4215  ;;  %v4756_v24 = vld [vmem:[#allocation2 + $0x30] sm:$0xff] }
0x147b   : > { %4233 = vst.msk [vmem:[#allocation2 + $0x38] sm:$0xff] %vm4225_vm6, %v4216_v3  ;;  %4959 = vmatmul.mubr.bf16.gmra.mrb[168].mxu0 %v4756_v24 }
0x147c   : > { %4749 = vst.msk [vmem:[#allocation2 + $0x38] sm:$0xff] %vm4741_vm7, %v4732_v8  ;;  %4968 = vmatprep.mubr.bf16.mxu0 %v10184_v56 }
0x1483   : > { %v4757_v55 = vld [vmem:[#allocation2 + $0x38] sm:$0xff] }
0x1484   : > { %4969 = vmatmul.mubr.bf16.gmra.mrb[172].mxu0 %v4757_v55 }
0x1502   : > { %v4900_v2 = vpop.f32.mrb[144].mxu0 }
0x1503   : > { %v4901_v38 = vadd.f32 %v4900_v2, %v9677_v46  ;;  %v4902_v33 = vpop.f32.mrb[145].mxu0 }
0x1504   : > { %v4903_v56 = vadd.f32 %v4902_v33, %v9679_v18  ;;  %v4904_v42 = vpop.f32.mrb[146].mxu0 }
0x1505   : > { %4979 = vst [vmem:[%s9683_s16] sm:$0xff] %v4901_v38  ;;  %v4905_v12 = vadd.f32 %v4904_v42, %v9677_v46  ;;  %v4906_v10 = vpop.f32.mrb[147].mxu0 }
0x1506   : > { %4995 = vst [vmem:[%s9687_s17] sm:$0xff] %v4903_v56  ;;  %v4907_v40 = vadd.f32 %v4906_v10, %v9679_v18 }
0x1507   : > { %4980 = vst [vmem:[%s9683_s16 + $0x8] sm:$0xff] %v4905_v12 }
0x1508   : > { %4996 = vst [vmem:[%s9687_s17 + $0x8] sm:$0xff] %v4907_v40 }
0x150a   : > { %v4910_v7 = vpop.f32.mrb[148].mxu0 }
0x150b   : > { %v4911_v43 = vadd.f32 %v4910_v7, %v9677_v46  ;;  %v4912_v49 = vpop.f32.mrb[149].mxu0 }
0x150c   : > { %v4913_v26 = vadd.f32 %v4912_v49, %v9679_v18  ;;  %v4914_v54 = vpop.f32.mrb[150].mxu0 }
0x150d   : > { %4981 = vst [vmem:[%s9683_s16 + $0x10] sm:$0xff] %v4911_v43  ;;  %v4915_v48 = vadd.f32 %v4914_v54, %v9677_v46  ;;  %v4916_v34 = vpop.f32.mrb[151].mxu0 }
0x150e   : > { %4997 = vst [vmem:[%s9687_s17 + $0x10] sm:$0xff] %v4913_v26  ;;  %v4917_v39 = vadd.f32 %v4916_v34, %v9679_v18 }
0x150f   : > { %4982 = vst [vmem:[%s9683_s16 + $0x18] sm:$0xff] %v4915_v48 }
0x1510   : > { %4998 = vst [vmem:[%s9687_s17 + $0x18] sm:$0xff] %v4917_v39 }
0x1512   : > { %v4920_v30 = vpop.f32.mrb[152].mxu0 }
0x1513   : > { %v4921_v16 = vadd.f32 %v4920_v30, %v9677_v46  ;;  %v4922_v47 = vpop.f32.mrb[153].mxu0 }
0x1514   : > { %v4923_v23 = vadd.f32 %v4922_v47, %v9679_v18  ;;  %v4924_v32 = vpop.f32.mrb[154].mxu0 }
0x1515   : > { %4983 = vst [vmem:[%s9683_s16 + $0x20] sm:$0xff] %v4921_v16  ;;  %v4925_v31 = vadd.f32 %v4924_v32, %v9677_v46  ;;  %v4926_v9 = vpop.f32.mrb[155].mxu0 }
0x1516   : > { %4999 = vst [vmem:[%s9687_s17 + $0x20] sm:$0xff] %v4923_v23  ;;  %v4927_v27 = vadd.f32 %v4926_v9, %v9679_v18 }
0x1517   : > { %4984 = vst [vmem:[%s9683_s16 + $0x28] sm:$0xff] %v4925_v31 }
0x1518   : > { %5000 = vst [vmem:[%s9687_s17 + $0x28] sm:$0xff] %v4927_v27 }
0x151a   : > { %v4930_v0 = vpop.f32.mrb[156].mxu0 }
0x151b   : > { %v4931_v41 = vadd.f32 %v4930_v0, %v9677_v46  ;;  %v4932_v51 = vpop.f32.mrb[157].mxu0 }
0x151c   : > { %v4933_v19 = vadd.f32 %v4932_v51, %v9679_v18  ;;  %v4934_v28 = vpop.f32.mrb[158].mxu0 }
0x151d   : > { %4985 = vst [vmem:[%s9683_s16 + $0x30] sm:$0xff] %v4931_v41  ;;  %v4935_v62 = vadd.f32 %v4934_v28, %v9677_v46  ;;  %v4936_v61 = vpop.f32.mrb[159].mxu0 }
0x151e   : > { %5001 = vst [vmem:[%s9687_s17 + $0x30] sm:$0xff] %v4933_v19  ;;  %v4937_v5 = vadd.f32 %v4936_v61, %v9679_v18 }
0x151f   : > { %4986 = vst [vmem:[%s9683_s16 + $0x38] sm:$0xff] %v4935_v62 }
0x1520   : > { %5002 = vst [vmem:[%s9687_s17 + $0x38] sm:$0xff] %v4937_v5 }
0x153e   : > { %v4940_v25 = vpop.f32.mrb[160].mxu0 }
0x153f   : > { %v4941_v35 = vadd.f32 %v4940_v25, %v9677_v46  ;;  %v4942_v14 = vpop.f32.mrb[161].mxu0 }
0x1540   : > { %v4943_v53 = vadd.f32 %v4942_v14, %v9679_v18  ;;  %v4944_v44 = vpop.f32.mrb[162].mxu0 }
0x1541   : > { %4987 = vst [vmem:[%s9683_s16 + $0x40] sm:$0xff] %v4941_v35  ;;  %v4945_v59 = vadd.f32 %v4944_v44, %v9677_v46  ;;  %v4946_v4 = vpop.f32.mrb[163].mxu0 }
0x1542   : > { %5003 = vst [vmem:[%s9687_s17 + $0x40] sm:$0xff] %v4943_v53  ;;  %v4947_v37 = vadd.f32 %v4946_v4, %v9679_v18 }
0x1543   : > { %4988 = vst [vmem:[%s9683_s16 + $0x48] sm:$0xff] %v4945_v59 }
0x1544   : > { %5004 = vst [vmem:[%s9687_s17 + $0x48] sm:$0xff] %v4947_v37 }
0x1546   : > { %v4950_v21 = vpop.f32.mrb[164].mxu0 }
0x1547   : > { %v4951_v20 = vadd.f32 %v4950_v21, %v9677_v46  ;;  %v4952_v11 = vpop.f32.mrb[165].mxu0 }
0x1548   : > { %v4953_v13 = vadd.f32 %v4952_v11, %v9679_v18  ;;  %v4954_v1 = vpop.f32.mrb[166].mxu0 }
0x1549   : > { %4989 = vst [vmem:[%s9683_s16 + $0x50] sm:$0xff] %v4951_v20  ;;  %v4955_v58 = vadd.f32 %v4954_v1, %v9677_v46  ;;  %v4956_v29 = vpop.f32.mrb[167].mxu0 }
0x154a   : > { %5005 = vst [vmem:[%s9687_s17 + $0x50] sm:$0xff] %v4953_v13  ;;  %v4957_v52 = vadd.f32 %v4956_v29, %v9679_v18 }
0x154b   : > { %4990 = vst [vmem:[%s9683_s16 + $0x58] sm:$0xff] %v4955_v58 }
0x154c   : > { %5006 = vst [vmem:[%s9687_s17 + $0x58] sm:$0xff] %v4957_v52 }
0x154e   : > { %v4960_v36 = vpop.f32.mrb[168].mxu0 }
0x154f   : > { %v4961_v6 = vadd.f32 %v4960_v36, %v9677_v46  ;;  %v4962_v57 = vpop.f32.mrb[169].mxu0 }
0x1550   : > { %v4963_v63 = vadd.f32 %v4962_v57, %v9679_v18  ;;  %v4964_v15 = vpop.f32.mrb[170].mxu0 }
0x1551   : > { %4991 = vst [vmem:[%s9683_s16 + $0x60] sm:$0xff] %v4961_v6  ;;  %v4965_v3 = vadd.f32 %v4964_v15, %v9677_v46  ;;  %v4966_v24 = vpop.f32.mrb[171].mxu0 }
0x1552   : > { %5007 = vst [vmem:[%s9687_s17 + $0x60] sm:$0xff] %v4963_v63  ;;  %v4967_v8 = vadd.f32 %v4966_v24, %v9679_v18 }
0x1553   : > { %4992 = vst [vmem:[%s9683_s16 + $0x68] sm:$0xff] %v4965_v3 }
0x1554   : > { %5008 = vst [vmem:[%s9687_s17 + $0x68] sm:$0xff] %v4967_v8 }
0x1557   : > { %v4970_v55 = vpop.f32.mrb[172].mxu0 }
0x1558   : > { %v4971_v22 = vadd.f32 %v4970_v55, %v9677_v46  ;;  %v4972_v60 = vpop.f32.mrb[173].mxu0 }
0x1559   : > { %v4973_v45 = vadd.f32 %v4972_v60, %v9679_v18  ;;  %v4974_v50 = vpop.f32.mrb[174].mxu0 }
0x155a   : > { %4993 = vst [vmem:[%s9683_s16 + $0x70] sm:$0xff] %v4971_v22  ;;  %v4975_v17 = vadd.f32 %v4974_v50, %v9677_v46  ;;  %v4976_v2 = vpop.f32.mrb[175].mxu0 }
0x155b   : > { %5009 = vst [vmem:[%s9687_s17 + $0x70] sm:$0xff] %v4973_v45  ;;  %v4977_v38 = vadd.f32 %v4976_v2, %v9679_v18 }
0x155c   : > { %4994 = vst [vmem:[%s9683_s16 + $0x78] sm:$0xff] %v4975_v17 }
0x155d   : > { %5010 = vst [vmem:[%s9687_s17 + $0x78] sm:$0xff] %v4977_v38 }
0x155e   : > { %6950 = shalt.err (!%p6947_p3)
}
0x155f   : > { %s6951_s16 = scalar_lea.hbm %s9754_s29, 2048  ;;  %s6955_s20 = scalar_lea.hbm %s9880_s4, 4096 }
0x1560   : > { %p6952_p4 = scmp.ne.s32.totalorder %s9754_s29, %s6951_s16  ;;  %p6956_p9 = scmp.lt.u32.totalorder %s9754_s29, %s9880_s4 }
0x1561   : > { %p6957_p10 = scmp.lt.u32.totalorder %s6955_s20, %s6951_s16  ;;  %p6959_p12 = scmp.lt.u32.totalorder %s6951_s16, %s9754_s29 }
0x1562   : > { %p6953_p7 = pnand %p6952_p4, %p7149_p5 }
0x1563   : > { %p6958_p11 = por %p6957_p10, %p6956_p9 }
0x1564   : > { %p6954_p8 = pneg %p6953_p7 }
0x1565   : > { %p6960_p13 = por %p6959_p12, %p6958_p11 }
0x1567   : > { %p6961_p0 = pnand %p6960_p13, %p6954_p8 }
0x1569   : > { %6964 = shalt.err (!%p6961_p0)
}
0x156a   : > { %s7070_s1 = smov 128   ;;  %s7071_s13 = smov 8  }
0x156b   : > { %6310 = dma.vmem_to_hbm [thread:$0]  (%p7149_p5), %s9756_s18, 2048, %s9754_s29, %s5012_s0, %s7070_s1, %s7070_s1, %s7071_s13  }
0x156c   : > { %s10247_s15 = sand.u32 1, %s7130_s25   ;;  %s6965_s17 = scalar_lea.vmem %s9765_s19, 2048 }
0x156d   : > { %s9805_s16 = scalar_lea.sflag [#allocation6], %s10247_s15  ;;  %p6966_p1 = scmp.ne.s32.totalorder %s9765_s19, %s6965_s17 }
0x156e   : > { %s7072_s11 = smov [#allocation5]  }
0x156f   : > { %p6967_p2 = pnand %p6966_p1, %p7149_p5  ;;  %s6969_s20 = sshll.u32 %s7072_s11, 4  ;;  %s6970_s20 = int_to_ptr.vmem [resolvable:$false] %s6969_s20 }
0x1570   : > { %s6971_s28 = scalar_lea.vmem %s6970_s20, 4096  ;;  %p6972_p4 = scmp.lt.s32.totalorder %s9765_s19, %s6970_s20 }
0x1571   : > { %p6968_p3 = pneg %p6967_p2  ;;  %p6973_p7 = scmp.lt.s32.totalorder %s6971_s28, %s6965_s17 }
0x1573   : > { %p6974_p8 = por %p6973_p7, %p6972_p4 }
0x1575   : > { %p6975_p9 = pnand %p6974_p8, %p6968_p3 }
0x1577   : > { %6978 = shalt.err (!%p6975_p9)
}
0x1578   : > { %s6979_s0 = scalar_lea.hbm %s9763_s12, 2048  ;;  %s6983_s18 = scalar_lea.hbm %s9881_s5, 4096 }
0x1579   : > { %p6980_p10 = scmp.ne.s32.totalorder %s9763_s12, %s6979_s0  ;;  %p6984_p13 = scmp.lt.u32.totalorder %s9763_s12, %s9881_s5 }
0x157a   : > { %p6985_p0 = scmp.lt.u32.totalorder %s6983_s18, %s6979_s0  ;;  %p6987_p2 = scmp.lt.u32.totalorder %s6979_s0, %s9763_s12 }
0x157b   : > { %p6981_p11 = pnand %p6980_p10, %p7149_p5 }
0x157c   : > { %p6986_p1 = por %p6985_p0, %p6984_p13 }
0x157d   : > { %p6982_p12 = pneg %p6981_p11 }
0x157e   : > { %p6988_p3 = por %p6987_p2, %p6986_p1 }
0x1580   : > { %p6989_p4 = pnand %p6988_p3, %p6982_p12 }
0x1582   : > { %6992 = shalt.err (!%p6989_p4)
}
0x1583   : > { %6311 = dma.vmem_to_hbm [thread:$0]  (%p7149_p5), %s9765_s19, 2048, %s9763_s12, %s9805_s16, %s7070_s1, %s7070_s1, %s7071_s13  }
0x1584   : > { %s6993_s15 = scalar_lea.vmem %s9773_s26, 16384  ;;  %s7073_s17 = smov [#allocation7]  }
0x1585   : > { %p6994_p7 = scmp.ne.s32.totalorder %s9773_s26, %s6993_s15  ;;  %s6997_s11 = sshll.u32 %s7073_s17, 4  ;;  %s6998_s11 = int_to_ptr.vmem [resolvable:$false] %s6997_s11 }
0x1586   : > { %s6999_s20 = scalar_lea.vmem %s6998_s11, 32768  ;;  %p7000_p10 = scmp.lt.s32.totalorder %s9773_s26, %s6998_s11 }
0x1587   : > { %p6995_p8 = pnand %p6994_p7, %p7149_p5  ;;  %p7001_p11 = scmp.lt.s32.totalorder %s6999_s20, %s6993_s15 }
0x1589   : > { %p6996_p9 = pneg %p6995_p8  ;;  %p7002_p12 = por %p7001_p11, %p7000_p10 }
0x158b   : > { %p7003_p13 = pnand %p7002_p12, %p6996_p9 }
0x158d   : > { %7006 = shalt.err (!%p7003_p13)
}
0x158e   : > { %s7007_s19 = scalar_lea.hbm %s9771_s10, 16384  ;;  %s7011_s0 = scalar_lea.hbm %s9882_s6, 32768 }
0x158f   : > { %p7008_p0 = scmp.ne.s32.totalorder %s9771_s10, %s7007_s19  ;;  %p7012_p3 = scmp.lt.u32.totalorder %s9771_s10, %s9882_s6 }
0x1590   : > { %p7013_p4 = scmp.lt.u32.totalorder %s7011_s0, %s7007_s19  ;;  %p7015_p8 = scmp.lt.u32.totalorder %s7007_s19, %s9771_s10 }
0x1591   : > { %p7009_p1 = pnand %p7008_p0, %p7149_p5 }
0x1592   : > { %p7014_p7 = por %p7013_p4, %p7012_p3 }
0x1593   : > { %p7010_p2 = pneg %p7009_p1 }
0x1594   : > { %p7016_p9 = por %p7015_p8, %p7014_p7 }
0x1596   : > { %p7017_p10 = pnand %p7016_p9, %p7010_p2 }
0x1598   : > { %7020 = shalt.err (!%p7017_p10)
}
0x1599   : > { %6312 = dma.vmem_to_hbm [thread:$0]  (%p7149_p5), %s9773_s26, 16384, %s9771_s10, %s9805_s16, %s7070_s1, %s7070_s1, %s7071_s13  }
0x159a PF: > { %p6326_p11 = scmp.ge.s32.totalorder %s7059_s24, 2  ;;  %s5082_s18 = sand.u32 1, %s7047_s21  }
0x159b   : > { %s5083_s29 = scalar_lea.sflag [#allocation4], %s5082_s18 }
0x159c   : > { %p6317_p12 = pnand %p6326_p11, %p7153_p6 }
0x159e   : > { %7038 = dma.done.wait (!%p6317_p12), %s5083_s29, 2048  }
0x159f   : > { %7040 = vsyncadd (!%p6317_p12), %s5083_s29, 4294965248  ;;  %s10248_s7 = sadd.s32 4294967294, %s7059_s24  }
0x15a0   : > { %s5091_s14 = sand.u32 1, %s10248_s7  }
0x15a1   : > { %s5092_s15 = scalar_lea.sflag [#allocation6], %s5091_s14 }
0x15a2   : > { %7042 = dma.done.wait (!%p6317_p12), %s5092_s15, 18432  }
0x15a3   : > { %7044 = vsyncadd (!%p6317_p12), %s5092_s15, 4294948864  ;;  %p20_p5 = scmp.ge.s32.totalorder %s7134_s27, 4   ;;  %s10249_s21 = smov %s7051_s22 }
0x15a4   : > { %s10250_s22 = smov %s7055_s23  ;;  %s10251_s23 = smov %s7147_s30 }
0x15a5   : > { %s10252_s24 = smov %s7134_s27  ;;  %22 = sbr.rel (!%p20_p5) target bundleno = 8 (0x8), region = 110 }
0x15ac   :  { %5106 = vsyncpa [#allocation4], 1 }
0x15ad   :  { %5108 = vsyncpa [#allocation4 + $0x1], 1 }
0x15ae   :  { %5109 = vsyncpa [#allocation6], 1 }
0x15af   :  { %5111 = vsyncpa [#allocation6 + $0x1], 1 }

</bundles_post_ra>
